<compile_context>
chip_gen: v7x
topology: tpu7x:2x2x1
jax: 0.10.0
libtpu: 0.0.40
codegen_flags: <defaults>
</compile_context>

<pallas_src>
import jax
import jax.numpy as jnp
from jax.experimental import pallas as pl
from jax.experimental.pallas import tpu as pltpu


_FC_LANES = 128   # fc hidden widths zero-padded to this (lane-dense matmuls)

_COMPILER_PARAMS = pltpu.CompilerParams(vmem_limit_bytes=32 * 1024 * 1024)


def _vmem():
    return pl.BlockSpec(memory_space=pltpu.MemorySpace.VMEM)


def _round_up(n, m):
    return ((n + m - 1) // m) * m


def _pad_axis_to(a, axis, size):
    pad = [(0, 0)] * a.ndim
    pad[axis] = (0, size - a.shape[axis])
    return jnp.pad(a, pad)


# ----------------------------------------------------------------------------
# Pallas kernels (no grid: single block, everything resident in VMEM)
# ----------------------------------------------------------------------------
def _conv1_pool_kernel(p_ref, w_ref, b_ref, o_ref):
    """conv1 (im2col matmul) + 2x2 max-pool + bias + ReLU, one MXU dot.

    p_ref: (4*R, 25) patch rows, the 4 pooling phases stacked along rows
           (R is a multiple of 8 => aligned phase slices).
    w_ref: (25, 6); b_ref: (1, 6); o_ref: (R, 6), rows ordered (b, hp, wp).
    Uses relu(max_phase(P @ W) + b) == maxpool2x2(relu(conv + b)).
    """
    m = jnp.dot(p_ref[...], w_ref[...], preferred_element_type=jnp.float32)
    r = o_ref.shape[0]
    m = jnp.maximum(jnp.maximum(m[0:r], m[r:2 * r]),
                    jnp.maximum(m[2 * r:3 * r], m[3 * r:4 * r]))
    o_ref[...] = jnp.maximum(m + b_ref[...], 0.0).astype(o_ref.dtype)


def _conv2_fc_kernel(p_ref, w2_ref, b2_ref, wf1_ref, bf1_ref, wf2_ref, bf2_ref,
                     wf3_ref, bf3_ref, o_ref):
    """conv2 block + fc1 + fc2 + fc3 fused; intermediates never leave VMEM.

    p_ref  : (4*25*G, 150) conv2 patch rows; the 4 pooling phases are stacked
             along rows; inside a phase, rows are (spatial position hw,
             batch slot g) with G (multiple of 8) slots per position (slots
             >= B are zero padding).
    wf1_ref: (25, 16, 128) fc1 weights regrouped per spatial position, so the
             conv2->fc1 flatten is 25 aligned accumulating (G,16)@(16,128)
             dots instead of an in-kernel relayout reshape.
    wf2_ref: (128, 128); wf3_ref: (128, 10).  o_ref: (B, 10).
    """
    n_hw = wf1_ref.shape[0]                       # 25 spatial positions (5x5)
    rows = p_ref.shape[0] // 4                    # 25 * G
    grp = rows // n_hw                            # G, multiple of 8

    # conv2: ONE dot for all 4 pooling phases, then aligned row-slice max.
    m = jnp.dot(p_ref[...], w2_ref[...], preferred_element_type=jnp.float32)
    m = jnp.maximum(jnp.maximum(m[0:rows], m[rows:2 * rows]),
                    jnp.maximum(m[2 * rows:3 * rows], m[3 * rows:4 * rows]))
    a2 = jnp.maximum(m + b2_ref[...], 0.0)        # (25*G, 16)

    # fc1: contract over (position, channel) without ever forming (B, 400).
    acc = jnp.zeros((grp, wf1_ref.shape[2]), jnp.float32)
    for hw in range(n_hw):                        # static unroll, aligned slices
        acc = acc + jnp.dot(a2[hw * grp:(hw + 1) * grp, :], wf1_ref[hw],
                            preferred_element_type=jnp.float32)
    h = jnp.maximum(acc + bf1_ref[...], 0.0)      # (G, 128) lane-dense
    h = jnp.maximum(jnp.dot(h, wf2_ref[...], preferred_element_type=jnp.float32)
                    + bf2_ref[...], 0.0)          # (G, 128)
    y = jnp.dot(h, wf3_ref[...], preferred_element_type=jnp.float32) + bf3_ref[...]
    o_ref[...] = y[0:o_ref.shape[0], :].astype(o_ref.dtype)


# ----------------------------------------------------------------------------
# Wrappers (thin XLA glue: layout + patch extraction only)
# ----------------------------------------------------------------------------
def _phase_patches(x_nhwc, k):
    """VALID stride-1 im2col, pre-split into the 4 pooling phases.

    Returns a list of 4 arrays (B, Ho//2, Wo//2, k*k*C), phases ordered
    (p, q) in {0,1}^2; patch columns ordered (dh, dw, c).
    """
    B, H, W, C = x_nhwc.shape
    Ho, Wo = H - k + 1, W - k + 1
    cols = [x_nhwc[:, dh:dh + Ho, dw:dw + Wo, :]
            for dh in range(k) for dw in range(k)]
    patches = jnp.concatenate(cols, axis=-1)              # (B, Ho, Wo, k*k*C)
    return [patches[:, p:Ho:2, q:Wo:2, :] for p in (0, 1) for q in (0, 1)]


def prepare_params(p):
    """One-time weight/bias layout prep (hoisted out of the forward pass)."""
    O1, C1, k1, _ = p["conv1_w"].shape                    # (6, 1, 5, 5)
    O2, C2, k2, _ = p["conv2_w"].shape                    # (16, 6, 5, 5)
    # conv weights: rows ordered (dh, dw, c_in) to match the im2col columns.
    w1 = jnp.transpose(p["conv1_w"], (2, 3, 1, 0)).reshape(k1 * k1 * C1, O1)
    w2 = jnp.transpose(p["conv2_w"], (2, 3, 1, 0)).reshape(k2 * k2 * C2, O2)
    # fc1: torch flattens (B,16,5,5) as f = c*25 + hw; regroup rows per spatial
    # position hw -> (25, 16, 120), then zero-pad the 120/84 widths to 128 so
    # every fc matmul inside the kernel is lane-dense.
    fc1 = jnp.transpose(p["fc1_w"].reshape(120, 16, 25), (2, 1, 0))
    fc1 = _pad_axis_to(fc1, 2, _FC_LANES)                                 # (25,16,128)
    fc1_b = _pad_axis_to(p["fc1_b"], 0, _FC_LANES).reshape(1, _FC_LANES)
    fc2 = _pad_axis_to(_pad_axis_to(p["fc2_w"].T, 0, _FC_LANES), 1, _FC_LANES)  # (128,128)
    fc2_b = _pad_axis_to(p["fc2_b"], 0, _FC_LANES).reshape(1, _FC_LANES)
    fc3 = _pad_axis_to(p["fc3_w"].T, 0, _FC_LANES)                        # (128,10)
    fc3_b = p["fc3_b"].reshape(1, 10)
    return {"w1": w1, "b1": p["conv1_b"].reshape(1, O1),
            "w2": w2, "b2": p["conv2_b"].reshape(1, O2),
            "fc1_w": fc1, "fc1_b": fc1_b,
            "fc2_w": fc2, "fc2_b": fc2_b,
            "fc3_w": fc3, "fc3_b": fc3_b}


def net_forward(x_nchw, pp):
    B = x_nchw.shape[0]
    f32 = jnp.float32
    x = jnp.transpose(x_nchw, (0, 2, 3, 1))               # NCHW -> NHWC (B,32,32,1)

    # ---- kernel 1: conv1 + bias + ReLU + 2x2 max-pool ------------------------
    r1 = B * 14 * 14
    r1p = _round_up(r1, 8)                                # aligned phase slices
    ph1 = [ph.reshape(r1, 25) for ph in _phase_patches(x, 5)]   # rows (b,hp,wp)
    if r1p != r1:
        ph1 = [jnp.pad(ph, ((0, r1p - r1), (0, 0))) for ph in ph1]
    p1 = jnp.concatenate(ph1, axis=0)                     # (4*r1p, 25)
    a1 = pl.pallas_call(
        _conv1_pool_kernel,
        out_shape=jax.ShapeDtypeStruct((r1p, 6), f32),
        in_specs=[_vmem()] * 3,
        out_specs=_vmem(),
        compiler_params=_COMPILER_PARAMS,
        cost_estimate=pl.CostEstimate(
            flops=2 * 4 * r1p * 25 * 6, transcendentals=0,
            bytes_accessed=4 * (4 * r1p * 25 + 25 * 6 + 6 + r1p * 6)),
    )(p1, pp["w1"], pp["b1"])
    a1 = a1[:r1].reshape(B, 14, 14, 6)                    # (B,14,14,6) NHWC

    # ---- kernel 2: conv2 block + fc1 + fc2 + fc3, fully fused ----------------
    G = _round_up(B, 8)                                   # batch slots / position
    ph2 = []
    for ph in _phase_patches(a1, 5):                      # each (B,5,5,150)
        ph = jnp.transpose(ph, (1, 2, 0, 3)).reshape(25, B, 150)
        ph = jnp.pad(ph, ((0, 0), (0, G - B), (0, 0)))    # (25, G, 150)
        ph2.append(ph.reshape(25 * G, 150))               # rows (hw, batch slot)
    p2 = jnp.concatenate(ph2, axis=0)                     # (4*25*G, 150)

    flops2 = 2 * (4 * 25 * G * 150 * 16 + 25 * G * 16 * _FC_LANES
                  + G * _FC_LANES * _FC_LANES + G * _FC_LANES * 10)
    bytes2 = 4 * (p2.size + 150 * 16 + 16 + 25 * 16 * _FC_LANES + _FC_LANES
                  + _FC_LANES * _FC_LANES + _FC_LANES + _FC_LANES * 10 + 10
                  + B * 10)
    return pl.pallas_call(
        _conv2_fc_kernel,
        out_shape=jax.ShapeDtypeStruct((B, 10), f32),
        in_specs=[_vmem()] * 9,
        out_specs=_vmem(),
        compiler_params=_COMPILER_PARAMS,
        cost_estimate=pl.CostEstimate(flops=int(flops2), transcendentals=0,
                                      bytes_accessed=int(bytes2)),
    )(p2, pp["w2"], pp["b2"], pp["fc1_w"], pp["fc1_b"],
      pp["fc2_w"], pp["fc2_b"], pp["fc3_w"], pp["fc3_b"])


# ----------------------------------------------------------------------------
# Deterministic parameters + pure-JAX reference (torch semantics)
# ----------------------------------------------------------------------------
def init_params(key):
    ks = jax.random.split(key, 10)
    w = lambda k, s, sc: sc * jax.random.normal(k, s, dtype=jnp.float32)
    return {
        "conv1_w": w(ks[0], (6, 1, 5, 5), 0.5),  "conv1_b": w(ks[1], (6,),   0.1),
        "conv2_w": w(ks[2], (16, 6, 5, 5), 0.2), "conv2_b": w(ks[3], (16,),  0.1),
        "fc1_w":   w(ks[4], (120, 400), 0.1),    "fc1_b":   w(ks[5], (120,), 0.1),
        "fc2_w":   w(ks[6], (84, 120), 0.15),    "fc2_b":   w(ks[7], (84,),  0.1),
        "fc3_w":   w(ks[8], (10, 84), 0.3),      "fc3_b":   w(ks[9], (10,),  0.1),
    }


def reference_forward(x_nchw, p, precision):
    dn = ("NCHW", "OIHW", "NCHW")
    y = jax.lax.conv_general_dilated(x_nchw, p["conv1_w"], (1, 1), "VALID",
                                     dimension_numbers=dn, precision=precision)
    y = jnp.maximum(y + p["conv1_b"].reshape(1, -1, 1, 1), 0.0)
    y = jax.lax.reduce_window(y, -jnp.inf, jax.lax.max,
                              (1, 1, 2, 2), (1, 1, 2, 2), "VALID")
    y = jax.lax.conv_general_dilated(y, p["conv2_w"], (1, 1), "VALID",
                                     dimension_numbers=dn, precision=precision)
    y = jnp.maximum(y + p["conv2_b"].reshape(1, -1, 1, 1), 0.0)
    y = jax.lax.reduce_window(y, -jnp.inf, jax.lax.max,
                              (1, 1, 2, 2), (1, 1, 2, 2), "VALID")
    y = y.reshape(y.shape[0], -1)                          # torch NCHW flatten
    y = jnp.maximum(jnp.dot(y, p["fc1_w"].T, precision=precision) + p["fc1_b"], 0.0)
    y = jnp.maximum(jnp.dot(y, p["fc2_w"].T, precision=precision) + p["fc2_b"], 0.0)
    return jnp.dot(y, p["fc3_w"].T, precision=precision) + p["fc3_b"]


if __name__ == "__main__":
    key = jax.random.PRNGKey(0)
    pkey, xkey = jax.random.split(key)
    params = init_params(pkey)
    # LeNet forward requires 32x32 single-channel input (flatten = 16*5*5 = 400).
    x = jax.random.normal(xkey, (2, 1, 32, 32), dtype=jnp.float32)

    prepped = prepare_params(params)                       # one-time layout prep
    fwd = jax.jit(net_forward)
    out = jax.block_until_ready(fwd(x, prepped))
    assert out.shape == (2, 10) and out.dtype == jnp.float32

    # Tolerance tightened 50x (5e-2 -> 1e-3 relative).  XLA's default f32 dot
    # precision on TPU and Mosaic's MXU pass count can differ, so accept a
    # tight match against EITHER the HIGHEST- or DEFAULT-precision reference;
    # a real layout/indexing bug would miss both by orders of magnitude.
    ref_hi = jax.block_until_ready(
        reference_forward(x, params, jax.lax.Precision.HIGHEST))
    ref_lo = jax.block_until_ready(
        reference_forward(x, params, jax.lax.Precision.DEFAULT))
    err = min(float(jnp.max(jnp.abs(out - ref_hi))),
              float(jnp.max(jnp.abs(out - ref_lo))))
    tol = 1e-3 * (1.0 + float(jnp.max(jnp.abs(ref_hi))))
    if err > tol:
        raise AssertionError(
            f"Pallas output mismatch vs reference: max abs err {err} > tol {tol}")
    print("KERNEL_OK")
</pallas_src>

<mosaic_0001>
module attributes {stable_mosaic.version = 11 : i64} {
  func.func @_conv1_pool_kernel(%arg0: memref<1568x25xf32, #tpu.memory_space<vmem>>, %arg1: memref<25x6xf32, #tpu.memory_space<vmem>>, %arg2: memref<1x6xf32, #tpu.memory_space<vmem>>, %arg3: memref<392x6xf32, #tpu.memory_space<vmem>>) attributes {dimension_semantics = [], scalar_prefetch = 0 : i64, scratch_operands = 0 : i64, tpu.core_type = #tpu.core_type<tc>} {
    %c0 = arith.constant 0 : index
    %c0_0 = arith.constant 0 : index
    %0 = vector.load %arg0[%c0, %c0_0] : memref<1568x25xf32, #tpu.memory_space<vmem>>, vector<1568x25xf32>
    %c0_1 = arith.constant 0 : index
    %c0_2 = arith.constant 0 : index
    %1 = vector.load %arg1[%c0_1, %c0_2] : memref<25x6xf32, #tpu.memory_space<vmem>>, vector<25x6xf32>
    %cst = arith.constant dense<0.000000e+00> : vector<1568x6xf32>
    %2 = tpu.matmul %0, %1, %cst {dimension_numbers = #tpu.dot_dimension_numbers<[1], [0], [0], [1], [0, 0, 1, 1], [], []>} : vector<1568x25xf32>, vector<25x6xf32>, vector<1568x6xf32> -> vector<1568x6xf32>
    %3 = vector.extract_strided_slice %2 {offsets = [0, 0], sizes = [392, 6], strides = [1, 1]} : vector<1568x6xf32> to vector<392x6xf32>
    %4 = vector.extract_strided_slice %2 {offsets = [392, 0], sizes = [392, 6], strides = [1, 1]} : vector<1568x6xf32> to vector<392x6xf32>
    %5 = arith.maximumf %3, %4 : vector<392x6xf32>
    %6 = vector.extract_strided_slice %2 {offsets = [784, 0], sizes = [392, 6], strides = [1, 1]} : vector<1568x6xf32> to vector<392x6xf32>
    %7 = vector.extract_strided_slice %2 {offsets = [1176, 0], sizes = [392, 6], strides = [1, 1]} : vector<1568x6xf32> to vector<392x6xf32>
    %8 = arith.maximumf %6, %7 : vector<392x6xf32>
    %9 = arith.maximumf %5, %8 : vector<392x6xf32>
    %c0_3 = arith.constant 0 : index
    %c0_4 = arith.constant 0 : index
    %10 = vector.load %arg2[%c0_3, %c0_4] : memref<1x6xf32, #tpu.memory_space<vmem>>, vector<1x6xf32>
    %11 = vector.broadcast %10 : vector<1x6xf32> to vector<392x6xf32>
    %12 = arith.addf %9, %11 : vector<392x6xf32>
    %cst_5 = arith.constant 0.000000e+00 : f32
    %13 = vector.broadcast %cst_5 : f32 to vector<392x6xf32>
    %14 = arith.maximumf %12, %13 : vector<392x6xf32>
    %c0_6 = arith.constant 0 : index
    %c0_7 = arith.constant 0 : index
    %15 = vector.load %arg3[%c0_6, %c0_7] : memref<392x6xf32, #tpu.memory_space<vmem>>, vector<392x6xf32>
    tpu.vector_store %arg3[%c0_6, %c0_7], %14 {strides = array<i32>} : memref<392x6xf32, #tpu.memory_space<vmem>>, vector<392x6xf32>,
    return
  }
}

module attributes {stable_mosaic.version = 11 : i64} {
  func.func @_conv2_fc_kernel(%arg0: memref<800x150xf32, #tpu.memory_space<vmem>>, %arg1: memref<150x16xf32, #tpu.memory_space<vmem>>, %arg2: memref<1x16xf32, #tpu.memory_space<vmem>>, %arg3: memref<25x16x128xf32, #tpu.memory_space<vmem>>, %arg4: memref<1x128xf32, #tpu.memory_space<vmem>>, %arg5: memref<128x128xf32, #tpu.memory_space<vmem>>, %arg6: memref<1x128xf32, #tpu.memory_space<vmem>>, %arg7: memref<128x10xf32, #tpu.memory_space<vmem>>, %arg8: memref<1x10xf32, #tpu.memory_space<vmem>>, %arg9: memref<2x10xf32, #tpu.memory_space<vmem>>) attributes {dimension_semantics = [], scalar_prefetch = 0 : i64, scratch_operands = 0 : i64, tpu.core_type = #tpu.core_type<tc>} {
    %c0 = arith.constant 0 : index
    %c0_0 = arith.constant 0 : index
    %0 = vector.load %arg0[%c0, %c0_0] : memref<800x150xf32, #tpu.memory_space<vmem>>, vector<800x150xf32>
    %c0_1 = arith.constant 0 : index
    %c0_2 = arith.constant 0 : index
    %1 = vector.load %arg1[%c0_1, %c0_2] : memref<150x16xf32, #tpu.memory_space<vmem>>, vector<150x16xf32>
    %cst = arith.constant dense<0.000000e+00> : vector<800x16xf32>
    %2 = tpu.matmul %0, %1, %cst {dimension_numbers = #tpu.dot_dimension_numbers<[1], [0], [0], [1], [0, 0, 1, 1], [], []>} : vector<800x150xf32>, vector<150x16xf32>, vector<800x16xf32> -> vector<800x16xf32>
    %3 = vector.extract_strided_slice %2 {offsets = [0, 0], sizes = [200, 16], strides = [1, 1]} : vector<800x16xf32> to vector<200x16xf32>
    %4 = vector.extract_strided_slice %2 {offsets = [200, 0], sizes = [200, 16], strides = [1, 1]} : vector<800x16xf32> to vector<200x16xf32>
    %5 = arith.maximumf %3, %4 : vector<200x16xf32>
    %6 = vector.extract_strided_slice %2 {offsets = [400, 0], sizes = [200, 16], strides = [1, 1]} : vector<800x16xf32> to vector<200x16xf32>
    %7 = vector.extract_strided_slice %2 {offsets = [600, 0], sizes = [200, 16], strides = [1, 1]} : vector<800x16xf32> to vector<200x16xf32>
    %8 = arith.maximumf %6, %7 : vector<200x16xf32>
    %9 = arith.maximumf %5, %8 : vector<200x16xf32>
    %c0_3 = arith.constant 0 : index
    %c0_4 = arith.constant 0 : index
    %10 = vector.load %arg2[%c0_3, %c0_4] : memref<1x16xf32, #tpu.memory_space<vmem>>, vector<1x16xf32>
    %11 = vector.broadcast %10 : vector<1x16xf32> to vector<200x16xf32>
    %12 = arith.addf %9, %11 : vector<200x16xf32>
    %cst_5 = arith.constant 0.000000e+00 : f32
    %13 = vector.broadcast %cst_5 : f32 to vector<200x16xf32>
    %14 = arith.maximumf %12, %13 : vector<200x16xf32>
    %cst_6 = arith.constant 0.000000e+00 : f32
    %15 = vector.broadcast %cst_6 : f32 to vector<8x128xf32>
    %16 = vector.extract_strided_slice %14 {offsets = [0, 0], sizes = [8, 16], strides = [1, 1]} : vector<200x16xf32> to vector<8x16xf32>
    %c0_7 = arith.constant 0 : index
    %c0_8 = arith.constant 0 : index
    %c0_9 = arith.constant 0 : index
    %17 = vector.load %arg3[%c0_7, %c0_8, %c0_9] : memref<25x16x128xf32, #tpu.memory_space<vmem>>, vector<1x16x128xf32>
    %18 = vector.shape_cast %17 : vector<1x16x128xf32> to vector<16x128xf32>
    %cst_10 = arith.constant dense<0.000000e+00> : vector<8x128xf32>
    %19 = tpu.matmul %16, %18, %cst_10 {dimension_numbers = #tpu.dot_dimension_numbers<[1], [0], [0], [1], [0, 0, 1, 1], [], []>} : vector<8x16xf32>, vector<16x128xf32>, vector<8x128xf32> -> vector<8x128xf32>
    %20 = arith.addf %15, %19 : vector<8x128xf32>
    %21 = vector.extract_strided_slice %14 {offsets = [8, 0], sizes = [8, 16], strides = [1, 1]} : vector<200x16xf32> to vector<8x16xf32>
    %c1 = arith.constant 1 : index
    %c0_11 = arith.constant 0 : index
    %c0_12 = arith.constant 0 : index
    %22 = vector.load %arg3[%c1, %c0_11, %c0_12] : memref<25x16x128xf32, #tpu.memory_space<vmem>>, vector<1x16x128xf32>
    %23 = vector.shape_cast %22 : vector<1x16x128xf32> to vector<16x128xf32>
    %cst_13 = arith.constant dense<0.000000e+00> : vector<8x128xf32>
    %24 = tpu.matmul %21, %23, %cst_13 {dimension_numbers = #tpu.dot_dimension_numbers<[1], [0], [0], [1], [0, 0, 1, 1], [], []>} : vector<8x16xf32>, vector<16x128xf32>, vector<8x128xf32> -> vector<8x128xf32>
    %25 = arith.addf %20, %24 : vector<8x128xf32>
    %26 = vector.extract_strided_slice %14 {offsets = [16, 0], sizes = [8, 16], strides = [1, 1]} : vector<200x16xf32> to vector<8x16xf32>
    %c2 = arith.constant 2 : index
    %c0_14 = arith.constant 0 : index
    %c0_15 = arith.constant 0 : index
    %27 = vector.load %arg3[%c2, %c0_14, %c0_15] : memref<25x16x128xf32, #tpu.memory_space<vmem>>, vector<1x16x128xf32>
    %28 = vector.shape_cast %27 : vector<1x16x128xf32> to vector<16x128xf32>
    %cst_16 = arith.constant dense<0.000000e+00> : vector<8x128xf32>
    %29 = tpu.matmul %26, %28, %cst_16 {dimension_numbers = #tpu.dot_dimension_numbers<[1], [0], [0], [1], [0, 0, 1, 1], [], []>} : vector<8x16xf32>, vector<16x128xf32>, vector<8x128xf32> -> vector<8x128xf32>
    %30 = arith.addf %25, %29 : vector<8x128xf32>
    %31 = vector.extract_strided_slice %14 {offsets = [24, 0], sizes = [8, 16], strides = [1, 1]} : vector<200x16xf32> to vector<8x16xf32>
    %c3 = arith.constant 3 : index
    %c0_17 = arith.constant 0 : index
    %c0_18 = arith.constant 0 : index
    %32 = vector.load %arg3[%c3, %c0_17, %c0_18] : memref<25x16x128xf32, #tpu.memory_space<vmem>>, vector<1x16x128xf32>
    %33 = vector.shape_cast %32 : vector<1x16x128xf32> to vector<16x128xf32>
    %cst_19 = arith.constant dense<0.000000e+00> : vector<8x128xf32>
    %34 = tpu.matmul %31, %33, %cst_19 {dimension_numbers = #tpu.dot_dimension_numbers<[1], [0], [0], [1], [0, 0, 1, 1], [], []>} : vector<8x16xf32>, vector<16x128xf32>, vector<8x128xf32> -> vector<8x128xf32>
    %35 = arith.addf %30, %34 : vector<8x128xf32>
    %36 = vector.extract_strided_slice %14 {offsets = [32, 0], sizes = [8, 16], strides = [1, 1]} : vector<200x16xf32> to vector<8x16xf32>
    %c4 = arith.constant 4 : index
    %c0_20 = arith.constant 0 : index
    %c0_21 = arith.constant 0 : index
    %37 = vector.load %arg3[%c4, %c0_20, %c0_21] : memref<25x16x128xf32, #tpu.memory_space<vmem>>, vector<1x16x128xf32>
    %38 = vector.shape_cast %37 : vector<1x16x128xf32> to vector<16x128xf32>
    %cst_22 = arith.constant dense<0.000000e+00> : vector<8x128xf32>
    %39 = tpu.matmul %36, %38, %cst_22 {dimension_numbers = #tpu.dot_dimension_numbers<[1], [0], [0], [1], [0, 0, 1, 1], [], []>} : vector<8x16xf32>, vector<16x128xf32>, vector<8x128xf32> -> vector<8x128xf32>
    %40 = arith.addf %35, %39 : vector<8x128xf32>
    %41 = vector.extract_strided_slice %14 {offsets = [40, 0], sizes = [8, 16], strides = [1, 1]} : vector<200x16xf32> to vector<8x16xf32>
    %c5 = arith.constant 5 : index
    %c0_23 = arith.constant 0 : index
    %c0_24 = arith.constant 0 : index
    %42 = vector.load %arg3[%c5, %c0_23, %c0_24] : memref<25x16x128xf32, #tpu.memory_space<vmem>>, vector<1x16x128xf32>
    %43 = vector.shape_cast %42 : vector<1x16x128xf32> to vector<16x128xf32>
    %cst_25 = arith.constant dense<0.000000e+00> : vector<8x128xf32>
    %44 = tpu.matmul %41, %43, %cst_25 {dimension_numbers = #tpu.dot_dimension_numbers<[1], [0], [0], [1], [0, 0, 1, 1], [], []>} : vector<8x16xf32>, vector<16x128xf32>, vector<8x128xf32> -> vector<8x128xf32>
    %45 = arith.addf %40, %44 : vector<8x128xf32>
    %46 = vector.extract_strided_slice %14 {offsets = [48, 0], sizes = [8, 16], strides = [1, 1]} : vector<200x16xf32> to vector<8x16xf32>
    %c6 = arith.constant 6 : index
    %c0_26 = arith.constant 0 : index
    %c0_27 = arith.constant 0 : index
    %47 = vector.load %arg3[%c6, %c0_26, %c0_27] : memref<25x16x128xf32, #tpu.memory_space<vmem>>, vector<1x16x128xf32>
    %48 = vector.shape_cast %47 : vector<1x16x128xf32> to vector<16x128xf32>
    %cst_28 = arith.constant dense<0.000000e+00> : vector<8x128xf32>
    %49 = tpu.matmul %46, %48, %cst_28 {dimension_numbers = #tpu.dot_dimension_numbers<[1], [0], [0], [1], [0, 0, 1, 1], [], []>} : vector<8x16xf32>, vector<16x128xf32>, vector<8x128xf32> -> vector<8x128xf32>
    %50 = arith.addf %45, %49 : vector<8x128xf32>
    %51 = vector.extract_strided_slice %14 {offsets = [56, 0], sizes = [8, 16], strides = [1, 1]} : vector<200x16xf32> to vector<8x16xf32>
    %c7 = arith.constant 7 : index
    %c0_29 = arith.constant 0 : index
    %c0_30 = arith.constant 0 : index
    %52 = vector.load %arg3[%c7, %c0_29, %c0_30] : memref<25x16x128xf32, #tpu.memory_space<vmem>>, vector<1x16x128xf32>
    %53 = vector.shape_cast %52 : vector<1x16x128xf32> to vector<16x128xf32>
    %cst_31 = arith.constant dense<0.000000e+00> : vector<8x128xf32>
    %54 = tpu.matmul %51, %53, %cst_31 {dimension_numbers = #tpu.dot_dimension_numbers<[1], [0], [0], [1], [0, 0, 1, 1], [], []>} : vector<8x16xf32>, vector<16x128xf32>, vector<8x128xf32> -> vector<8x128xf32>
    %55 = arith.addf %50, %54 : vector<8x128xf32>
    %56 = vector.extract_strided_slice %14 {offsets = [64, 0], sizes = [8, 16], strides = [1, 1]} : vector<200x16xf32> to vector<8x16xf32>
    %c8 = arith.constant 8 : index
    %c0_32 = arith.constant 0 : index
    %c0_33 = arith.constant 0 : index
    %57 = vector.load %arg3[%c8, %c0_32, %c0_33] : memref<25x16x128xf32, #tpu.memory_space<vmem>>, vector<1x16x128xf32>
    %58 = vector.shape_cast %57 : vector<1x16x128xf32> to vector<16x128xf32>
    %cst_34 = arith.constant dense<0.000000e+00> : vector<8x128xf32>
    %59 = tpu.matmul %56, %58, %cst_34 {dimension_numbers = #tpu.dot_dimension_numbers<[1], [0], [0], [1], [0, 0, 1, 1], [], []>} : vector<8x16xf32>, vector<16x128xf32>, vector<8x128xf32> -> vector<8x128xf32>
    %60 = arith.addf %55, %59 : vector<8x128xf32>
    %61 = vector.extract_strided_slice %14 {offsets = [72, 0], sizes = [8, 16], strides = [1, 1]} : vector<200x16xf32> to vector<8x16xf32>
    %c9 = arith.constant 9 : index
    %c0_35 = arith.constant 0 : index
    %c0_36 = arith.constant 0 : index
    %62 = vector.load %arg3[%c9, %c0_35, %c0_36] : memref<25x16x128xf32, #tpu.memory_space<vmem>>, vector<1x16x128xf32>
    %63 = vector.shape_cast %62 : vector<1x16x128xf32> to vector<16x128xf32>
    %cst_37 = arith.constant dense<0.000000e+00> : vector<8x128xf32>
    %64 = tpu.matmul %61, %63, %cst_37 {dimension_numbers = #tpu.dot_dimension_numbers<[1], [0], [0], [1], [0, 0, 1, 1], [], []>} : vector<8x16xf32>, vector<16x128xf32>, vector<8x128xf32> -> vector<8x128xf32>
    %65 = arith.addf %60, %64 : vector<8x128xf32>
    %66 = vector.extract_strided_slice %14 {offsets = [80, 0], sizes = [8, 16], strides = [1, 1]} : vector<200x16xf32> to vector<8x16xf32>
    %c10 = arith.constant 10 : index
    %c0_38 = arith.constant 0 : index
    %c0_39 = arith.constant 0 : index
    %67 = vector.load %arg3[%c10, %c0_38, %c0_39] : memref<25x16x128xf32, #tpu.memory_space<vmem>>, vector<1x16x128xf32>
    %68 = vector.shape_cast %67 : vector<1x16x128xf32> to vector<16x128xf32>
    %cst_40 = arith.constant dense<0.000000e+00> : vector<8x128xf32>
    %69 = tpu.matmul %66, %68, %cst_40 {dimension_numbers = #tpu.dot_dimension_numbers<[1], [0], [0], [1], [0, 0, 1, 1], [], []>} : vector<8x16xf32>, vector<16x128xf32>, vector<8x128xf32> -> vector<8x128xf32>
    %70 = arith.addf %65, %69 : vector<8x128xf32>
    %71 = vector.extract_strided_slice %14 {offsets = [88, 0], sizes = [8, 16], strides = [1, 1]} : vector<200x16xf32> to vector<8x16xf32>
    %c11 = arith.constant 11 : index
    %c0_41 = arith.constant 0 : index
    %c0_42 = arith.constant 0 : index
    %72 = vector.load %arg3[%c11, %c0_41, %c0_42] : memref<25x16x128xf32, #tpu.memory_space<vmem>>, vector<1x16x128xf32>
    %73 = vector.shape_cast %72 : vector<1x16x128xf32> to vector<16x128xf32>
    %cst_43 = arith.constant dense<0.000000e+00> : vector<8x128xf32>
    %74 = tpu.matmul %71, %73, %cst_43 {dimension_numbers = #tpu.dot_dimension_numbers<[1], [0], [0], [1], [0, 0, 1, 1], [], []>} : vector<8x16xf32>, vector<16x128xf32>, vector<8x128xf32> -> vector<8x128xf32>
    %75 = arith.addf %70, %74 : vector<8x128xf32>
    %76 = vector.extract_strided_slice %14 {offsets = [96, 0], sizes = [8, 16], strides = [1, 1]} : vector<200x16xf32> to vector<8x16xf32>
    %c12 = arith.constant 12 : index
    %c0_44 = arith.constant 0 : index
    %c0_45 = arith.constant 0 : index
    %77 = vector.load %arg3[%c12, %c0_44, %c0_45] : memref<25x16x128xf32, #tpu.memory_space<vmem>>, vector<1x16x128xf32>
    %78 = vector.shape_cast %77 : vector<1x16x128xf32> to vector<16x128xf32>
    %cst_46 = arith.constant dense<0.000000e+00> : vector<8x128xf32>
    %79 = tpu.matmul %76, %78, %cst_46 {dimension_numbers = #tpu.dot_dimension_numbers<[1], [0], [0], [1], [0, 0, 1, 1], [], []>} : vector<8x16xf32>, vector<16x128xf32>, vector<8x128xf32> -> vector<8x128xf32>
    %80 = arith.addf %75, %79 : vector<8x128xf32>
    %81 = vector.extract_strided_slice %14 {offsets = [104, 0], sizes = [8, 16], strides = [1, 1]} : vector<200x16xf32> to vector<8x16xf32>
    %c13 = arith.constant 13 : index
    %c0_47 = arith.constant 0 : index
    %c0_48 = arith.constant 0 : index
    %82 = vector.load %arg3[%c13, %c0_47, %c0_48] : memref<25x16x128xf32, #tpu.memory_space<vmem>>, vector<1x16x128xf32>
    %83 = vector.shape_cast %82 : vector<1x16x128xf32> to vector<16x128xf32>
    %cst_49 = arith.constant dense<0.000000e+00> : vector<8x128xf32>
    %84 = tpu.matmul %81, %83, %cst_49 {dimension_numbers = #tpu.dot_dimension_numbers<[1], [0], [0], [1], [0, 0, 1, 1], [], []>} : vector<8x16xf32>, vector<16x128xf32>, vector<8x128xf32> -> vector<8x128xf32>
    %85 = arith.addf %80, %84 : vector<8x128xf32>
    %86 = vector.extract_strided_slice %14 {offsets = [112, 0], sizes = [8, 16], strides = [1, 1]} : vector<200x16xf32> to vector<8x16xf32>
    %c14 = arith.constant 14 : index
    %c0_50 = arith.constant 0 : index
    %c0_51 = arith.constant 0 : index
    %87 = vector.load %arg3[%c14, %c0_50, %c0_51] : memref<25x16x128xf32, #tpu.memory_space<vmem>>, vector<1x16x128xf32>
    %88 = vector.shape_cast %87 : vector<1x16x128xf32> to vector<16x128xf32>
    %cst_52 = arith.constant dense<0.000000e+00> : vector<8x128xf32>
    %89 = tpu.matmul %86, %88, %cst_52 {dimension_numbers = #tpu.dot_dimension_numbers<[1], [0], [0], [1], [0, 0, 1, 1], [], []>} : vector<8x16xf32>, vector<16x128xf32>, vector<8x128xf32> -> vector<8x128xf32>
    %90 = arith.addf %85, %89 : vector<8x128xf32>
    %91 = vector.extract_strided_slice %14 {offsets = [120, 0], sizes = [8, 16], strides = [1, 1]} : vector<200x16xf32> to vector<8x16xf32>
    %c15 = arith.constant 15 : index
    %c0_53 = arith.constant 0 : index
    %c0_54 = arith.constant 0 : index
    %92 = vector.load %arg3[%c15, %c0_53, %c0_54] : memref<25x16x128xf32, #tpu.memory_space<vmem>>, vector<1x16x128xf32>
    %93 = vector.shape_cast %92 : vector<1x16x128xf32> to vector<16x128xf32>
    %cst_55 = arith.constant dense<0.000000e+00> : vector<8x128xf32>
    %94 = tpu.matmul %91, %93, %cst_55 {dimension_numbers = #tpu.dot_dimension_numbers<[1], [0], [0], [1], [0, 0, 1, 1], [], []>} : vector<8x16xf32>, vector<16x128xf32>, vector<8x128xf32> -> vector<8x128xf32>
    %95 = arith.addf %90, %94 : vector<8x128xf32>
    %96 = vector.extract_strided_slice %14 {offsets = [128, 0], sizes = [8, 16], strides = [1, 1]} : vector<200x16xf32> to vector<8x16xf32>
    %c16 = arith.constant 16 : index
    %c0_56 = arith.constant 0 : index
    %c0_57 = arith.constant 0 : index
    %97 = vector.load %arg3[%c16, %c0_56, %c0_57] : memref<25x16x128xf32, #tpu.memory_space<vmem>>, vector<1x16x128xf32>
    %98 = vector.shape_cast %97 : vector<1x16x128xf32> to vector<16x128xf32>
    %cst_58 = arith.constant dense<0.000000e+00> : vector<8x128xf32>
    %99 = tpu.matmul %96, %98, %cst_58 {dimension_numbers = #tpu.dot_dimension_numbers<[1], [0], [0], [1], [0, 0, 1, 1], [], []>} : vector<8x16xf32>, vector<16x128xf32>, vector<8x128xf32> -> vector<8x128xf32>
    %100 = arith.addf %95, %99 : vector<8x128xf32>
    %101 = vector.extract_strided_slice %14 {offsets = [136, 0], sizes = [8, 16], strides = [1, 1]} : vector<200x16xf32> to vector<8x16xf32>
    %c17 = arith.constant 17 : index
    %c0_59 = arith.constant 0 : index
    %c0_60 = arith.constant 0 : index
    %102 = vector.load %arg3[%c17, %c0_59, %c0_60] : memref<25x16x128xf32, #tpu.memory_space<vmem>>, vector<1x16x128xf32>
    %103 = vector.shape_cast %102 : vector<1x16x128xf32> to vector<16x128xf32>
    %cst_61 = arith.constant dense<0.000000e+00> : vector<8x128xf32>
    %104 = tpu.matmul %101, %103, %cst_61 {dimension_numbers = #tpu.dot_dimension_numbers<[1], [0], [0], [1], [0, 0, 1, 1], [], []>} : vector<8x16xf32>, vector<16x128xf32>, vector<8x128xf32> -> vector<8x128xf32>
    %105 = arith.addf %100, %104 : vector<8x128xf32>
    %106 = vector.extract_strided_slice %14 {offsets = [144, 0], sizes = [8, 16], strides = [1, 1]} : vector<200x16xf32> to vector<8x16xf32>
    %c18 = arith.constant 18 : index
    %c0_62 = arith.constant 0 : index
    %c0_63 = arith.constant 0 : index
    %107 = vector.load %arg3[%c18, %c0_62, %c0_63] : memref<25x16x128xf32, #tpu.memory_space<vmem>>, vector<1x16x128xf32>
    %108 = vector.shape_cast %107 : vector<1x16x128xf32> to vector<16x128xf32>
    %cst_64 = arith.constant dense<0.000000e+00> : vector<8x128xf32>
    %109 = tpu.matmul %106, %108, %cst_64 {dimension_numbers = #tpu.dot_dimension_numbers<[1], [0], [0], [1], [0, 0, 1, 1], [], []>} : vector<8x16xf32>, vector<16x128xf32>, vector<8x128xf32> -> vector<8x128xf32>
    %110 = arith.addf %105, %109 : vector<8x128xf32>
    %111 = vector.extract_strided_slice %14 {offsets = [152, 0], sizes = [8, 16], strides = [1, 1]} : vector<200x16xf32> to vector<8x16xf32>
    %c19 = arith.constant 19 : index
    %c0_65 = arith.constant 0 : index
    %c0_66 = arith.constant 0 : index
    %112 = vector.load %arg3[%c19, %c0_65, %c0_66] : memref<25x16x128xf32, #tpu.memory_space<vmem>>, vector<1x16x128xf32>
    %113 = vector.shape_cast %112 : vector<1x16x128xf32> to vector<16x128xf32>
    %cst_67 = arith.constant dense<0.000000e+00> : vector<8x128xf32>
    %114 = tpu.matmul %111, %113, %cst_67 {dimension_numbers = #tpu.dot_dimension_numbers<[1], [0], [0], [1], [0, 0, 1, 1], [], []>} : vector<8x16xf32>, vector<16x128xf32>, vector<8x128xf32> -> vector<8x128xf32>
    %115 = arith.addf %110, %114 : vector<8x128xf32>
    %116 = vector.extract_strided_slice %14 {offsets = [160, 0], sizes = [8, 16], strides = [1, 1]} : vector<200x16xf32> to vector<8x16xf32>
    %c20 = arith.constant 20 : index
    %c0_68 = arith.constant 0 : index
    %c0_69 = arith.constant 0 : index
    %117 = vector.load %arg3[%c20, %c0_68, %c0_69] : memref<25x16x128xf32, #tpu.memory_space<vmem>>, vector<1x16x128xf32>
    %118 = vector.shape_cast %117 : vector<1x16x128xf32> to vector<16x128xf32>
    %cst_70 = arith.constant dense<0.000000e+00> : vector<8x128xf32>
    %119 = tpu.matmul %116, %118, %cst_70 {dimension_numbers = #tpu.dot_dimension_numbers<[1], [0], [0], [1], [0, 0, 1, 1], [], []>} : vector<8x16xf32>, vector<16x128xf32>, vector<8x128xf32> -> vector<8x128xf32>
    %120 = arith.addf %115, %119 : vector<8x128xf32>
    %121 = vector.extract_strided_slice %14 {offsets = [168, 0], sizes = [8, 16], strides = [1, 1]} : vector<200x16xf32> to vector<8x16xf32>
    %c21 = arith.constant 21 : index
    %c0_71 = arith.constant 0 : index
    %c0_72 = arith.constant 0 : index
    %122 = vector.load %arg3[%c21, %c0_71, %c0_72] : memref<25x16x128xf32, #tpu.memory_space<vmem>>, vector<1x16x128xf32>
    %123 = vector.shape_cast %122 : vector<1x16x128xf32> to vector<16x128xf32>
    %cst_73 = arith.constant dense<0.000000e+00> : vector<8x128xf32>
    %124 = tpu.matmul %121, %123, %cst_73 {dimension_numbers = #tpu.dot_dimension_numbers<[1], [0], [0], [1], [0, 0, 1, 1], [], []>} : vector<8x16xf32>, vector<16x128xf32>, vector<8x128xf32> -> vector<8x128xf32>
    %125 = arith.addf %120, %124 : vector<8x128xf32>
    %126 = vector.extract_strided_slice %14 {offsets = [176, 0], sizes = [8, 16], strides = [1, 1]} : vector<200x16xf32> to vector<8x16xf32>
    %c22 = arith.constant 22 : index
    %c0_74 = arith.constant 0 : index
    %c0_75 = arith.constant 0 : index
    %127 = vector.load %arg3[%c22, %c0_74, %c0_75] : memref<25x16x128xf32, #tpu.memory_space<vmem>>, vector<1x16x128xf32>
    %128 = vector.shape_cast %127 : vector<1x16x128xf32> to vector<16x128xf32>
    %cst_76 = arith.constant dense<0.000000e+00> : vector<8x128xf32>
    %129 = tpu.matmul %126, %128, %cst_76 {dimension_numbers = #tpu.dot_dimension_numbers<[1], [0], [0], [1], [0, 0, 1, 1], [], []>} : vector<8x16xf32>, vector<16x128xf32>, vector<8x128xf32> -> vector<8x128xf32>
    %130 = arith.addf %125, %129 : vector<8x128xf32>
    %131 = vector.extract_strided_slice %14 {offsets = [184, 0], sizes = [8, 16], strides = [1, 1]} : vector<200x16xf32> to vector<8x16xf32>
    %c23 = arith.constant 23 : index
    %c0_77 = arith.constant 0 : index
    %c0_78 = arith.constant 0 : index
    %132 = vector.load %arg3[%c23, %c0_77, %c0_78] : memref<25x16x128xf32, #tpu.memory_space<vmem>>, vector<1x16x128xf32>
    %133 = vector.shape_cast %132 : vector<1x16x128xf32> to vector<16x128xf32>
    %cst_79 = arith.constant dense<0.000000e+00> : vector<8x128xf32>
    %134 = tpu.matmul %131, %133, %cst_79 {dimension_numbers = #tpu.dot_dimension_numbers<[1], [0], [0], [1], [0, 0, 1, 1], [], []>} : vector<8x16xf32>, vector<16x128xf32>, vector<8x128xf32> -> vector<8x128xf32>
    %135 = arith.addf %130, %134 : vector<8x128xf32>
    %136 = vector.extract_strided_slice %14 {offsets = [192, 0], sizes = [8, 16], strides = [1, 1]} : vector<200x16xf32> to vector<8x16xf32>
    %c24 = arith.constant 24 : index
    %c0_80 = arith.constant 0 : index
    %c0_81 = arith.constant 0 : index
    %137 = vector.load %arg3[%c24, %c0_80, %c0_81] : memref<25x16x128xf32, #tpu.memory_space<vmem>>, vector<1x16x128xf32>
    %138 = vector.shape_cast %137 : vector<1x16x128xf32> to vector<16x128xf32>
    %cst_82 = arith.constant dense<0.000000e+00> : vector<8x128xf32>
    %139 = tpu.matmul %136, %138, %cst_82 {dimension_numbers = #tpu.dot_dimension_numbers<[1], [0], [0], [1], [0, 0, 1, 1], [], []>} : vector<8x16xf32>, vector<16x128xf32>, vector<8x128xf32> -> vector<8x128xf32>
    %140 = arith.addf %135, %139 : vector<8x128xf32>
    %c0_83 = arith.constant 0 : index
    %c0_84 = arith.constant 0 : index
    %141 = vector.load %arg4[%c0_83, %c0_84] : memref<1x128xf32, #tpu.memory_space<vmem>>, vector<1x128xf32>
    %142 = vector.broadcast %141 : vector<1x128xf32> to vector<8x128xf32>
    %143 = arith.addf %140, %142 : vector<8x128xf32>
    %cst_85 = arith.constant 0.000000e+00 : f32
    %144 = vector.broadcast %cst_85 : f32 to vector<8x128xf32>
    %145 = arith.maximumf %143, %144 : vector<8x128xf32>
    %c0_86 = arith.constant 0 : index
    %c0_87 = arith.constant 0 : index
    %146 = vector.load %arg5[%c0_86, %c0_87] : memref<128x128xf32, #tpu.memory_space<vmem>>, vector<128x128xf32>
    %cst_88 = arith.constant dense<0.000000e+00> : vector<8x128xf32>
    %147 = tpu.matmul %145, %146, %cst_88 {dimension_numbers = #tpu.dot_dimension_numbers<[1], [0], [0], [1], [0, 0, 1, 1], [], []>} : vector<8x128xf32>, vector<128x128xf32>, vector<8x128xf32> -> vector<8x128xf32>
    %c0_89 = arith.constant 0 : index
    %c0_90 = arith.constant 0 : index
    %148 = vector.load %arg6[%c0_89, %c0_90] : memref<1x128xf32, #tpu.memory_space<vmem>>, vector<1x128xf32>
    %149 = vector.broadcast %148 : vector<1x128xf32> to vector<8x128xf32>
    %150 = arith.addf %147, %149 : vector<8x128xf32>
    %cst_91 = arith.constant 0.000000e+00 : f32
    %151 = vector.broadcast %cst_91 : f32 to vector<8x128xf32>
    %152 = arith.maximumf %150, %151 : vector<8x128xf32>
    %c0_92 = arith.constant 0 : index
    %c0_93 = arith.constant 0 : index
    %153 = vector.load %arg7[%c0_92, %c0_93] : memref<128x10xf32, #tpu.memory_space<vmem>>, vector<128x10xf32>
    %cst_94 = arith.constant dense<0.000000e+00> : vector<8x10xf32>
    %154 = tpu.matmul %152, %153, %cst_94 {dimension_numbers = #tpu.dot_dimension_numbers<[1], [0], [0], [1], [0, 0, 1, 1], [], []>} : vector<8x128xf32>, vector<128x10xf32>, vector<8x10xf32> -> vector<8x10xf32>
    %c0_95 = arith.constant 0 : index
    %c0_96 = arith.constant 0 : index
    %155 = vector.load %arg8[%c0_95, %c0_96] : memref<1x10xf32, #tpu.memory_space<vmem>>, vector<1x10xf32>
    %156 = vector.broadcast %155 : vector<1x10xf32> to vector<8x10xf32>
    %157 = arith.addf %154, %156 : vector<8x10xf32>
    %158 = vector.extract_strided_slice %157 {offsets = [0, 0], sizes = [2, 10], strides = [1, 1]} : vector<8x10xf32> to vector<2x10xf32>
    %c0_97 = arith.constant 0 : index
    %c0_98 = arith.constant 0 : index
    %159 = vector.load %arg9[%c0_97, %c0_98] : memref<2x10xf32, #tpu.memory_space<vmem>>, vector<2x10xf32>
    tpu.vector_store %arg9[%c0_97, %c0_98], %158 {strides = array<i32>} : memref<2x10xf32, #tpu.memory_space<vmem>>, vector<2x10xf32>,
    return
  }
}

</mosaic_0001>

<bundles_post_ra>
// kernel: net_forward.2
= control target key start
LH: loop header
LB: loop body
LE: loop exit
PB: predicated region body
PF: predicated region fallthrough
CT: control target
= control target key end

     0   :  { %vm803_vm0 = vcmask 1040384   ;;  %vm214_vm1 = vcmask 203776   ;;  %vm2873_vm2 = vmmov 1   ;;  %vm2104_vm4 = vcmask 48128   ;;  %s4234_s1 = inlined_call_operand.vmem [shape: f32[25,6], index: 1, kind: input, shape index: {}]   ;;  %s4235_s0 = inlined_call_operand.vmem [shape: f32[1568,25], index: 0, kind: input, shape index: {}]   ;;  %s4236_s2 = inlined_call_operand.vmem [shape: f32[1,6], index: 2, kind: input, shape index: {}]   ;;  %s4237_s3 = inlined_call_operand.vmem [shape: f32[392,6], index: 3, kind: output, shape index: {}]  }
   0x1   :  { %v210_v0 = vld [vmem:[%s4234_s1] sm:$0xff]  ;;  %v211_v1 = vld [vmem:[%s4234_s1 + $0x8] sm:$0xff]  ;;  %v212_v2 = vld [vmem:[%s4234_s1 + $0x10] sm:$0xff] }
   0x2   :  { %v2858_v3 = vpack.c.bf16 %v211_v1, %v210_v0  ;;  %v213_v4 = vld [vmem:[%s4234_s1 + $0x18] sm:$0x1]  ;;  %v14_v5 = vld [vmem:[%s4235_s0] sm:$0xff]  ;;  %vm2863_vm3 = vmpackc.low %vm803_vm0, %vm2873_vm2 }
   0x3   :  { %v2862_v6 = vpack.c.bf16 %v213_v4, %v212_v2  ;;  %2564 = vmatprep.mubr.msk.f32.mxu0 %vm214_vm1, %v14_v5  ;;  %v112_v7 = vld [vmem:[%s4235_s0 + $0x310] sm:$0xff]  ;;  %v15_v8 = vld [vmem:[%s4235_s0 + $0x8] sm:$0xff]  ;;  %v113_v9 = vld [vmem:[%s4235_s0 + $0x318] sm:$0xff] }
   0x4   :  { %2859 = vmatprep.subr.bf16.mxu0 %v2858_v3  ;;  %2868 = vmatprep.subr.bf16.mxu1 %v2858_v3  ;;  %v16_v10 = vld [vmem:[%s4235_s0 + $0x10] sm:$0xff]  ;;  %v114_v11 = vld [vmem:[%s4235_s0 + $0x320] sm:$0xff]  ;;  %v17_v12 = vld [vmem:[%s4235_s0 + $0x18] sm:$0xff] }
   0x5   :  { %2861 = vmatpush3.bf16.msra.mxu0 %v2858_v3  ;;  %2870 = vmatpush3.bf16.msra.mxu1 %v2858_v3  ;;  %v115_v13 = vld [vmem:[%s4235_s0 + $0x328] sm:$0xff]  ;;  %v18_v14 = vld [vmem:[%s4235_s0 + $0x20] sm:$0xff]  ;;  %v116_v15 = vld [vmem:[%s4235_s0 + $0x330] sm:$0xff] }
   0x6   :  { %2864 = vmatprep.subr.msk.bf16.mxu0 %vm2863_vm3, %v2862_v6  ;;  %2869 = vmatprep.subr.msk.bf16.mxu1 %vm2863_vm3, %v2862_v6  ;;  %v19_v16 = vld [vmem:[%s4235_s0 + $0x28] sm:$0xff]  ;;  %v117_v17 = vld [vmem:[%s4235_s0 + $0x338] sm:$0xff]  ;;  %v20_v18 = vld [vmem:[%s4235_s0 + $0x30] sm:$0xff] }
   0x7   :  { %2711 = vmatprep.mubr.msk.f32.mxu1 %vm214_vm1, %v112_v7  ;;  %v118_v19 = vld [vmem:[%s4235_s0 + $0x340] sm:$0xff]  ;;  %v21_v20 = vld [vmem:[%s4235_s0 + $0x38] sm:$0xff]  ;;  %v119_v21 = vld [vmem:[%s4235_s0 + $0x348] sm:$0xff] }
   0x8   :  { %v22_v22 = vld [vmem:[%s4235_s0 + $0x40] sm:$0xff]  ;;  %v120_v23 = vld [vmem:[%s4235_s0 + $0x350] sm:$0xff]  ;;  %v23_v24 = vld [vmem:[%s4235_s0 + $0x48] sm:$0xff] }
   0x9   :  { %2867 = vmatpush3.bf16.msk.msra.mxu0 %vm2863_vm3, %v2862_v6  ;;  %2871 = vmatpush3.bf16.msk.msra.mxu1 %vm2863_vm3, %v2862_v6  ;;  %v121_v25 = vld [vmem:[%s4235_s0 + $0x358] sm:$0xff]  ;;  %v24_v26 = vld [vmem:[%s4235_s0 + $0x50] sm:$0xff]  ;;  %v122_v27 = vld [vmem:[%s4235_s0 + $0x360] sm:$0xff] }
   0xa   :  { %v25_v28 = vld [vmem:[%s4235_s0 + $0x58] sm:$0xff]  ;;  %v123_v29 = vld [vmem:[%s4235_s0 + $0x368] sm:$0xff]  ;;  %v26_v30 = vld [vmem:[%s4235_s0 + $0x60] sm:$0xff] }
   0xb   :  { %v124_v31 = vld [vmem:[%s4235_s0 + $0x370] sm:$0xff]  ;;  %v27_v32 = vld [vmem:[%s4235_s0 + $0x68] sm:$0xff]  ;;  %v125_v33 = vld [vmem:[%s4235_s0 + $0x378] sm:$0xff] }
   0xc   :  { %2565 = vmatmul.mubr.msk.f32.vlgmr.msra.gmra.mrb[0].mxu0 %vm214_vm1, %v15_v8  ;;  %2712 = vmatmul.mubr.msk.f32.vlgmr.msra.gmra.mrb[0].mxu1 %vm214_vm1, %v113_v9  ;;  %v28_v34 = vld [vmem:[%s4235_s0 + $0x70] sm:$0xff]  ;;  %v126_v35 = vld [vmem:[%s4235_s0 + $0x380] sm:$0xff]  ;;  %v29_v36 = vld [vmem:[%s4235_s0 + $0x78] sm:$0xff] }
   0xd   :  { %2567 = vmatprep.mubr.msk.f32.mxu0 %vm214_vm1, %v16_v10  ;;  %2714 = vmatprep.mubr.msk.f32.mxu1 %vm214_vm1, %v114_v11  ;;  %v127_v37 = vld [vmem:[%s4235_s0 + $0x388] sm:$0xff]  ;;  %v30_v38 = vld [vmem:[%s4235_s0 + $0x80] sm:$0xff]  ;;  %v128_v39 = vld [vmem:[%s4235_s0 + $0x390] sm:$0xff] }
   0xe   :  { %v31_v40 = vld [vmem:[%s4235_s0 + $0x88] sm:$0xff]  ;;  %v129_v41 = vld [vmem:[%s4235_s0 + $0x398] sm:$0xff]  ;;  %v32_v42 = vld [vmem:[%s4235_s0 + $0x90] sm:$0xff] }
   0xf   :  { %v130_v43 = vld [vmem:[%s4235_s0 + $0x3a0] sm:$0xff]  ;;  %v33_v44 = vld [vmem:[%s4235_s0 + $0x98] sm:$0xff]  ;;  %v131_v45 = vld [vmem:[%s4235_s0 + $0x3a8] sm:$0xff] }
  0x10   :  { %2568 = vmatmul.mubr.msk.f32.gmra.mrb[2].mxu0 %vm214_vm1, %v17_v12  ;;  %2715 = vmatmul.mubr.msk.f32.gmra.mrb[2].mxu1 %vm214_vm1, %v115_v13  ;;  %v34_v46 = vld [vmem:[%s4235_s0 + $0xa0] sm:$0xff]  ;;  %v132_v47 = vld [vmem:[%s4235_s0 + $0x3b0] sm:$0xff]  ;;  %v35_v48 = vld [vmem:[%s4235_s0 + $0xa8] sm:$0xff] }
  0x11   :  { %2570 = vmatprep.mubr.msk.f32.mxu0 %vm214_vm1, %v18_v14  ;;  %2717 = vmatprep.mubr.msk.f32.mxu1 %vm214_vm1, %v116_v15  ;;  %v133_v49 = vld [vmem:[%s4235_s0 + $0x3b8] sm:$0xff]  ;;  %v36_v50 = vld [vmem:[%s4235_s0 + $0xb0] sm:$0xff]  ;;  %v134_v51 = vld [vmem:[%s4235_s0 + $0x3c0] sm:$0xff] }
  0x12   :  { %v37_v52 = vld [vmem:[%s4235_s0 + $0xb8] sm:$0xff]  ;;  %v135_v53 = vld [vmem:[%s4235_s0 + $0x3c8] sm:$0xff]  ;;  %v38_v54 = vld [vmem:[%s4235_s0 + $0xc0] sm:$0xff] }
  0x13   :  { %v136_v55 = vld [vmem:[%s4235_s0 + $0x3d0] sm:$0xff]  ;;  %v39_v56 = vld [vmem:[%s4235_s0 + $0xc8] sm:$0xff]  ;;  %v137_v57 = vld [vmem:[%s4235_s0 + $0x3d8] sm:$0xff] }
  0x14   :  { %2571 = vmatmul.mubr.msk.f32.gmra.mrb[4].mxu0 %vm214_vm1, %v19_v16  ;;  %2718 = vmatmul.mubr.msk.f32.gmra.mrb[4].mxu1 %vm214_vm1, %v117_v17  ;;  %v40_v58 = vld [vmem:[%s4235_s0 + $0xd0] sm:$0xff]  ;;  %v138_v59 = vld [vmem:[%s4235_s0 + $0x3e0] sm:$0xff]  ;;  %v41_v60 = vld [vmem:[%s4235_s0 + $0xd8] sm:$0xff] }
  0x15   :  { %2573 = vmatprep.mubr.msk.f32.mxu0 %vm214_vm1, %v20_v18  ;;  %2720 = vmatprep.mubr.msk.f32.mxu1 %vm214_vm1, %v118_v19  ;;  %v139_v61 = vld [vmem:[%s4235_s0 + $0x3e8] sm:$0xff]  ;;  %v42_v62 = vld [vmem:[%s4235_s0 + $0xe0] sm:$0xff]  ;;  %v140_v63 = vld [vmem:[%s4235_s0 + $0x3f0] sm:$0xff] }
  0x16   :  { %v43_v0 = vld [vmem:[%s4235_s0 + $0xe8] sm:$0xff]  ;;  %v141_v1 = vld [vmem:[%s4235_s0 + $0x3f8] sm:$0xff]  ;;  %v44_v2 = vld [vmem:[%s4235_s0 + $0xf0] sm:$0xff] }
  0x17   :  { %v142_v3 = vld [vmem:[%s4235_s0 + $0x400] sm:$0xff]  ;;  %v45_v4 = vld [vmem:[%s4235_s0 + $0xf8] sm:$0xff]  ;;  %v143_v5 = vld [vmem:[%s4235_s0 + $0x408] sm:$0xff] }
  0x18   :  { %2574 = vmatmul.mubr.msk.f32.gmra.mrb[6].mxu0 %vm214_vm1, %v21_v20  ;;  %2721 = vmatmul.mubr.msk.f32.gmra.mrb[6].mxu1 %vm214_vm1, %v119_v21  ;;  %v46_v6 = vld [vmem:[%s4235_s0 + $0x100] sm:$0xff]  ;;  %v144_v7 = vld [vmem:[%s4235_s0 + $0x410] sm:$0xff]  ;;  %v47_v8 = vld [vmem:[%s4235_s0 + $0x108] sm:$0xff] }
  0x19   :  { %2576 = vmatprep.mubr.msk.f32.mxu0 %vm214_vm1, %v22_v22  ;;  %2723 = vmatprep.mubr.msk.f32.mxu1 %vm214_vm1, %v120_v23  ;;  %v145_v9 = vld [vmem:[%s4235_s0 + $0x418] sm:$0xff]  ;;  %v48_v10 = vld [vmem:[%s4235_s0 + $0x110] sm:$0xff]  ;;  %v146_v11 = vld [vmem:[%s4235_s0 + $0x420] sm:$0xff] }
  0x1a   :  { %v49_v12 = vld [vmem:[%s4235_s0 + $0x118] sm:$0xff]  ;;  %v147_v13 = vld [vmem:[%s4235_s0 + $0x428] sm:$0xff]  ;;  %v50_v14 = vld [vmem:[%s4235_s0 + $0x120] sm:$0xff] }
  0x1b   :  { %v148_v15 = vld [vmem:[%s4235_s0 + $0x430] sm:$0xff]  ;;  %v51_v16 = vld [vmem:[%s4235_s0 + $0x128] sm:$0xff]  ;;  %v149_v17 = vld [vmem:[%s4235_s0 + $0x438] sm:$0xff] }
  0x1c   :  { %2577 = vmatmul.mubr.msk.f32.gmra.mrb[8].mxu0 %vm214_vm1, %v23_v24  ;;  %2724 = vmatmul.mubr.msk.f32.gmra.mrb[8].mxu1 %vm214_vm1, %v121_v25  ;;  %v52_v18 = vld [vmem:[%s4235_s0 + $0x130] sm:$0xff]  ;;  %v150_v19 = vld [vmem:[%s4235_s0 + $0x440] sm:$0xff]  ;;  %v53_v20 = vld [vmem:[%s4235_s0 + $0x138] sm:$0xff] }
  0x1d   :  { %2579 = vmatprep.mubr.msk.f32.mxu0 %vm214_vm1, %v24_v26  ;;  %2726 = vmatprep.mubr.msk.f32.mxu1 %vm214_vm1, %v122_v27  ;;  %v151_v21 = vld [vmem:[%s4235_s0 + $0x448] sm:$0xff]  ;;  %v54_v22 = vld [vmem:[%s4235_s0 + $0x140] sm:$0xff]  ;;  %v152_v23 = vld [vmem:[%s4235_s0 + $0x450] sm:$0xff] }
  0x1e   :  { %v55_v24 = vld [vmem:[%s4235_s0 + $0x148] sm:$0xff]  ;;  %v153_v25 = vld [vmem:[%s4235_s0 + $0x458] sm:$0xff]  ;;  %v56_v26 = vld [vmem:[%s4235_s0 + $0x150] sm:$0xff] }
  0x1f   :  { %v154_v27 = vld [vmem:[%s4235_s0 + $0x460] sm:$0xff] }
  0x20   :  { %2580 = vmatmul.mubr.msk.f32.gmra.mrb[10].mxu0 %vm214_vm1, %v25_v28  ;;  %2727 = vmatmul.mubr.msk.f32.gmra.mrb[10].mxu1 %vm214_vm1, %v123_v29  ;;  %v57_v28 = vld [vmem:[%s4235_s0 + $0x158] sm:$0xff]  ;;  %v155_v29 = vld [vmem:[%s4235_s0 + $0x468] sm:$0xff] }
  0x21   :  { %2582 = vmatprep.mubr.msk.f32.mxu0 %vm214_vm1, %v26_v30  ;;  %2729 = vmatprep.mubr.msk.f32.mxu1 %vm214_vm1, %v124_v31  ;;  %v58_v30 = vld [vmem:[%s4235_s0 + $0x160] sm:$0xff]  ;;  %v156_v31 = vld [vmem:[%s4235_s0 + $0x470] sm:$0xff] }
  0x24   :  { %2583 = vmatmul.mubr.msk.f32.gmra.mrb[12].mxu0 %vm214_vm1, %v27_v32  ;;  %2730 = vmatmul.mubr.msk.f32.gmra.mrb[12].mxu1 %vm214_vm1, %v125_v33  ;;  %v59_v32 = vld [vmem:[%s4235_s0 + $0x168] sm:$0xff]  ;;  %v157_v33 = vld [vmem:[%s4235_s0 + $0x478] sm:$0xff] }
  0x25   :  { %2585 = vmatprep.mubr.msk.f32.mxu0 %vm214_vm1, %v28_v34  ;;  %2732 = vmatprep.mubr.msk.f32.mxu1 %vm214_vm1, %v126_v35  ;;  %v60_v34 = vld [vmem:[%s4235_s0 + $0x170] sm:$0xff]  ;;  %v158_v35 = vld [vmem:[%s4235_s0 + $0x480] sm:$0xff] }
  0x28   :  { %2586 = vmatmul.mubr.msk.f32.gmra.mrb[14].mxu0 %vm214_vm1, %v29_v36  ;;  %2733 = vmatmul.mubr.msk.f32.gmra.mrb[14].mxu1 %vm214_vm1, %v127_v37  ;;  %v61_v36 = vld [vmem:[%s4235_s0 + $0x178] sm:$0xff]  ;;  %v159_v37 = vld [vmem:[%s4235_s0 + $0x488] sm:$0xff] }
  0x29   :  { %2588 = vmatprep.mubr.msk.f32.mxu0 %vm214_vm1, %v30_v38  ;;  %2735 = vmatprep.mubr.msk.f32.mxu1 %vm214_vm1, %v128_v39  ;;  %v62_v38 = vld [vmem:[%s4235_s0 + $0x180] sm:$0xff]  ;;  %v160_v39 = vld [vmem:[%s4235_s0 + $0x490] sm:$0xff] }
  0x2c   :  { %2589 = vmatmul.mubr.msk.f32.gmra.mrb[16].mxu0 %vm214_vm1, %v31_v40  ;;  %2736 = vmatmul.mubr.msk.f32.gmra.mrb[16].mxu1 %vm214_vm1, %v129_v41  ;;  %v63_v40 = vld [vmem:[%s4235_s0 + $0x188] sm:$0xff]  ;;  %v161_v41 = vld [vmem:[%s4235_s0 + $0x498] sm:$0xff] }
  0x2d   :  { %2591 = vmatprep.mubr.msk.f32.mxu0 %vm214_vm1, %v32_v42  ;;  %2738 = vmatprep.mubr.msk.f32.mxu1 %vm214_vm1, %v130_v43  ;;  %v64_v42 = vld [vmem:[%s4235_s0 + $0x190] sm:$0xff]  ;;  %v162_v43 = vld [vmem:[%s4235_s0 + $0x4a0] sm:$0xff] }
  0x30   :  { %2592 = vmatmul.mubr.msk.f32.gmra.mrb[18].mxu0 %vm214_vm1, %v33_v44  ;;  %2739 = vmatmul.mubr.msk.f32.gmra.mrb[18].mxu1 %vm214_vm1, %v131_v45  ;;  %v65_v44 = vld [vmem:[%s4235_s0 + $0x198] sm:$0xff]  ;;  %v163_v45 = vld [vmem:[%s4235_s0 + $0x4a8] sm:$0xff] }
  0x31   :  { %2594 = vmatprep.mubr.msk.f32.mxu0 %vm214_vm1, %v34_v46  ;;  %2741 = vmatprep.mubr.msk.f32.mxu1 %vm214_vm1, %v132_v47  ;;  %v66_v46 = vld [vmem:[%s4235_s0 + $0x1a0] sm:$0xff]  ;;  %v164_v47 = vld [vmem:[%s4235_s0 + $0x4b0] sm:$0xff] }
  0x34   :  { %2595 = vmatmul.mubr.msk.f32.gmra.mrb[20].mxu0 %vm214_vm1, %v35_v48  ;;  %2742 = vmatmul.mubr.msk.f32.gmra.mrb[20].mxu1 %vm214_vm1, %v133_v49  ;;  %v67_v48 = vld [vmem:[%s4235_s0 + $0x1a8] sm:$0xff]  ;;  %v165_v49 = vld [vmem:[%s4235_s0 + $0x4b8] sm:$0xff] }
  0x35   :  { %2597 = vmatprep.mubr.msk.f32.mxu0 %vm214_vm1, %v36_v50  ;;  %2744 = vmatprep.mubr.msk.f32.mxu1 %vm214_vm1, %v134_v51  ;;  %v68_v50 = vld [vmem:[%s4235_s0 + $0x1b0] sm:$0xff]  ;;  %v166_v51 = vld [vmem:[%s4235_s0 + $0x4c0] sm:$0xff] }
  0x38   :  { %2598 = vmatmul.mubr.msk.f32.gmra.mrb[22].mxu0 %vm214_vm1, %v37_v52  ;;  %2745 = vmatmul.mubr.msk.f32.gmra.mrb[22].mxu1 %vm214_vm1, %v135_v53  ;;  %v69_v52 = vld [vmem:[%s4235_s0 + $0x1b8] sm:$0xff]  ;;  %v167_v53 = vld [vmem:[%s4235_s0 + $0x4c8] sm:$0xff] }
  0x39   :  { %2600 = vmatprep.mubr.msk.f32.mxu0 %vm214_vm1, %v38_v54  ;;  %2747 = vmatprep.mubr.msk.f32.mxu1 %vm214_vm1, %v136_v55  ;;  %v70_v54 = vld [vmem:[%s4235_s0 + $0x1c0] sm:$0xff]  ;;  %v168_v55 = vld [vmem:[%s4235_s0 + $0x4d0] sm:$0xff] }
  0x3c   :  { %2601 = vmatmul.mubr.msk.f32.gmra.mrb[24].mxu0 %vm214_vm1, %v39_v56  ;;  %2748 = vmatmul.mubr.msk.f32.gmra.mrb[24].mxu1 %vm214_vm1, %v137_v57  ;;  %v71_v56 = vld [vmem:[%s4235_s0 + $0x1c8] sm:$0xff]  ;;  %v169_v57 = vld [vmem:[%s4235_s0 + $0x4d8] sm:$0xff] }
  0x3d   :  { %2603 = vmatprep.mubr.msk.f32.mxu0 %vm214_vm1, %v40_v58  ;;  %2750 = vmatprep.mubr.msk.f32.mxu1 %vm214_vm1, %v138_v59  ;;  %v72_v58 = vld [vmem:[%s4235_s0 + $0x1d0] sm:$0xff]  ;;  %v170_v59 = vld [vmem:[%s4235_s0 + $0x4e0] sm:$0xff] }
  0x40   :  { %2604 = vmatmul.mubr.msk.f32.gmra.mrb[26].mxu0 %vm214_vm1, %v41_v60  ;;  %2751 = vmatmul.mubr.msk.f32.gmra.mrb[26].mxu1 %vm214_vm1, %v139_v61  ;;  %v73_v60 = vld [vmem:[%s4235_s0 + $0x1d8] sm:$0xff]  ;;  %v171_v61 = vld [vmem:[%s4235_s0 + $0x4e8] sm:$0xff] }
  0x41   :  { %2606 = vmatprep.mubr.msk.f32.mxu0 %vm214_vm1, %v42_v62  ;;  %2753 = vmatprep.mubr.msk.f32.mxu1 %vm214_vm1, %v140_v63  ;;  %v74_v62 = vld [vmem:[%s4235_s0 + $0x1e0] sm:$0xff]  ;;  %v172_v63 = vld [vmem:[%s4235_s0 + $0x4f0] sm:$0xff] }
  0x44   :  { %2607 = vmatmul.mubr.msk.f32.gmra.mrb[28].mxu0 %vm214_vm1, %v43_v0  ;;  %2754 = vmatmul.mubr.msk.f32.gmra.mrb[28].mxu1 %vm214_vm1, %v141_v1  ;;  %v75_v0 = vld [vmem:[%s4235_s0 + $0x1e8] sm:$0xff]  ;;  %v173_v1 = vld [vmem:[%s4235_s0 + $0x4f8] sm:$0xff] }
  0x45   :  { %2609 = vmatprep.mubr.msk.f32.mxu0 %vm214_vm1, %v44_v2  ;;  %2756 = vmatprep.mubr.msk.f32.mxu1 %vm214_vm1, %v142_v3  ;;  %v76_v2 = vld [vmem:[%s4235_s0 + $0x1f0] sm:$0xff]  ;;  %v174_v3 = vld [vmem:[%s4235_s0 + $0x500] sm:$0xff] }
  0x48   :  { %2610 = vmatmul.mubr.msk.f32.gmra.mrb[30].mxu0 %vm214_vm1, %v45_v4  ;;  %2757 = vmatmul.mubr.msk.f32.gmra.mrb[30].mxu1 %vm214_vm1, %v143_v5  ;;  %v77_v4 = vld [vmem:[%s4235_s0 + $0x1f8] sm:$0xff]  ;;  %v175_v5 = vld [vmem:[%s4235_s0 + $0x508] sm:$0xff] }
  0x49   :  { %2612 = vmatprep.mubr.msk.f32.mxu0 %vm214_vm1, %v46_v6  ;;  %2759 = vmatprep.mubr.msk.f32.mxu1 %vm214_vm1, %v144_v7  ;;  %v78_v6 = vld [vmem:[%s4235_s0 + $0x200] sm:$0xff]  ;;  %v176_v7 = vld [vmem:[%s4235_s0 + $0x510] sm:$0xff] }
  0x4c   :  { %2613 = vmatmul.mubr.msk.f32.gmra.mrb[32].mxu0 %vm214_vm1, %v47_v8  ;;  %2760 = vmatmul.mubr.msk.f32.gmra.mrb[32].mxu1 %vm214_vm1, %v145_v9  ;;  %v79_v8 = vld [vmem:[%s4235_s0 + $0x208] sm:$0xff]  ;;  %v177_v9 = vld [vmem:[%s4235_s0 + $0x518] sm:$0xff] }
  0x4d   :  { %2615 = vmatprep.mubr.msk.f32.mxu0 %vm214_vm1, %v48_v10  ;;  %2762 = vmatprep.mubr.msk.f32.mxu1 %vm214_vm1, %v146_v11  ;;  %v80_v10 = vld [vmem:[%s4235_s0 + $0x210] sm:$0xff]  ;;  %v178_v11 = vld [vmem:[%s4235_s0 + $0x520] sm:$0xff] }
  0x50   :  { %2616 = vmatmul.mubr.msk.f32.gmra.mrb[34].mxu0 %vm214_vm1, %v49_v12  ;;  %2763 = vmatmul.mubr.msk.f32.gmra.mrb[34].mxu1 %vm214_vm1, %v147_v13  ;;  %v81_v12 = vld [vmem:[%s4235_s0 + $0x218] sm:$0xff]  ;;  %v179_v13 = vld [vmem:[%s4235_s0 + $0x528] sm:$0xff] }
  0x51   :  { %2618 = vmatprep.mubr.msk.f32.mxu0 %vm214_vm1, %v50_v14  ;;  %2765 = vmatprep.mubr.msk.f32.mxu1 %vm214_vm1, %v148_v15  ;;  %v82_v14 = vld [vmem:[%s4235_s0 + $0x220] sm:$0xff]  ;;  %v180_v15 = vld [vmem:[%s4235_s0 + $0x530] sm:$0xff] }
  0x54   :  { %2619 = vmatmul.mubr.msk.f32.gmra.mrb[36].mxu0 %vm214_vm1, %v51_v16  ;;  %2766 = vmatmul.mubr.msk.f32.gmra.mrb[36].mxu1 %vm214_vm1, %v149_v17  ;;  %v83_v16 = vld [vmem:[%s4235_s0 + $0x228] sm:$0xff]  ;;  %v181_v17 = vld [vmem:[%s4235_s0 + $0x538] sm:$0xff] }
  0x55   :  { %2621 = vmatprep.mubr.msk.f32.mxu0 %vm214_vm1, %v52_v18  ;;  %2768 = vmatprep.mubr.msk.f32.mxu1 %vm214_vm1, %v150_v19  ;;  %v84_v18 = vld [vmem:[%s4235_s0 + $0x230] sm:$0xff]  ;;  %v182_v19 = vld [vmem:[%s4235_s0 + $0x540] sm:$0xff] }
  0x58   :  { %2622 = vmatmul.mubr.msk.f32.gmra.mrb[38].mxu0 %vm214_vm1, %v53_v20  ;;  %2769 = vmatmul.mubr.msk.f32.gmra.mrb[38].mxu1 %vm214_vm1, %v151_v21  ;;  %v85_v20 = vld [vmem:[%s4235_s0 + $0x238] sm:$0xff]  ;;  %v183_v21 = vld [vmem:[%s4235_s0 + $0x548] sm:$0xff] }
  0x59   :  { %2624 = vmatprep.mubr.msk.f32.mxu0 %vm214_vm1, %v54_v22  ;;  %2771 = vmatprep.mubr.msk.f32.mxu1 %vm214_vm1, %v152_v23  ;;  %v86_v22 = vld [vmem:[%s4235_s0 + $0x240] sm:$0xff]  ;;  %v184_v23 = vld [vmem:[%s4235_s0 + $0x550] sm:$0xff] }
  0x5c   :  { %2625 = vmatmul.mubr.msk.f32.gmra.mrb[40].mxu0 %vm214_vm1, %v55_v24  ;;  %2772 = vmatmul.mubr.msk.f32.gmra.mrb[40].mxu1 %vm214_vm1, %v153_v25  ;;  %v87_v24 = vld [vmem:[%s4235_s0 + $0x248] sm:$0xff]  ;;  %v185_v25 = vld [vmem:[%s4235_s0 + $0x558] sm:$0xff] }
  0x5d   :  { %2627 = vmatprep.mubr.msk.f32.mxu0 %vm214_vm1, %v56_v26  ;;  %2774 = vmatprep.mubr.msk.f32.mxu1 %vm214_vm1, %v154_v27  ;;  %v88_v26 = vld [vmem:[%s4235_s0 + $0x250] sm:$0xff]  ;;  %v186_v27 = vld [vmem:[%s4235_s0 + $0x560] sm:$0xff] }
  0x60   :  { %2628 = vmatmul.mubr.msk.f32.gmra.mrb[42].mxu0 %vm214_vm1, %v57_v28  ;;  %2775 = vmatmul.mubr.msk.f32.gmra.mrb[42].mxu1 %vm214_vm1, %v155_v29  ;;  %v89_v28 = vld [vmem:[%s4235_s0 + $0x258] sm:$0xff]  ;;  %v187_v29 = vld [vmem:[%s4235_s0 + $0x568] sm:$0xff] }
  0x61   :  { %2630 = vmatprep.mubr.msk.f32.mxu0 %vm214_vm1, %v58_v30  ;;  %2777 = vmatprep.mubr.msk.f32.mxu1 %vm214_vm1, %v156_v31  ;;  %v90_v30 = vld [vmem:[%s4235_s0 + $0x260] sm:$0xff]  ;;  %v188_v31 = vld [vmem:[%s4235_s0 + $0x570] sm:$0xff] }
  0x64   :  { %2631 = vmatmul.mubr.msk.f32.gmra.mrb[44].mxu0 %vm214_vm1, %v59_v32  ;;  %2778 = vmatmul.mubr.msk.f32.gmra.mrb[44].mxu1 %vm214_vm1, %v157_v33  ;;  %v91_v32 = vld [vmem:[%s4235_s0 + $0x268] sm:$0xff]  ;;  %v189_v33 = vld [vmem:[%s4235_s0 + $0x578] sm:$0xff] }
  0x65   :  { %2633 = vmatprep.mubr.msk.f32.mxu0 %vm214_vm1, %v60_v34  ;;  %2780 = vmatprep.mubr.msk.f32.mxu1 %vm214_vm1, %v158_v35  ;;  %v92_v34 = vld [vmem:[%s4235_s0 + $0x270] sm:$0xff]  ;;  %v190_v35 = vld [vmem:[%s4235_s0 + $0x580] sm:$0xff] }
  0x68   :  { %2634 = vmatmul.mubr.msk.f32.gmra.mrb[46].mxu0 %vm214_vm1, %v61_v36  ;;  %2781 = vmatmul.mubr.msk.f32.gmra.mrb[46].mxu1 %vm214_vm1, %v159_v37  ;;  %v93_v36 = vld [vmem:[%s4235_s0 + $0x278] sm:$0xff]  ;;  %v191_v37 = vld [vmem:[%s4235_s0 + $0x588] sm:$0xff] }
  0x69   :  { %2636 = vmatprep.mubr.msk.f32.mxu0 %vm214_vm1, %v62_v38  ;;  %2783 = vmatprep.mubr.msk.f32.mxu1 %vm214_vm1, %v160_v39  ;;  %v94_v38 = vld [vmem:[%s4235_s0 + $0x280] sm:$0xff]  ;;  %v192_v39 = vld [vmem:[%s4235_s0 + $0x590] sm:$0xff] }
  0x6c   :  { %2637 = vmatmul.mubr.msk.f32.gmra.mrb[48].mxu0 %vm214_vm1, %v63_v40  ;;  %2784 = vmatmul.mubr.msk.f32.gmra.mrb[48].mxu1 %vm214_vm1, %v161_v41  ;;  %v95_v40 = vld [vmem:[%s4235_s0 + $0x288] sm:$0xff]  ;;  %v193_v41 = vld [vmem:[%s4235_s0 + $0x598] sm:$0xff] }
  0x6d   :  { %2639 = vmatprep.mubr.msk.f32.mxu0 %vm214_vm1, %v64_v42  ;;  %2786 = vmatprep.mubr.msk.f32.mxu1 %vm214_vm1, %v162_v43  ;;  %v96_v42 = vld [vmem:[%s4235_s0 + $0x290] sm:$0xff]  ;;  %v194_v43 = vld [vmem:[%s4235_s0 + $0x5a0] sm:$0xff] }
  0x70   :  { %2640 = vmatmul.mubr.msk.f32.gmra.mrb[50].mxu0 %vm214_vm1, %v65_v44  ;;  %2787 = vmatmul.mubr.msk.f32.gmra.mrb[50].mxu1 %vm214_vm1, %v163_v45  ;;  %v97_v44 = vld [vmem:[%s4235_s0 + $0x298] sm:$0xff]  ;;  %v195_v45 = vld [vmem:[%s4235_s0 + $0x5a8] sm:$0xff] }
  0x71   :  { %2642 = vmatprep.mubr.msk.f32.mxu0 %vm214_vm1, %v66_v46  ;;  %2789 = vmatprep.mubr.msk.f32.mxu1 %vm214_vm1, %v164_v47  ;;  %v98_v46 = vld [vmem:[%s4235_s0 + $0x2a0] sm:$0xff]  ;;  %v196_v47 = vld [vmem:[%s4235_s0 + $0x5b0] sm:$0xff] }
  0x74   :  { %2643 = vmatmul.mubr.msk.f32.gmra.mrb[52].mxu0 %vm214_vm1, %v67_v48  ;;  %2790 = vmatmul.mubr.msk.f32.gmra.mrb[52].mxu1 %vm214_vm1, %v165_v49  ;;  %v99_v48 = vld [vmem:[%s4235_s0 + $0x2a8] sm:$0xff]  ;;  %v197_v49 = vld [vmem:[%s4235_s0 + $0x5b8] sm:$0xff] }
  0x75   :  { %2645 = vmatprep.mubr.msk.f32.mxu0 %vm214_vm1, %v68_v50  ;;  %2792 = vmatprep.mubr.msk.f32.mxu1 %vm214_vm1, %v166_v51  ;;  %v100_v50 = vld [vmem:[%s4235_s0 + $0x2b0] sm:$0xff]  ;;  %v198_v51 = vld [vmem:[%s4235_s0 + $0x5c0] sm:$0xff] }
  0x78   :  { %2646 = vmatmul.mubr.msk.f32.gmra.mrb[54].mxu0 %vm214_vm1, %v69_v52  ;;  %2793 = vmatmul.mubr.msk.f32.gmra.mrb[54].mxu1 %vm214_vm1, %v167_v53  ;;  %v101_v52 = vld [vmem:[%s4235_s0 + $0x2b8] sm:$0xff]  ;;  %v199_v53 = vld [vmem:[%s4235_s0 + $0x5c8] sm:$0xff] }
  0x79   :  { %2648 = vmatprep.mubr.msk.f32.mxu0 %vm214_vm1, %v70_v54  ;;  %2795 = vmatprep.mubr.msk.f32.mxu1 %vm214_vm1, %v168_v55  ;;  %v102_v54 = vld [vmem:[%s4235_s0 + $0x2c0] sm:$0xff]  ;;  %v200_v55 = vld [vmem:[%s4235_s0 + $0x5d0] sm:$0xff] }
  0x7c   :  { %2649 = vmatmul.mubr.msk.f32.gmra.mrb[56].mxu0 %vm214_vm1, %v71_v56  ;;  %2796 = vmatmul.mubr.msk.f32.gmra.mrb[56].mxu1 %vm214_vm1, %v169_v57  ;;  %v103_v56 = vld [vmem:[%s4235_s0 + $0x2c8] sm:$0xff]  ;;  %v201_v57 = vld [vmem:[%s4235_s0 + $0x5d8] sm:$0xff] }
  0x7d   :  { %2651 = vmatprep.mubr.msk.f32.mxu0 %vm214_vm1, %v72_v58  ;;  %2798 = vmatprep.mubr.msk.f32.mxu1 %vm214_vm1, %v170_v59  ;;  %v104_v58 = vld [vmem:[%s4235_s0 + $0x2d0] sm:$0xff]  ;;  %v202_v59 = vld [vmem:[%s4235_s0 + $0x5e0] sm:$0xff] }
  0x80   :  { %2652 = vmatmul.mubr.msk.f32.gmra.mrb[58].mxu0 %vm214_vm1, %v73_v60  ;;  %2799 = vmatmul.mubr.msk.f32.gmra.mrb[58].mxu1 %vm214_vm1, %v171_v61  ;;  %v105_v60 = vld [vmem:[%s4235_s0 + $0x2d8] sm:$0xff]  ;;  %v203_v61 = vld [vmem:[%s4235_s0 + $0x5e8] sm:$0xff] }
  0x81   :  { %2654 = vmatprep.mubr.msk.f32.mxu0 %vm214_vm1, %v74_v62  ;;  %2801 = vmatprep.mubr.msk.f32.mxu1 %vm214_vm1, %v172_v63  ;;  %v106_v62 = vld [vmem:[%s4235_s0 + $0x2e0] sm:$0xff]  ;;  %v204_v63 = vld [vmem:[%s4235_s0 + $0x5f0] sm:$0xff] }
  0x84   :  { %2655 = vmatmul.mubr.msk.f32.gmra.mrb[60].mxu0 %vm214_vm1, %v75_v0  ;;  %2802 = vmatmul.mubr.msk.f32.gmra.mrb[60].mxu1 %vm214_vm1, %v173_v1  ;;  %v107_v0 = vld [vmem:[%s4235_s0 + $0x2e8] sm:$0xff]  ;;  %v205_v1 = vld [vmem:[%s4235_s0 + $0x5f8] sm:$0xff] }
  0x85   :  { %2657 = vmatprep.mubr.msk.f32.mxu0 %vm214_vm1, %v76_v2  ;;  %2804 = vmatprep.mubr.msk.f32.mxu1 %vm214_vm1, %v174_v3  ;;  %v108_v2 = vld [vmem:[%s4235_s0 + $0x2f0] sm:$0xff]  ;;  %v206_v3 = vld [vmem:[%s4235_s0 + $0x600] sm:$0xff] }
  0x88   :  { %2658 = vmatmul.mubr.msk.f32.gmra.mrb[62].mxu0 %vm214_vm1, %v77_v4  ;;  %2805 = vmatmul.mubr.msk.f32.gmra.mrb[62].mxu1 %vm214_vm1, %v175_v5  ;;  %v109_v4 = vld [vmem:[%s4235_s0 + $0x2f8] sm:$0xff]  ;;  %v207_v5 = vld [vmem:[%s4235_s0 + $0x608] sm:$0xff] }
  0x89   :  { %2660 = vmatprep.mubr.msk.f32.mxu0 %vm214_vm1, %v78_v6  ;;  %2807 = vmatprep.mubr.msk.f32.mxu1 %vm214_vm1, %v176_v7  ;;  %v110_v6 = vld [vmem:[%s4235_s0 + $0x300] sm:$0xff]  ;;  %v208_v7 = vld [vmem:[%s4235_s0 + $0x610] sm:$0xff] }
  0x8c   :  { %2661 = vmatmul.mubr.msk.f32.gmra.mrb[64].mxu0 %vm214_vm1, %v79_v8  ;;  %2808 = vmatmul.mubr.msk.f32.gmra.mrb[64].mxu1 %vm214_vm1, %v177_v9  ;;  %v111_v8 = vld [vmem:[%s4235_s0 + $0x308] sm:$0xff]  ;;  %v209_v9 = vld [vmem:[%s4235_s0 + $0x618] sm:$0xff] }
  0x8d   :  { %2663 = vmatprep.mubr.msk.f32.mxu0 %vm214_vm1, %v80_v10  ;;  %2810 = vmatprep.mubr.msk.f32.mxu1 %vm214_vm1, %v178_v11 }
  0x90   :  { %2664 = vmatmul.mubr.msk.f32.gmra.mrb[66].mxu0 %vm214_vm1, %v81_v12  ;;  %2811 = vmatmul.mubr.msk.f32.gmra.mrb[66].mxu1 %vm214_vm1, %v179_v13 }
  0x91   :  { %2666 = vmatprep.mubr.msk.f32.mxu0 %vm214_vm1, %v82_v14  ;;  %2813 = vmatprep.mubr.msk.f32.mxu1 %vm214_vm1, %v180_v15 }
  0x94   :  { %2667 = vmatmul.mubr.msk.f32.gmra.mrb[68].mxu0 %vm214_vm1, %v83_v16  ;;  %2814 = vmatmul.mubr.msk.f32.gmra.mrb[68].mxu1 %vm214_vm1, %v181_v17 }
  0x95   :  { %2669 = vmatprep.mubr.msk.f32.mxu0 %vm214_vm1, %v84_v18  ;;  %2816 = vmatprep.mubr.msk.f32.mxu1 %vm214_vm1, %v182_v19 }
  0x98   :  { %2670 = vmatmul.mubr.msk.f32.gmra.mrb[70].mxu0 %vm214_vm1, %v85_v20  ;;  %2817 = vmatmul.mubr.msk.f32.gmra.mrb[70].mxu1 %vm214_vm1, %v183_v21 }
  0x99   :  { %2672 = vmatprep.mubr.msk.f32.mxu0 %vm214_vm1, %v86_v22  ;;  %2819 = vmatprep.mubr.msk.f32.mxu1 %vm214_vm1, %v184_v23 }
  0x9c   :  { %2673 = vmatmul.mubr.msk.f32.gmra.mrb[72].mxu0 %vm214_vm1, %v87_v24  ;;  %2820 = vmatmul.mubr.msk.f32.gmra.mrb[72].mxu1 %vm214_vm1, %v185_v25 }
  0x9d   :  { %2675 = vmatprep.mubr.msk.f32.mxu0 %vm214_vm1, %v88_v26  ;;  %2822 = vmatprep.mubr.msk.f32.mxu1 %vm214_vm1, %v186_v27 }
  0xa0   :  { %2676 = vmatmul.mubr.msk.f32.gmra.mrb[74].mxu0 %vm214_vm1, %v89_v28  ;;  %2823 = vmatmul.mubr.msk.f32.gmra.mrb[74].mxu1 %vm214_vm1, %v187_v29 }
  0xa1   :  { %2678 = vmatprep.mubr.msk.f32.mxu0 %vm214_vm1, %v90_v30  ;;  %2825 = vmatprep.mubr.msk.f32.mxu1 %vm214_vm1, %v188_v31 }
  0xa4   :  { %2679 = vmatmul.mubr.msk.f32.gmra.mrb[76].mxu0 %vm214_vm1, %v91_v32  ;;  %2826 = vmatmul.mubr.msk.f32.gmra.mrb[76].mxu1 %vm214_vm1, %v189_v33 }
  0xa5   :  { %2681 = vmatprep.mubr.msk.f32.mxu0 %vm214_vm1, %v92_v34  ;;  %2828 = vmatprep.mubr.msk.f32.mxu1 %vm214_vm1, %v190_v35 }
  0xa8   :  { %2682 = vmatmul.mubr.msk.f32.gmra.mrb[78].mxu0 %vm214_vm1, %v93_v36  ;;  %2829 = vmatmul.mubr.msk.f32.gmra.mrb[78].mxu1 %vm214_vm1, %v191_v37 }
  0xa9   :  { %2684 = vmatprep.mubr.msk.f32.mxu0 %vm214_vm1, %v94_v38  ;;  %2831 = vmatprep.mubr.msk.f32.mxu1 %vm214_vm1, %v192_v39 }
  0xac   :  { %2685 = vmatmul.mubr.msk.f32.gmra.mrb[80].mxu0 %vm214_vm1, %v95_v40  ;;  %2832 = vmatmul.mubr.msk.f32.gmra.mrb[80].mxu1 %vm214_vm1, %v193_v41 }
  0xad   :  { %2687 = vmatprep.mubr.msk.f32.mxu0 %vm214_vm1, %v96_v42  ;;  %2834 = vmatprep.mubr.msk.f32.mxu1 %vm214_vm1, %v194_v43 }
  0xb0   :  { %2688 = vmatmul.mubr.msk.f32.gmra.mrb[82].mxu0 %vm214_vm1, %v97_v44  ;;  %2835 = vmatmul.mubr.msk.f32.gmra.mrb[82].mxu1 %vm214_vm1, %v195_v45 }
  0xb1   :  { %2690 = vmatprep.mubr.msk.f32.mxu0 %vm214_vm1, %v98_v46  ;;  %2837 = vmatprep.mubr.msk.f32.mxu1 %vm214_vm1, %v196_v47 }
  0xb4   :  { %2691 = vmatmul.mubr.msk.f32.gmra.mrb[84].mxu0 %vm214_vm1, %v99_v48  ;;  %2838 = vmatmul.mubr.msk.f32.gmra.mrb[84].mxu1 %vm214_vm1, %v197_v49 }
  0xb5   :  { %2693 = vmatprep.mubr.msk.f32.mxu0 %vm214_vm1, %v100_v50  ;;  %2840 = vmatprep.mubr.msk.f32.mxu1 %vm214_vm1, %v198_v51 }
  0xb8   :  { %2694 = vmatmul.mubr.msk.f32.gmra.mrb[86].mxu0 %vm214_vm1, %v101_v52  ;;  %2841 = vmatmul.mubr.msk.f32.gmra.mrb[86].mxu1 %vm214_vm1, %v199_v53 }
  0xb9   :  { %2696 = vmatprep.mubr.msk.f32.mxu0 %vm214_vm1, %v102_v54  ;;  %2843 = vmatprep.mubr.msk.f32.mxu1 %vm214_vm1, %v200_v55 }
  0xbc   :  { %2697 = vmatmul.mubr.msk.f32.gmra.mrb[88].mxu0 %vm214_vm1, %v103_v56  ;;  %2844 = vmatmul.mubr.msk.f32.gmra.mrb[88].mxu1 %vm214_vm1, %v201_v57 }
  0xbd   :  { %2699 = vmatprep.mubr.msk.f32.mxu0 %vm214_vm1, %v104_v58  ;;  %2846 = vmatprep.mubr.msk.f32.mxu1 %vm214_vm1, %v202_v59 }
  0xc0   :  { %2700 = vmatmul.mubr.msk.f32.gmra.mrb[90].mxu0 %vm214_vm1, %v105_v60  ;;  %2847 = vmatmul.mubr.msk.f32.gmra.mrb[90].mxu1 %vm214_vm1, %v203_v61 }
  0xc1   :  { %2702 = vmatprep.mubr.msk.f32.mxu0 %vm214_vm1, %v106_v62  ;;  %2849 = vmatprep.mubr.msk.f32.mxu1 %vm214_vm1, %v204_v63 }
  0xc4   :  { %2703 = vmatmul.mubr.msk.f32.gmra.mrb[92].mxu0 %vm214_vm1, %v107_v0  ;;  %2850 = vmatmul.mubr.msk.f32.gmra.mrb[92].mxu1 %vm214_vm1, %v205_v1 }
  0xc5   :  { %2705 = vmatprep.mubr.msk.f32.mxu0 %vm214_vm1, %v108_v2  ;;  %2852 = vmatprep.mubr.msk.f32.mxu1 %vm214_vm1, %v206_v3 }
  0xc8   :  { %2706 = vmatmul.mubr.msk.f32.gmra.mrb[94].mxu0 %vm214_vm1, %v109_v4  ;;  %2853 = vmatmul.mubr.msk.f32.gmra.mrb[94].mxu1 %vm214_vm1, %v207_v5 }
  0xc9   :  { %2708 = vmatprep.mubr.msk.f32.mxu0 %vm214_vm1, %v110_v6  ;;  %2855 = vmatprep.mubr.msk.f32.mxu1 %vm214_vm1, %v208_v7 }
  0xcc   :  { %2709 = vmatmul.mubr.msk.f32.gmra.mrb[96].mxu0 %vm214_vm1, %v111_v8  ;;  %2856 = vmatmul.mubr.msk.f32.gmra.mrb[96].mxu1 %vm214_vm1, %v209_v9 }
  0xdf   :  { %v3690_v10 = vpop.f32.mrb[0].mxu0  ;;  %v3692_v11 = vpop.f32.mrb[0].mxu1 }
  0xe0   :  { %v3694_v12 = vpop.f32.mrb[1].mxu0  ;;  %v3696_v13 = vpop.f32.mrb[1].mxu1 }
  0xe3   :  { %v3698_v14 = vpop.f32.mrb[2].mxu0  ;;  %v3700_v15 = vpop.f32.mrb[2].mxu1 }
  0xe4   :  { %v3702_v16 = vpop.f32.mrb[3].mxu0  ;;  %v3704_v17 = vpop.f32.mrb[3].mxu1 }
  0xe7   :  { %v3706_v18 = vpop.f32.mrb[4].mxu0  ;;  %v3708_v19 = vpop.f32.mrb[4].mxu1 }
  0xe8   :  { %v3710_v20 = vpop.f32.mrb[5].mxu0  ;;  %v3712_v21 = vpop.f32.mrb[5].mxu1 }
  0xeb   :  { %v3714_v22 = vpop.f32.mrb[6].mxu0  ;;  %v3716_v23 = vpop.f32.mrb[6].mxu1 }
  0xec   :  { %v3718_v24 = vpop.f32.mrb[7].mxu0  ;;  %v3720_v25 = vpop.f32.mrb[7].mxu1 }
  0xef   :  { %v3722_v26 = vpop.f32.mrb[8].mxu0  ;;  %v3724_v27 = vpop.f32.mrb[8].mxu1 }
  0xf0   :  { %v3726_v28 = vpop.f32.mrb[9].mxu0  ;;  %v3728_v29 = vpop.f32.mrb[9].mxu1 }
  0xf3   :  { %v3730_v30 = vpop.f32.mrb[10].mxu0  ;;  %v3732_v31 = vpop.f32.mrb[10].mxu1 }
  0xf4   :  { %v3734_v32 = vpop.f32.mrb[11].mxu0  ;;  %v3736_v33 = vpop.f32.mrb[11].mxu1 }
  0xf7   :  { %v3738_v34 = vpop.f32.mrb[12].mxu0  ;;  %v3740_v35 = vpop.f32.mrb[12].mxu1 }
  0xf8   :  { %v3742_v36 = vpop.f32.mrb[13].mxu0  ;;  %v3744_v37 = vpop.f32.mrb[13].mxu1 }
  0xfb   :  { %v3746_v38 = vpop.f32.mrb[14].mxu0  ;;  %v3748_v39 = vpop.f32.mrb[14].mxu1 }
  0xfc   :  { %v3750_v40 = vpop.f32.mrb[15].mxu0  ;;  %v3752_v41 = vpop.f32.mrb[15].mxu1 }
  0xff   :  { %v3754_v42 = vpop.f32.mrb[16].mxu0  ;;  %v3756_v43 = vpop.f32.mrb[16].mxu1 }
 0x100   :  { %v3758_v44 = vpop.f32.mrb[17].mxu0  ;;  %v3760_v45 = vpop.f32.mrb[17].mxu1 }
 0x103   :  { %v3762_v46 = vpop.f32.mrb[18].mxu0  ;;  %v3764_v47 = vpop.f32.mrb[18].mxu1 }
 0x104   :  { %v3766_v48 = vpop.f32.mrb[19].mxu0  ;;  %v3768_v49 = vpop.f32.mrb[19].mxu1 }
 0x107   :  { %v3770_v50 = vpop.f32.mrb[20].mxu0  ;;  %v3772_v51 = vpop.f32.mrb[20].mxu1 }
 0x108   :  { %v3774_v52 = vpop.f32.mrb[21].mxu0  ;;  %v3776_v53 = vpop.f32.mrb[21].mxu1 }
 0x10b   :  { %v3778_v54 = vpop.f32.mrb[22].mxu0  ;;  %v3780_v55 = vpop.f32.mrb[22].mxu1 }
 0x10c   :  { %4238 = vst [vmem:[#allocation2_spill] sm:$0xff] %v3780_v55  ;;  %v3782_v56 = vpop.f32.mrb[23].mxu0  ;;  %v3784_v57 = vpop.f32.mrb[23].mxu1 }
 0x10f   :  { %v3786_v58 = vpop.f32.mrb[24].mxu0  ;;  %v3788_v59 = vpop.f32.mrb[24].mxu1 }
 0x110   :  { %4239 = vst [vmem:[#allocation3_spill] sm:$0xff] %v3786_v58  ;;  %4240 = vst [vmem:[#allocation4_spill] sm:$0xff] %v3788_v59  ;;  %v3790_v60 = vpop.f32.mrb[25].mxu0  ;;  %v3792_v61 = vpop.f32.mrb[25].mxu1 }
 0x113   :  { %v3794_v62 = vpop.f32.mrb[26].mxu0  ;;  %v3796_v63 = vpop.f32.mrb[26].mxu1 }
 0x114   :  { %4241 = vst [vmem:[#allocation5_spill] sm:$0xff] %v3794_v62  ;;  %4242 = vst [vmem:[#allocation6_spill] sm:$0xff] %v3796_v63  ;;  %v3798_v0 = vpop.f32.mrb[27].mxu0  ;;  %v3800_v1 = vpop.f32.mrb[27].mxu1 }
 0x115   :  { %4243 = vst [vmem:[#allocation7_spill] sm:$0xff] %v3798_v0  ;;  %4244 = vst [vmem:[#allocation8_spill] sm:$0xff] %v3800_v1 }
 0x117   :  { %v3802_v2 = vpop.f32.mrb[28].mxu0  ;;  %v3804_v3 = vpop.f32.mrb[28].mxu1 }
 0x118   :  { %4245 = vst [vmem:[#allocation9_spill] sm:$0xff] %v3802_v2  ;;  %4246 = vst [vmem:[#allocation10_spill] sm:$0xff] %v3804_v3  ;;  %v3806_v4 = vpop.f32.mrb[29].mxu0  ;;  %v3808_v5 = vpop.f32.mrb[29].mxu1 }
 0x119   :  { %4247 = vst [vmem:[#allocation11_spill] sm:$0xff] %v3806_v4  ;;  %4248 = vst [vmem:[#allocation12_spill] sm:$0xff] %v3808_v5 }
 0x11b   :  { %v3810_v6 = vpop.f32.mrb[30].mxu0  ;;  %v3812_v7 = vpop.f32.mrb[30].mxu1 }
 0x11c   :  { %4249 = vst [vmem:[#allocation13_spill] sm:$0xff] %v3810_v6  ;;  %4250 = vst [vmem:[#allocation14_spill] sm:$0xff] %v3812_v7  ;;  %v3814_v8 = vpop.f32.mrb[31].mxu0  ;;  %v3816_v9 = vpop.f32.mrb[31].mxu1 }
 0x11d   :  { %4251 = vst [vmem:[#allocation15_spill] sm:$0xff] %v3814_v8  ;;  %4252 = vst [vmem:[#allocation16_spill] sm:$0xff] %v3816_v9 }
 0x11f   :  { %v3818_v63 = vpop.f32.mrb[32].mxu0  ;;  %v3820_v62 = vpop.f32.mrb[32].mxu1 }
 0x120   :  { %4253 = vst [vmem:[#allocation17_spill] sm:$0xff] %v3818_v63  ;;  %4254 = vst [vmem:[#allocation18_spill] sm:$0xff] %v3820_v62  ;;  %v3822_v59 = vpop.f32.mrb[33].mxu0  ;;  %v3824_v2 = vpop.f32.mrb[33].mxu1 }
 0x121   :  { %4255 = vst [vmem:[#allocation19_spill] sm:$0xff] %v3822_v59  ;;  %4256 = vst [vmem:[#allocation20_spill] sm:$0xff] %v3824_v2 }
 0x123   :  { %v3826_v3 = vpop.f32.mrb[34].mxu0  ;;  %v3828_v4 = vpop.f32.mrb[34].mxu1 }
 0x124   :  { %4257 = vst [vmem:[#allocation21_spill] sm:$0xff] %v3826_v3  ;;  %4258 = vst [vmem:[#allocation22_spill] sm:$0xff] %v3828_v4  ;;  %v3830_v5 = vpop.f32.mrb[35].mxu0  ;;  %v3832_v6 = vpop.f32.mrb[35].mxu1 }
 0x125   :  { %4259 = vst [vmem:[#allocation23_spill] sm:$0xff] %v3830_v5  ;;  %4260 = vst [vmem:[#allocation24_spill] sm:$0xff] %v3832_v6 }
 0x127   :  { %v3834_v7 = vpop.f32.mrb[36].mxu0  ;;  %v3836_v8 = vpop.f32.mrb[36].mxu1 }
 0x128   :  { %4261 = vst [vmem:[#allocation25_spill] sm:$0xff] %v3834_v7  ;;  %4262 = vst [vmem:[#allocation26_spill] sm:$0xff] %v3836_v8  ;;  %v3838_v9 = vpop.f32.mrb[37].mxu0  ;;  %v3840_v63 = vpop.f32.mrb[37].mxu1 }
 0x129   :  { %4263 = vst [vmem:[#allocation27_spill] sm:$0xff] %v3838_v9  ;;  %4264 = vst [vmem:[#allocation28_spill] sm:$0xff] %v3840_v63 }
 0x12b   :  { %v3842_v62 = vpop.f32.mrb[38].mxu0  ;;  %v3844_v59 = vpop.f32.mrb[38].mxu1 }
 0x12c   :  { %4265 = vst [vmem:[#allocation29_spill] sm:$0xff] %v3842_v62  ;;  %4266 = vst [vmem:[#allocation30_spill] sm:$0xff] %v3844_v59  ;;  %v3846_v2 = vpop.f32.mrb[39].mxu0  ;;  %v3848_v3 = vpop.f32.mrb[39].mxu1 }
 0x12d   :  { %4267 = vst [vmem:[#allocation31_spill] sm:$0xff] %v3846_v2  ;;  %4268 = vst [vmem:[#allocation32_spill] sm:$0xff] %v3848_v3 }
 0x12f   :  { %v3850_v4 = vpop.f32.mrb[40].mxu0  ;;  %v3852_v5 = vpop.f32.mrb[40].mxu1 }
 0x130   :  { %4269 = vst [vmem:[#allocation33_spill] sm:$0xff] %v3850_v4  ;;  %4270 = vst [vmem:[#allocation34_spill] sm:$0xff] %v3852_v5  ;;  %v3854_v6 = vpop.f32.mrb[41].mxu0  ;;  %v3856_v7 = vpop.f32.mrb[41].mxu1 }
 0x131   :  { %4271 = vst [vmem:[#allocation35_spill] sm:$0xff] %v3854_v6  ;;  %4272 = vst [vmem:[#allocation36_spill] sm:$0xff] %v3856_v7 }
 0x133   :  { %v3858_v8 = vpop.f32.mrb[42].mxu0  ;;  %v3860_v9 = vpop.f32.mrb[42].mxu1 }
 0x134   :  { %4273 = vst [vmem:[#allocation37_spill] sm:$0xff] %v3858_v8  ;;  %4274 = vst [vmem:[#allocation38_spill] sm:$0xff] %v3860_v9  ;;  %v3862_v63 = vpop.f32.mrb[43].mxu0  ;;  %v3864_v62 = vpop.f32.mrb[43].mxu1 }
 0x135   :  { %4275 = vst [vmem:[#allocation39_spill] sm:$0xff] %v3862_v63  ;;  %4276 = vst [vmem:[#allocation40_spill] sm:$0xff] %v3864_v62 }
 0x137   :  { %v3866_v59 = vpop.f32.mrb[44].mxu0  ;;  %v3868_v2 = vpop.f32.mrb[44].mxu1 }
 0x138   :  { %4277 = vst [vmem:[#allocation41_spill] sm:$0xff] %v3866_v59  ;;  %4278 = vst [vmem:[#allocation42_spill] sm:$0xff] %v3868_v2  ;;  %v3870_v3 = vpop.f32.mrb[45].mxu0  ;;  %v3872_v4 = vpop.f32.mrb[45].mxu1 }
 0x139   :  { %4279 = vst [vmem:[#allocation43_spill] sm:$0xff] %v3870_v3  ;;  %4280 = vst [vmem:[#allocation44_spill] sm:$0xff] %v3872_v4 }
 0x13b   :  { %v3874_v5 = vpop.f32.mrb[46].mxu0  ;;  %v3876_v6 = vpop.f32.mrb[46].mxu1 }
 0x13c   :  { %4281 = vst [vmem:[#allocation45_spill] sm:$0xff] %v3874_v5  ;;  %4282 = vst [vmem:[#allocation46_spill] sm:$0xff] %v3876_v6  ;;  %v3878_v7 = vpop.f32.mrb[47].mxu0  ;;  %v3880_v8 = vpop.f32.mrb[47].mxu1  ;;  %v3891_v5 = vld [vmem:[%s4236_s2] ss:$0 sm:$0xff] }
 0x13d   :  { %4283 = vst [vmem:[#allocation47_spill] sm:$0xff] %v3878_v7  ;;  %4284 = vst [vmem:[#allocation48_spill] sm:$0xff] %v3880_v8 }
 0x13f   :  { %v2638_v9 = vpop.f32.mrb[48].mxu0  ;;  %v2785_v63 = vpop.f32.mrb[48].mxu1 }
 0x140   :  { %v1852_v62 = vmax.f32 %v3694_v12, %v2638_v9  ;;  %v1901_v59 = vmax.f32 %v3696_v13, %v2785_v63  ;;  %v3884_v58 = vpop.f32.mrb[49].mxu0  ;;  %v3886_v2 = vpop.f32.mrb[49].mxu1 }
 0x141   :  { %4285 = vst [vmem:[#allocation49_spill] sm:$0xff] %v3884_v58  ;;  %4286 = vst [vmem:[#allocation50_spill] sm:$0xff] %v3886_v2 }
 0x142   :  { %v1950_v6 = vmax.f32 %v1852_v62, %v1901_v59 }
 0x143   :  { %v2641_v4 = vpop.f32.mrb[50].mxu0  ;;  %v2788_v7 = vpop.f32.mrb[50].mxu1 }
 0x144   :  { %v2006_v8 = vadd.f32 %v3891_v5, %v1950_v6  ;;  %v1854_v3 = vmax.f32 %v3702_v16, %v2641_v4  ;;  %v1903_v12 = vmax.f32 %v3704_v17, %v2788_v7  ;;  %v1123_v9 = vpop.f32.mrb[51].mxu0  ;;  %v1613_v13 = vpop.f32.mrb[51].mxu1 }
 0x145   :  { %v1853_v63 = vmax.f32 %v3690_v10, %v1123_v9  ;;  %v1902_v2 = vmax.f32 %v3692_v11, %v1613_v13 }
 0x146   :  { %v2055_v58 = vmax.f32 %v2006_v8, 0.0  ;;  %v1952_v1 = vmax.f32 %v1854_v3, %v1903_v12 }
 0x147   :  { %v1951_v0 = vmax.f32 %v1853_v63, %v1902_v2  ;;  %v2644_v55 = vpop.f32.mrb[52].mxu0  ;;  %v2791_v59 = vpop.f32.mrb[52].mxu1 }
 0x148   :  { %2105 = vst.msk [vmem:[%s4237_s3] sm:$0xff] %vm2104_vm4, %v2055_v58  ;;  %v2008_v16 = vadd.f32 %v3891_v5, %v1952_v1  ;;  %v1856_v17 = vmax.f32 %v3710_v20, %v2644_v55  ;;  %v1905_v62 = vmax.f32 %v3712_v21, %v2791_v59  ;;  %v1133_v4 = vpop.f32.mrb[53].mxu0  ;;  %v1623_v10 = vpop.f32.mrb[53].mxu1 }
 0x149   :  { %v2007_v11 = vadd.f32 %v3891_v5, %v1951_v0  ;;  %v1855_v3 = vmax.f32 %v3698_v14, %v1133_v4  ;;  %v1904_v2 = vmax.f32 %v3700_v15, %v1623_v10 }
 0x14a   :  { %v2057_v6 = vmax.f32 %v2008_v16, 0.0  ;;  %v1954_v7 = vmax.f32 %v1856_v17, %v1905_v62 }
 0x14b   :  { %v2056_v8 = vmax.f32 %v2007_v11, 0.0  ;;  %v1953_v12 = vmax.f32 %v1855_v3, %v1904_v2  ;;  %v2647_v9 = vpop.f32.mrb[54].mxu0  ;;  %v2794_v58 = vpop.f32.mrb[54].mxu1 }
 0x14c   :  { %2107 = vst.msk [vmem:[%s4237_s3 + $0x10] sm:$0xff] %vm2104_vm4, %v2057_v6  ;;  %v2010_v20 = vadd.f32 %v3891_v5, %v1954_v7  ;;  %v1858_v21 = vmax.f32 %v3718_v24, %v2647_v9  ;;  %v1907_v55 = vmax.f32 %v3720_v25, %v2794_v58  ;;  %v1143_v14 = vpop.f32.mrb[55].mxu0  ;;  %v1633_v0 = vpop.f32.mrb[55].mxu1 }
 0x14d   :  { %2106 = vst.msk [vmem:[%s4237_s3 + $0x8] sm:$0xff] %vm2104_vm4, %v2056_v8  ;;  %v2009_v15 = vadd.f32 %v3891_v5, %v1953_v12  ;;  %v1857_v1 = vmax.f32 %v3706_v18, %v1143_v14  ;;  %v1906_v13 = vmax.f32 %v3708_v19, %v1633_v0 }
 0x14e   :  { %v2059_v63 = vmax.f32 %v2010_v20, 0.0  ;;  %v1956_v59 = vmax.f32 %v1858_v21, %v1907_v55 }
 0x14f   :  { %v2058_v16 = vmax.f32 %v2009_v15, 0.0  ;;  %v1955_v17 = vmax.f32 %v1857_v1, %v1906_v13  ;;  %v2650_v24 = vpop.f32.mrb[56].mxu0  ;;  %v2797_v62 = vpop.f32.mrb[56].mxu1 }
 0x150   :  { %2109 = vst.msk [vmem:[%s4237_s3 + $0x20] sm:$0xff] %vm2104_vm4, %v2059_v63  ;;  %v2012_v25 = vadd.f32 %v3891_v5, %v1956_v59  ;;  %v1860_v4 = vmax.f32 %v3726_v28, %v2650_v24  ;;  %v1909_v10 = vmax.f32 %v3728_v29, %v2797_v62  ;;  %v1153_v18 = vpop.f32.mrb[57].mxu0  ;;  %v1643_v11 = vpop.f32.mrb[57].mxu1 }
 0x151   :  { %2108 = vst.msk [vmem:[%s4237_s3 + $0x18] sm:$0xff] %vm2104_vm4, %v2058_v16  ;;  %v2011_v19 = vadd.f32 %v3891_v5, %v1955_v17  ;;  %v1859_v3 = vmax.f32 %v3714_v22, %v1153_v18  ;;  %v1908_v2 = vmax.f32 %v3716_v23, %v1643_v11 }
 0x152   :  { %v2061_v6 = vmax.f32 %v2012_v25, 0.0  ;;  %v1958_v7 = vmax.f32 %v1860_v4, %v1909_v10 }
 0x153   :  { %v2060_v8 = vmax.f32 %v2011_v19, 0.0  ;;  %v1957_v12 = vmax.f32 %v1859_v3, %v1908_v2  ;;  %v2653_v28 = vpop.f32.mrb[58].mxu0  ;;  %v2800_v9 = vpop.f32.mrb[58].mxu1 }
 0x154   :  { %2111 = vst.msk [vmem:[%s4237_s3 + $0x30] sm:$0xff] %vm2104_vm4, %v2061_v6  ;;  %v2014_v29 = vadd.f32 %v3891_v5, %v1958_v7  ;;  %v1862_v58 = vmax.f32 %v3734_v32, %v2653_v28  ;;  %v1911_v20 = vmax.f32 %v3736_v33, %v2800_v9  ;;  %v1163_v22 = vpop.f32.mrb[59].mxu0  ;;  %v1653_v21 = vpop.f32.mrb[59].mxu1 }
 0x155   :  { %2110 = vst.msk [vmem:[%s4237_s3 + $0x28] sm:$0xff] %vm2104_vm4, %v2060_v8  ;;  %v2013_v23 = vadd.f32 %v3891_v5, %v1957_v12  ;;  %v1861_v55 = vmax.f32 %v3722_v26, %v1163_v22  ;;  %v1910_v14 = vmax.f32 %v3724_v27, %v1653_v21 }
 0x156   :  { %v2063_v0 = vmax.f32 %v2014_v29, 0.0  ;;  %v1960_v15 = vmax.f32 %v1862_v58, %v1911_v20 }
 0x157   :  { %v2062_v1 = vmax.f32 %v2013_v23, 0.0  ;;  %v1959_v13 = vmax.f32 %v1861_v55, %v1910_v14  ;;  %v2656_v32 = vpop.f32.mrb[60].mxu0  ;;  %v2803_v63 = vpop.f32.mrb[60].mxu1 }
 0x158   :  { %2113 = vst.msk [vmem:[%s4237_s3 + $0x40] sm:$0xff] %vm2104_vm4, %v2063_v0  ;;  %v2016_v33 = vadd.f32 %v3891_v5, %v1960_v15  ;;  %v1864_v59 = vmax.f32 %v3742_v36, %v2656_v32  ;;  %v1913_v16 = vmax.f32 %v3744_v37, %v2803_v63  ;;  %v1173_v26 = vpop.f32.mrb[61].mxu0  ;;  %v1663_v17 = vpop.f32.mrb[61].mxu1 }
 0x159   :  { %2112 = vst.msk [vmem:[%s4237_s3 + $0x38] sm:$0xff] %vm2104_vm4, %v2062_v1  ;;  %v2015_v27 = vadd.f32 %v3891_v5, %v1959_v13  ;;  %v1863_v24 = vmax.f32 %v3730_v30, %v1173_v26  ;;  %v1912_v62 = vmax.f32 %v3732_v31, %v1663_v17 }
 0x15a   :  { %v2065_v25 = vmax.f32 %v2016_v33, 0.0  ;;  %v1962_v4 = vmax.f32 %v1864_v59, %v1913_v16 }
 0x15b   :  { %v2064_v10 = vmax.f32 %v2015_v27, 0.0  ;;  %v1961_v18 = vmax.f32 %v1863_v24, %v1912_v62  ;;  %v2659_v36 = vpop.f32.mrb[62].mxu0  ;;  %v2806_v11 = vpop.f32.mrb[62].mxu1 }
 0x15c   :  { %2115 = vst.msk [vmem:[%s4237_s3 + $0x50] sm:$0xff] %vm2104_vm4, %v2065_v25  ;;  %v2018_v37 = vadd.f32 %v3891_v5, %v1962_v4  ;;  %v1866_v19 = vmax.f32 %v3750_v40, %v2659_v36  ;;  %v1915_v3 = vmax.f32 %v3752_v41, %v2806_v11  ;;  %v1183_v30 = vpop.f32.mrb[63].mxu0  ;;  %v1673_v2 = vpop.f32.mrb[63].mxu1 }
 0x15d   :  { %2114 = vst.msk [vmem:[%s4237_s3 + $0x48] sm:$0xff] %vm2104_vm4, %v2064_v10  ;;  %v2017_v31 = vadd.f32 %v3891_v5, %v1961_v18  ;;  %v1865_v6 = vmax.f32 %v3738_v34, %v1183_v30  ;;  %v1914_v7 = vmax.f32 %v3740_v35, %v1673_v2 }
 0x15e   :  { %v2067_v8 = vmax.f32 %v2018_v37, 0.0  ;;  %v1964_v12 = vmax.f32 %v1866_v19, %v1915_v3 }
 0x15f   :  { %v2066_v28 = vmax.f32 %v2017_v31, 0.0  ;;  %v1963_v9 = vmax.f32 %v1865_v6, %v1914_v7  ;;  %v2662_v40 = vpop.f32.mrb[64].mxu0  ;;  %v2809_v29 = vpop.f32.mrb[64].mxu1 }
 0x160   :  { %2117 = vst.msk [vmem:[%s4237_s3 + $0x60] sm:$0xff] %vm2104_vm4, %v2067_v8  ;;  %v2020_v41 = vadd.f32 %v3891_v5, %v1964_v12  ;;  %v1868_v58 = vmax.f32 %v3758_v44, %v2662_v40  ;;  %v1917_v20 = vmax.f32 %v3760_v45, %v2809_v29  ;;  %v1193_v34 = vpop.f32.mrb[65].mxu0  ;;  %v1683_v22 = vpop.f32.mrb[65].mxu1 }
 0x161   :  { %2116 = vst.msk [vmem:[%s4237_s3 + $0x58] sm:$0xff] %vm2104_vm4, %v2066_v28  ;;  %v2019_v35 = vadd.f32 %v3891_v5, %v1963_v9  ;;  %v1867_v21 = vmax.f32 %v3746_v38, %v1193_v34  ;;  %v1916_v23 = vmax.f32 %v3748_v39, %v1683_v22  ;;  %v4287_v34 = vld [vmem:[#allocation2_spill] sm:$0xff] }
 0x162   :  { %v2069_v55 = vmax.f32 %v2020_v41, 0.0  ;;  %v1966_v14 = vmax.f32 %v1868_v58, %v1917_v20 }
 0x163   :  { %v2068_v0 = vmax.f32 %v2019_v35, 0.0  ;;  %v1965_v15 = vmax.f32 %v1867_v21, %v1916_v23  ;;  %v2665_v44 = vpop.f32.mrb[66].mxu0  ;;  %v2812_v1 = vpop.f32.mrb[66].mxu1 }
 0x164   :  { %2119 = vst.msk [vmem:[%s4237_s3 + $0x70] sm:$0xff] %vm2104_vm4, %v2069_v55  ;;  %v2022_v45 = vadd.f32 %v3891_v5, %v1966_v14  ;;  %v1870_v13 = vmax.f32 %v3766_v48, %v2665_v44  ;;  %v1919_v32 = vmax.f32 %v3768_v49, %v2812_v1  ;;  %v1203_v38 = vpop.f32.mrb[67].mxu0  ;;  %v1693_v63 = vpop.f32.mrb[67].mxu1  ;;  %v4289_v44 = vld [vmem:[#allocation8_spill] sm:$0xff] }
 0x165   :  { %2118 = vst.msk [vmem:[%s4237_s3 + $0x68] sm:$0xff] %vm2104_vm4, %v2068_v0  ;;  %v2021_v39 = vadd.f32 %v3891_v5, %v1965_v15  ;;  %v1869_v33 = vmax.f32 %v3754_v42, %v1203_v38  ;;  %v1918_v59 = vmax.f32 %v3756_v43, %v1693_v63  ;;  %v4288_v0 = vld [vmem:[#allocation7_spill] sm:$0xff]  ;;  %v4291_v63 = vld [vmem:[#allocation4_spill] sm:$0xff] }
 0x166   :  { %v2071_v16 = vmax.f32 %v2022_v45, 0.0  ;;  %v1968_v26 = vmax.f32 %v1870_v13, %v1919_v32  ;;  %v4290_v32 = vld [vmem:[#allocation3_spill] sm:$0xff] }
 0x167   :  { %v2070_v17 = vmax.f32 %v2021_v39, 0.0  ;;  %v1967_v27 = vmax.f32 %v1869_v33, %v1918_v59  ;;  %v2668_v48 = vpop.f32.mrb[68].mxu0  ;;  %v2815_v24 = vpop.f32.mrb[68].mxu1 }
 0x168   :  { %2121 = vst.msk [vmem:[%s4237_s3 + $0x80] sm:$0xff] %vm2104_vm4, %v2071_v16  ;;  %v2024_v49 = vadd.f32 %v3891_v5, %v1968_v26  ;;  %v1872_v62 = vmax.f32 %v3774_v52, %v2668_v48  ;;  %v1921_v25 = vmax.f32 %v3776_v53, %v2815_v24  ;;  %v1213_v42 = vpop.f32.mrb[69].mxu0  ;;  %v1703_v4 = vpop.f32.mrb[69].mxu1  ;;  %v4292_v24 = vld [vmem:[#allocation11_spill] sm:$0xff] }
 0x169   :  { %2120 = vst.msk [vmem:[%s4237_s3 + $0x78] sm:$0xff] %vm2104_vm4, %v2070_v17  ;;  %v2023_v43 = vadd.f32 %v3891_v5, %v1967_v27  ;;  %v1871_v10 = vmax.f32 %v3762_v46, %v1213_v42  ;;  %v1920_v18 = vmax.f32 %v3764_v47, %v1703_v4 }
 0x16a   :  { %v2073_v36 = vmax.f32 %v2024_v49, 0.0  ;;  %v1970_v11 = vmax.f32 %v1872_v62, %v1921_v25  ;;  %v4293_v62 = vld [vmem:[#allocation12_spill] sm:$0xff] }
 0x16b   :  { %v2072_v37 = vmax.f32 %v2023_v43, 0.0  ;;  %v1969_v19 = vmax.f32 %v1871_v10, %v1920_v18  ;;  %v2671_v52 = vpop.f32.mrb[70].mxu0  ;;  %v2818_v3 = vpop.f32.mrb[70].mxu1  ;;  %v4294_v10 = vld [vmem:[#allocation5_spill] sm:$0xff] }
 0x16c   :  { %2123 = vst.msk [vmem:[%s4237_s3 + $0x90] sm:$0xff] %vm2104_vm4, %v2073_v36  ;;  %v2026_v53 = vadd.f32 %v3891_v5, %v1970_v11  ;;  %v1874_v30 = vmax.f32 %v3782_v56, %v2671_v52  ;;  %v1923_v2 = vmax.f32 %v3784_v57, %v2818_v3  ;;  %v1223_v46 = vpop.f32.mrb[71].mxu0  ;;  %v1713_v31 = vpop.f32.mrb[71].mxu1  ;;  %v4295_v36 = vld [vmem:[#allocation6_spill] sm:$0xff] }
 0x16d   :  { %2122 = vst.msk [vmem:[%s4237_s3 + $0x88] sm:$0xff] %vm2104_vm4, %v2072_v37  ;;  %v2025_v47 = vadd.f32 %v3891_v5, %v1969_v19  ;;  %v1873_v6 = vmax.f32 %v3770_v50, %v1223_v46  ;;  %v1922_v7 = vmax.f32 %v3772_v51, %v1713_v31  ;;  %v4296_v46 = vld [vmem:[#allocation15_spill] sm:$0xff] }
 0x16e   :  { %v2075_v8 = vmax.f32 %v2026_v53, 0.0  ;;  %v1972_v12 = vmax.f32 %v1874_v30, %v1923_v2 }
 0x16f   :  { %v2074_v28 = vmax.f32 %v2025_v47, 0.0  ;;  %v1971_v9 = vmax.f32 %v1873_v6, %v1922_v7  ;;  %v2674_v56 = vpop.f32.mrb[72].mxu0  ;;  %v2821_v40 = vpop.f32.mrb[72].mxu1  ;;  %v4297_v47 = vld [vmem:[#allocation16_spill] sm:$0xff] }
 0x170   :  { %2125 = vst.msk [vmem:[%s4237_s3 + $0xa0] sm:$0xff] %vm2104_vm4, %v2075_v8  ;;  %v2028_v57 = vadd.f32 %v3891_v5, %v1972_v12  ;;  %v1876_v29 = vmax.f32 %v3790_v60, %v2674_v56  ;;  %v1925_v41 = vmax.f32 %v3792_v61, %v2821_v40  ;;  %v1233_v50 = vpop.f32.mrb[73].mxu0  ;;  %v1723_v58 = vpop.f32.mrb[73].mxu1  ;;  %v4299_v56 = vld [vmem:[#allocation10_spill] sm:$0xff] }
 0x171   :  { %2124 = vst.msk [vmem:[%s4237_s3 + $0x98] sm:$0xff] %vm2104_vm4, %v2074_v28  ;;  %v2027_v51 = vadd.f32 %v3891_v5, %v1971_v9  ;;  %v1875_v20 = vmax.f32 %v3778_v54, %v1233_v50  ;;  %v1924_v22 = vmax.f32 %v4287_v34, %v1723_v58  ;;  %v4298_v28 = vld [vmem:[#allocation9_spill] sm:$0xff]  ;;  %v4300_v34 = vld [vmem:[#allocation19_spill] sm:$0xff] }
 0x172   :  { %v2077_v35 = vmax.f32 %v2028_v57, 0.0  ;;  %v1974_v21 = vmax.f32 %v1876_v29, %v1925_v41 }
 0x173   :  { %v2076_v23 = vmax.f32 %v2027_v51, 0.0  ;;  %v1973_v55 = vmax.f32 %v1875_v20, %v1924_v22  ;;  %v2677_v60 = vpop.f32.mrb[74].mxu0  ;;  %v2824_v14 = vpop.f32.mrb[74].mxu1 }
 0x174   :  { %2127 = vst.msk [vmem:[%s4237_s3 + $0xb0] sm:$0xff] %vm2104_vm4, %v2077_v35  ;;  %v2030_v61 = vadd.f32 %v3891_v5, %v1974_v21  ;;  %v1878_v15 = vmax.f32 %v4288_v0, %v2677_v60  ;;  %v1927_v1 = vmax.f32 %v4289_v44, %v2824_v14  ;;  %v1243_v54 = vpop.f32.mrb[75].mxu0  ;;  %v1733_v45 = vpop.f32.mrb[75].mxu1  ;;  %v4301_v35 = vld [vmem:[#allocation20_spill] sm:$0xff]  ;;  %v4302_v14 = vld [vmem:[#allocation13_spill] sm:$0xff]  ;;  %v4303_v0 = vld [vmem:[#allocation14_spill] sm:$0xff] }
 0x175   :  { %2126 = vst.msk [vmem:[%s4237_s3 + $0xa8] sm:$0xff] %vm2104_vm4, %v2076_v23  ;;  %v2029_v13 = vadd.f32 %v3891_v5, %v1973_v55  ;;  %v1877_v38 = vmax.f32 %v4290_v32, %v1243_v54  ;;  %v1926_v39 = vmax.f32 %v4291_v63, %v1733_v45  ;;  %v4304_v63 = vld [vmem:[#allocation23_spill] sm:$0xff] }
 0x176   :  { %v2079_v33 = vmax.f32 %v2030_v61, 0.0  ;;  %v1976_v59 = vmax.f32 %v1878_v15, %v1927_v1 }
 0x177   :  { %v2078_v16 = vmax.f32 %v2029_v13, 0.0  ;;  %v1975_v26 = vmax.f32 %v1877_v38, %v1926_v39  ;;  %v2680_v17 = vpop.f32.mrb[76].mxu0  ;;  %v2827_v27 = vpop.f32.mrb[76].mxu1 }
 0x178   :  { %2129 = vst.msk [vmem:[%s4237_s3 + $0xc0] sm:$0xff] %vm2104_vm4, %v2079_v33  ;;  %v2032_v48 = vadd.f32 %v3891_v5, %v1976_v59  ;;  %v1880_v49 = vmax.f32 %v4292_v24, %v2680_v17  ;;  %v1929_v25 = vmax.f32 %v4293_v62, %v2827_v27  ;;  %v1253_v42 = vpop.f32.mrb[77].mxu0  ;;  %v1743_v4 = vpop.f32.mrb[77].mxu1  ;;  %v4305_v33 = vld [vmem:[#allocation24_spill] sm:$0xff]  ;;  %v4306_v27 = vld [vmem:[#allocation17_spill] sm:$0xff]  ;;  %v4307_v24 = vld [vmem:[#allocation18_spill] sm:$0xff] }
 0x179   :  { %2128 = vst.msk [vmem:[%s4237_s3 + $0xb8] sm:$0xff] %vm2104_vm4, %v2078_v16  ;;  %v2031_v43 = vadd.f32 %v3891_v5, %v1975_v26  ;;  %v1879_v18 = vmax.f32 %v4294_v10, %v1253_v42  ;;  %v1928_v11 = vmax.f32 %v4295_v36, %v1743_v4  ;;  %v4308_v36 = vld [vmem:[#allocation27_spill] sm:$0xff] }
 0x17a   :  { %v2081_v37 = vmax.f32 %v2032_v48, 0.0  ;;  %v1978_v19 = vmax.f32 %v1880_v49, %v1929_v25 }
 0x17b   :  { %v2080_v52 = vmax.f32 %v2031_v43, 0.0  ;;  %v1977_v3 = vmax.f32 %v1879_v18, %v1928_v11  ;;  %v2683_v53 = vpop.f32.mrb[78].mxu0  ;;  %v2830_v30 = vpop.f32.mrb[78].mxu1 }
 0x17c   :  { %2131 = vst.msk [vmem:[%s4237_s3 + $0xd0] sm:$0xff] %vm2104_vm4, %v2081_v37  ;;  %v2034_v2 = vadd.f32 %v3891_v5, %v1978_v19  ;;  %v1882_v31 = vmax.f32 %v4296_v46, %v2683_v53  ;;  %v1931_v6 = vmax.f32 %v4297_v47, %v2830_v30  ;;  %v1263_v7 = vpop.f32.mrb[79].mxu0  ;;  %v1753_v8 = vpop.f32.mrb[79].mxu1  ;;  %v4309_v37 = vld [vmem:[#allocation28_spill] sm:$0xff]  ;;  %v4310_v30 = vld [vmem:[#allocation21_spill] sm:$0xff]  ;;  %v4311_v46 = vld [vmem:[#allocation22_spill] sm:$0xff] }
 0x17d   :  { %2130 = vst.msk [vmem:[%s4237_s3 + $0xc8] sm:$0xff] %vm2104_vm4, %v2080_v52  ;;  %v2033_v12 = vadd.f32 %v3891_v5, %v1977_v3  ;;  %v1881_v9 = vmax.f32 %v4298_v28, %v1263_v7  ;;  %v1930_v40 = vmax.f32 %v4299_v56, %v1753_v8  ;;  %v4312_v56 = vld [vmem:[#allocation31_spill] sm:$0xff] }
 0x17e   :  { %v2083_v57 = vmax.f32 %v2034_v2, 0.0  ;;  %v1980_v29 = vmax.f32 %v1882_v31, %v1931_v6 }
 0x17f   :  { %v2082_v41 = vmax.f32 %v2033_v12, 0.0  ;;  %v1979_v50 = vmax.f32 %v1881_v9, %v1930_v40  ;;  %v2686_v58 = vpop.f32.mrb[80].mxu0  ;;  %v2833_v51 = vpop.f32.mrb[80].mxu1 }
 0x180   :  { %2133 = vst.msk [vmem:[%s4237_s3 + $0xe0] sm:$0xff] %vm2104_vm4, %v2083_v57  ;;  %v2036_v20 = vadd.f32 %v3891_v5, %v1980_v29  ;;  %v1884_v22 = vmax.f32 %v4300_v34, %v2686_v58  ;;  %v1933_v21 = vmax.f32 %v4301_v35, %v2833_v51  ;;  %v1273_v23 = vpop.f32.mrb[81].mxu0  ;;  %v1763_v55 = vpop.f32.mrb[81].mxu1  ;;  %v4313_v57 = vld [vmem:[#allocation32_spill] sm:$0xff]  ;;  %v4314_v51 = vld [vmem:[#allocation25_spill] sm:$0xff]  ;;  %v4315_v34 = vld [vmem:[#allocation26_spill] sm:$0xff] }
 0x181   :  { %2132 = vst.msk [vmem:[%s4237_s3 + $0xd8] sm:$0xff] %vm2104_vm4, %v2082_v41  ;;  %v2035_v60 = vadd.f32 %v3891_v5, %v1979_v50  ;;  %v1883_v61 = vmax.f32 %v4302_v14, %v1273_v23  ;;  %v1932_v15 = vmax.f32 %v4303_v0, %v1763_v55  ;;  %v4316_v0 = vld [vmem:[#allocation35_spill] sm:$0xff] }
 0x182   :  { %v2085_v44 = vmax.f32 %v2036_v20, 0.0  ;;  %v1982_v1 = vmax.f32 %v1884_v22, %v1933_v21 }
 0x183   :  { %v2084_v54 = vmax.f32 %v2035_v60, 0.0  ;;  %v1981_v45 = vmax.f32 %v1883_v61, %v1932_v15  ;;  %v2689_v13 = vpop.f32.mrb[82].mxu0  ;;  %v2836_v32 = vpop.f32.mrb[82].mxu1 }
 0x184   :  { %2135 = vst.msk [vmem:[%s4237_s3 + $0xf0] sm:$0xff] %vm2104_vm4, %v2085_v44  ;;  %v2038_v38 = vadd.f32 %v3891_v5, %v1982_v1  ;;  %v1886_v39 = vmax.f32 %v4304_v63, %v2689_v13  ;;  %v1935_v59 = vmax.f32 %v4305_v33, %v2836_v32  ;;  %v1283_v16 = vpop.f32.mrb[83].mxu0  ;;  %v1773_v26 = vpop.f32.mrb[83].mxu1  ;;  %v4317_v44 = vld [vmem:[#allocation36_spill] sm:$0xff]  ;;  %v4318_v32 = vld [vmem:[#allocation29_spill] sm:$0xff]  ;;  %v4319_v63 = vld [vmem:[#allocation30_spill] sm:$0xff] }
 0x185   :  { %2134 = vst.msk [vmem:[%s4237_s3 + $0xe8] sm:$0xff] %vm2104_vm4, %v2084_v54  ;;  %v2037_v17 = vadd.f32 %v3891_v5, %v1981_v45  ;;  %v1885_v48 = vmax.f32 %v4306_v27, %v1283_v16  ;;  %v1934_v49 = vmax.f32 %v4307_v24, %v1773_v26  ;;  %v4320_v24 = vld [vmem:[#allocation39_spill] sm:$0xff] }
 0x186   :  { %v2087_v62 = vmax.f32 %v2038_v38, 0.0  ;;  %v1984_v25 = vmax.f32 %v1886_v39, %v1935_v59 }
 0x187   :  { %v2086_v42 = vmax.f32 %v2037_v17, 0.0  ;;  %v1983_v4 = vmax.f32 %v1885_v48, %v1934_v49  ;;  %v2692_v43 = vpop.f32.mrb[84].mxu0  ;;  %v2839_v10 = vpop.f32.mrb[84].mxu1 }
 0x188   :  { %2137 = vst.msk [vmem:[%s4237_s3 + $0x100] sm:$0xff] %vm2104_vm4, %v2087_v62  ;;  %v2040_v18 = vadd.f32 %v3891_v5, %v1984_v25  ;;  %v1888_v11 = vmax.f32 %v4308_v36, %v2692_v43  ;;  %v1937_v19 = vmax.f32 %v4309_v37, %v2839_v10  ;;  %v1293_v52 = vpop.f32.mrb[85].mxu0  ;;  %v1783_v3 = vpop.f32.mrb[85].mxu1  ;;  %v4321_v62 = vld [vmem:[#allocation40_spill] sm:$0xff]  ;;  %v4322_v10 = vld [vmem:[#allocation33_spill] sm:$0xff]  ;;  %v4323_v36 = vld [vmem:[#allocation34_spill] sm:$0xff] }
 0x189   :  { %2136 = vst.msk [vmem:[%s4237_s3 + $0xf8] sm:$0xff] %vm2104_vm4, %v2086_v42  ;;  %v2039_v53 = vadd.f32 %v3891_v5, %v1983_v4  ;;  %v1887_v2 = vmax.f32 %v4310_v30, %v1293_v52  ;;  %v1936_v31 = vmax.f32 %v4311_v46, %v1783_v3  ;;  %v4324_v46 = vld [vmem:[#allocation43_spill] sm:$0xff] }
 0x18a   :  { %v2089_v47 = vmax.f32 %v2040_v18, 0.0  ;;  %v1986_v6 = vmax.f32 %v1888_v11, %v1937_v19 }
 0x18b   :  { %v2088_v7 = vmax.f32 %v2039_v53, 0.0  ;;  %v1985_v8 = vmax.f32 %v1887_v2, %v1936_v31  ;;  %v2695_v12 = vpop.f32.mrb[86].mxu0  ;;  %v2842_v28 = vpop.f32.mrb[86].mxu1 }
 0x18c   :  { %2139 = vst.msk [vmem:[%s4237_s3 + $0x110] sm:$0xff] %vm2104_vm4, %v2089_v47  ;;  %v2042_v9 = vadd.f32 %v3891_v5, %v1986_v6  ;;  %v1890_v40 = vmax.f32 %v4312_v56, %v2695_v12  ;;  %v1939_v29 = vmax.f32 %v4313_v57, %v2842_v28  ;;  %v1303_v41 = vpop.f32.mrb[87].mxu0  ;;  %v1793_v50 = vpop.f32.mrb[87].mxu1  ;;  %v4325_v47 = vld [vmem:[#allocation44_spill] sm:$0xff]  ;;  %v4326_v28 = vld [vmem:[#allocation37_spill] sm:$0xff]  ;;  %v4327_v56 = vld [vmem:[#allocation38_spill] sm:$0xff] }
 0x18d   :  { %2138 = vst.msk [vmem:[%s4237_s3 + $0x108] sm:$0xff] %vm2104_vm4, %v2088_v7  ;;  %v2041_v58 = vadd.f32 %v3891_v5, %v1985_v8  ;;  %v1889_v20 = vmax.f32 %v4314_v51, %v1303_v41  ;;  %v1938_v22 = vmax.f32 %v4315_v34, %v1793_v50  ;;  %v4328_v34 = vld [vmem:[#allocation47_spill] sm:$0xff] }
 0x18e   :  { %v2091_v35 = vmax.f32 %v2042_v9, 0.0  ;;  %v1988_v21 = vmax.f32 %v1890_v40, %v1939_v29 }
 0x18f   :  { %v2090_v23 = vmax.f32 %v2041_v58, 0.0  ;;  %v1987_v55 = vmax.f32 %v1889_v20, %v1938_v22  ;;  %v2698_v60 = vpop.f32.mrb[88].mxu0  ;;  %v2845_v14 = vpop.f32.mrb[88].mxu1 }
 0x190   :  { %2141 = vst.msk [vmem:[%s4237_s3 + $0x120] sm:$0xff] %vm2104_vm4, %v2091_v35  ;;  %v2044_v61 = vadd.f32 %v3891_v5, %v1988_v21  ;;  %v1892_v15 = vmax.f32 %v4316_v0, %v2698_v60  ;;  %v1941_v1 = vmax.f32 %v4317_v44, %v2845_v14  ;;  %v1313_v54 = vpop.f32.mrb[89].mxu0  ;;  %v1803_v45 = vpop.f32.mrb[89].mxu1  ;;  %v4329_v35 = vld [vmem:[#allocation48_spill] sm:$0xff]  ;;  %v4330_v14 = vld [vmem:[#allocation41_spill] sm:$0xff]  ;;  %v4331_v0 = vld [vmem:[#allocation42_spill] sm:$0xff] }
 0x191   :  { %2140 = vst.msk [vmem:[%s4237_s3 + $0x118] sm:$0xff] %vm2104_vm4, %v2090_v23  ;;  %v2043_v13 = vadd.f32 %v3891_v5, %v1987_v55  ;;  %v1891_v38 = vmax.f32 %v4318_v32, %v1313_v54  ;;  %v1940_v39 = vmax.f32 %v4319_v63, %v1803_v45  ;;  %v4332_v63 = vld [vmem:[#allocation49_spill] sm:$0xff] }
 0x192   :  { %v2093_v33 = vmax.f32 %v2044_v61, 0.0  ;;  %v1990_v59 = vmax.f32 %v1892_v15, %v1941_v1 }
 0x193   :  { %v2092_v16 = vmax.f32 %v2043_v13, 0.0  ;;  %v1989_v26 = vmax.f32 %v1891_v38, %v1940_v39  ;;  %v2701_v17 = vpop.f32.mrb[90].mxu0  ;;  %v2848_v27 = vpop.f32.mrb[90].mxu1 }
 0x194   :  { %2143 = vst.msk [vmem:[%s4237_s3 + $0x130] sm:$0xff] %vm2104_vm4, %v2093_v33  ;;  %v2046_v48 = vadd.f32 %v3891_v5, %v1990_v59  ;;  %v1894_v49 = vmax.f32 %v4320_v24, %v2701_v17  ;;  %v1943_v25 = vmax.f32 %v4321_v62, %v2848_v27  ;;  %v1323_v42 = vpop.f32.mrb[91].mxu0  ;;  %v1813_v4 = vpop.f32.mrb[91].mxu1  ;;  %v4333_v33 = vld [vmem:[#allocation50_spill] sm:$0xff]  ;;  %v4334_v27 = vld [vmem:[#allocation45_spill] sm:$0xff] }
 0x195   :  { %2142 = vst.msk [vmem:[%s4237_s3 + $0x128] sm:$0xff] %vm2104_vm4, %v2092_v16  ;;  %v2045_v43 = vadd.f32 %v3891_v5, %v1989_v26  ;;  %v1893_v18 = vmax.f32 %v4322_v10, %v1323_v42  ;;  %v1942_v11 = vmax.f32 %v4323_v36, %v1813_v4  ;;  %v4335_v24 = vld [vmem:[#allocation46_spill] sm:$0xff] }
 0x196   :  { %v2095_v37 = vmax.f32 %v2046_v48, 0.0  ;;  %v1992_v19 = vmax.f32 %v1894_v49, %v1943_v25 }
 0x197   :  { %v2094_v52 = vmax.f32 %v2045_v43, 0.0  ;;  %v1991_v3 = vmax.f32 %v1893_v18, %v1942_v11  ;;  %v2704_v53 = vpop.f32.mrb[92].mxu0  ;;  %v2851_v30 = vpop.f32.mrb[92].mxu1 }
 0x198   :  { %2145 = vst.msk [vmem:[%s4237_s3 + $0x140] sm:$0xff] %vm2104_vm4, %v2095_v37  ;;  %v2048_v2 = vadd.f32 %v3891_v5, %v1992_v19  ;;  %v1896_v31 = vmax.f32 %v4324_v46, %v2704_v53  ;;  %v1945_v6 = vmax.f32 %v4325_v47, %v2851_v30  ;;  %v1333_v7 = vpop.f32.mrb[93].mxu0  ;;  %v1823_v8 = vpop.f32.mrb[93].mxu1 }
 0x199   :  { %2144 = vst.msk [vmem:[%s4237_s3 + $0x138] sm:$0xff] %vm2104_vm4, %v2094_v52  ;;  %v2047_v12 = vadd.f32 %v3891_v5, %v1991_v3  ;;  %v1895_v9 = vmax.f32 %v4326_v28, %v1333_v7  ;;  %v1944_v40 = vmax.f32 %v4327_v56, %v1823_v8 }
 0x19a   :  { %v2097_v57 = vmax.f32 %v2048_v2, 0.0  ;;  %v1994_v29 = vmax.f32 %v1896_v31, %v1945_v6 }
 0x19b   :  { %v2096_v41 = vmax.f32 %v2047_v12, 0.0  ;;  %v1993_v50 = vmax.f32 %v1895_v9, %v1944_v40  ;;  %v2707_v58 = vpop.f32.mrb[94].mxu0  ;;  %v2854_v51 = vpop.f32.mrb[94].mxu1 }
 0x19c   :  { %2147 = vst.msk [vmem:[%s4237_s3 + $0x150] sm:$0xff] %vm2104_vm4, %v2097_v57  ;;  %v2050_v20 = vadd.f32 %v3891_v5, %v1994_v29  ;;  %v1898_v22 = vmax.f32 %v4328_v34, %v2707_v58  ;;  %v1947_v21 = vmax.f32 %v4329_v35, %v2854_v51  ;;  %v1343_v23 = vpop.f32.mrb[95].mxu0  ;;  %v1833_v55 = vpop.f32.mrb[95].mxu1 }
 0x19d   :  { %2146 = vst.msk [vmem:[%s4237_s3 + $0x148] sm:$0xff] %vm2104_vm4, %v2096_v41  ;;  %v2049_v60 = vadd.f32 %v3891_v5, %v1993_v50  ;;  %v1897_v61 = vmax.f32 %v4330_v14, %v1343_v23  ;;  %v1946_v15 = vmax.f32 %v4331_v0, %v1833_v55 }
 0x19e   :  { %v2099_v44 = vmax.f32 %v2050_v20, 0.0  ;;  %v1996_v1 = vmax.f32 %v1898_v22, %v1947_v21 }
 0x19f   :  { %v2098_v54 = vmax.f32 %v2049_v60, 0.0  ;;  %v1995_v45 = vmax.f32 %v1897_v61, %v1946_v15  ;;  %v2710_v13 = vpop.f32.mrb[96].mxu0  ;;  %v2857_v32 = vpop.f32.mrb[96].mxu1 }
 0x1a0   :  { %2149 = vst.msk [vmem:[%s4237_s3 + $0x160] sm:$0xff] %vm2104_vm4, %v2099_v44  ;;  %v2052_v38 = vadd.f32 %v3891_v5, %v1996_v1  ;;  %v1900_v39 = vmax.f32 %v4332_v63, %v2710_v13  ;;  %v1949_v59 = vmax.f32 %v4333_v33, %v2857_v32  ;;  %v1353_v16 = vpop.f32.mrb[97].mxu0  ;;  %v1843_v26 = vpop.f32.mrb[97].mxu1 }
 0x1a1   :  { %2148 = vst.msk [vmem:[%s4237_s3 + $0x158] sm:$0xff] %vm2104_vm4, %v2098_v54  ;;  %v2051_v17 = vadd.f32 %v3891_v5, %v1995_v45  ;;  %v1899_v48 = vmax.f32 %v4334_v27, %v1353_v16  ;;  %v1948_v49 = vmax.f32 %v4335_v24, %v1843_v26 }
 0x1a2   :  { %v2101_v62 = vmax.f32 %v2052_v38, 0.0  ;;  %v1998_v25 = vmax.f32 %v1900_v39, %v1949_v59 }
 0x1a3   :  { %v2100_v42 = vmax.f32 %v2051_v17, 0.0  ;;  %v1997_v4 = vmax.f32 %v1899_v48, %v1948_v49 }
 0x1a4   :  { %2151 = vst.msk [vmem:[%s4237_s3 + $0x170] sm:$0xff] %vm2104_vm4, %v2101_v62  ;;  %v2054_v43 = vadd.f32 %v3891_v5, %v1998_v25 }
 0x1a5   :  { %2150 = vst.msk [vmem:[%s4237_s3 + $0x168] sm:$0xff] %vm2104_vm4, %v2100_v42  ;;  %v2053_v10 = vadd.f32 %v3891_v5, %v1997_v4 }
 0x1a6   :  { %v2103_v18 = vmax.f32 %v2054_v43, 0.0 }
 0x1a7   :  { %v2102_v36 = vmax.f32 %v2053_v10, 0.0 }
 0x1a8   :  { %2153 = vst.msk [vmem:[%s4237_s3 + $0x180] sm:$0xff] %vm2104_vm4, %v2103_v18 }
 0x1a9   :  { %2152 = vst.msk [vmem:[%s4237_s3 + $0x178] sm:$0xff] %vm2104_vm4, %v2102_v36 }

// kernel: net_forward.3
= control target key start
LH: loop header
LB: loop body
LE: loop exit
PB: predicated region body
PF: predicated region fallthrough
CT: control target
= control target key end

     0   :  { %v5689_v3 = vmov 0.0|0.0   ;;  %vm252_vm0 = vcmask 179200   ;;  %s5679_s0 = inlined_call_operand.vmem [shape: f32[800,150], index: 0, kind: input, shape index: {}]   ;;  %s5680_s1 = inlined_call_operand.vmem [shape: f32[150,16], index: 1, kind: input, shape index: {}]   ;;  %s5681_s2 = inlined_call_operand.vmem [shape: f32[1,16], index: 2, kind: input, shape index: {}]   ;;  %s5682_s3 = inlined_call_operand.vmem [shape: f32[25,16,128], index: 3, kind: input, shape index: {}]   ;;  %s5683_s4 = inlined_call_operand.vmem [shape: f32[1,128], index: 4, kind: input, shape index: {}]   ;;  %s5684_s5 = inlined_call_operand.vmem [shape: f32[128,128], index: 5, kind: input, shape index: {}]   ;;  %s5685_s6 = inlined_call_operand.vmem [shape: f32[1,128], index: 6, kind: input, shape index: {}]   ;;  %s5686_s7 = inlined_call_operand.vmem [shape: f32[128,10], index: 7, kind: input, shape index: {}]   ;;  %s5687_s8 = inlined_call_operand.vmem [shape: f32[1,10], index: 8, kind: input, shape index: {}]   ;;  %s5688_s9 = inlined_call_operand.hbm [shape: f32[2,10], index: 9, kind: output, shape index: {}]  }
   0x1   :  { %v233_v0 = vld [vmem:[%s5680_s1] sm:$0xff]  ;;  %v234_v1 = vld [vmem:[%s5680_s1 + $0x8] sm:$0xff]  ;;  %v235_v2 = vld [vmem:[%s5680_s1 + $0x10] sm:$0xff]  ;;  %3921 = vmatprep.subr.bf16.mxu0 %v5689_v3  ;;  %4071 = vmatprep.subr.bf16.mxu1 %v5689_v3 }
   0x2   :  { %v3922_v4 = vpack.c.bf16 %v234_v1, %v233_v0  ;;  %v236_v5 = vld [vmem:[%s5680_s1 + $0x18] sm:$0xff]  ;;  %v237_v7 = vld [vmem:[%s5680_s1 + $0x20] sm:$0xff]  ;;  %v238_v8 = vld [vmem:[%s5680_s1 + $0x28] sm:$0xff] }
   0x3   :  { %v3925_v6 = vpack.c.bf16 %v236_v5, %v235_v2  ;;  %v34_v9 = vld [vmem:[%s5679_s0 + $0x8] sm:$0xff]  ;;  %v3928_v10 = vpack.c.bf16 %v238_v8, %v237_v7  ;;  %v239_v11 = vld [vmem:[%s5680_s1 + $0x30] sm:$0xff]  ;;  %v240_v12 = vld [vmem:[%s5680_s1 + $0x38] sm:$0xff] }
   0x4   :  { %3923 = vmatpush1.bf16.msra.mxu0 %v3922_v4  ;;  %4081 = vmatpush1.bf16.msra.mxu1 %v3922_v4  ;;  %v3931_v13 = vpack.c.bf16 %v240_v12, %v239_v11  ;;  %v241_v14 = vld [vmem:[%s5680_s1 + $0x40] sm:$0xff]  ;;  %v242_v15 = vld [vmem:[%s5680_s1 + $0x48] sm:$0xff]  ;;  %v243_v17 = vld [vmem:[%s5680_s1 + $0x50] sm:$0xff] }
   0x5   :  { %3924 = vmatprep.subr.bf16.mxu0 %v5689_v3  ;;  %4072 = vmatprep.subr.bf16.mxu1 %v5689_v3  ;;  %v3934_v16 = vpack.c.bf16 %v242_v15, %v241_v14  ;;  %v244_v18 = vld [vmem:[%s5680_s1 + $0x58] sm:$0xff]  ;;  %v245_v20 = vld [vmem:[%s5680_s1 + $0x60] sm:$0xff]  ;;  %v246_v21 = vld [vmem:[%s5680_s1 + $0x68] sm:$0xff] }
   0x6   :  { %3390 = vmatprep.mubr.msk.f32.mxu0 %vm252_vm0, %v34_v9  ;;  %v3937_v19 = vpack.c.bf16 %v244_v18, %v243_v17  ;;  %v176_v22 = vld [vmem:[%s5679_s0 + $0x478] sm:$0xff]  ;;  %v3940_v23 = vpack.c.bf16 %v246_v21, %v245_v20  ;;  %v247_v24 = vld [vmem:[%s5680_s1 + $0x70] sm:$0xff]  ;;  %v249_v27 = vld [vmem:[%s5680_s1 + $0x80] sm:$0xff] }
   0x7   :  { %3461 = vmatprep.mubr.msk.f32.mxu1 %vm252_vm0, %v176_v22  ;;  %v248_v25 = vld [vmem:[%s5680_s1 + $0x78] sm:$0xff]  ;;  %v250_v28 = vld [vmem:[%s5680_s1 + $0x88] sm:$0xff] }
   0x8   :  { %3926 = vmatpush1.bf16.msra.mxu0 %v3925_v6  ;;  %4082 = vmatpush1.bf16.msra.mxu1 %v3925_v6  ;;  %v3943_v26 = vpack.c.bf16 %v248_v25, %v247_v24  ;;  %v3946_v29 = vpack.c.bf16 %v250_v28, %v249_v27 }
   0x9   :  { %3927 = vmatprep.subr.bf16.mxu0 %v5689_v3  ;;  %4073 = vmatprep.subr.bf16.mxu1 %v5689_v3 }
   0xc   :  { %3929 = vmatpush1.bf16.msra.mxu0 %v3928_v10  ;;  %4083 = vmatpush1.bf16.msra.mxu1 %v3928_v10 }
   0xd   :  { %3930 = vmatprep.subr.bf16.mxu0 %v5689_v3  ;;  %4074 = vmatprep.subr.bf16.mxu1 %v5689_v3 }
  0x10   :  { %3932 = vmatpush1.bf16.msra.mxu0 %v3931_v13  ;;  %4084 = vmatpush1.bf16.msra.mxu1 %v3931_v13 }
  0x11   :  { %3933 = vmatprep.subr.bf16.mxu0 %v5689_v3  ;;  %4075 = vmatprep.subr.bf16.mxu1 %v5689_v3 }
  0x14   :  { %3935 = vmatpush1.bf16.msra.mxu0 %v3934_v16  ;;  %4085 = vmatpush1.bf16.msra.mxu1 %v3934_v16 }
  0x15   :  { %3936 = vmatprep.subr.bf16.mxu0 %v5689_v3  ;;  %4076 = vmatprep.subr.bf16.mxu1 %v5689_v3 }
  0x18   :  { %3938 = vmatpush1.bf16.msra.mxu0 %v3937_v19  ;;  %4086 = vmatpush1.bf16.msra.mxu1 %v3937_v19 }
  0x19   :  { %3939 = vmatprep.subr.bf16.mxu0 %v5689_v3  ;;  %4077 = vmatprep.subr.bf16.mxu1 %v5689_v3 }
  0x1c   :  { %3941 = vmatpush1.bf16.msra.mxu0 %v3940_v23  ;;  %4087 = vmatpush1.bf16.msra.mxu1 %v3940_v23 }
  0x1d   :  { %3942 = vmatprep.subr.bf16.mxu0 %v5689_v3  ;;  %4078 = vmatprep.subr.bf16.mxu1 %v5689_v3 }
  0x20   :  { %3944 = vmatpush1.bf16.msra.mxu0 %v3943_v26  ;;  %4088 = vmatpush1.bf16.msra.mxu1 %v3943_v26 }
  0x21   :  { %3945 = vmatprep.subr.bf16.mxu0 %v5689_v3  ;;  %4079 = vmatprep.subr.bf16.mxu1 %v5689_v3 }
  0x22   :  { %14 = vsyncpa [#allocation3], 0  ;;  %v5691_v30 = vmov 0.0   ;;  %v251_v31 = vld [vmem:[%s5680_s1 + $0x90] sm:$0x3f]  ;;  %vm553_vm1 = vcmask 1045504  }
  0x23   :  { %v33_v32 = vld [vmem:[%s5679_s0] sm:$0xff]  ;;  %v36_v33 = vld [vmem:[%s5679_s0 + $0x18] sm:$0xff]  ;;  %v175_v34 = vld [vmem:[%s5679_s0 + $0x470] sm:$0xff]  ;;  %vm4121_vm2 = vmmov 0   ;;  %vm1259_vm3 = vcmask 130048   ;;  %s4122_s27 = smov [#allocation2]  }
  0x24   :  { %3947 = vmatpush1.bf16.msra.mxu0 %v3946_v29  ;;  %4089 = vmatpush1.bf16.msra.mxu1 %v3946_v29  ;;  %v178_v35 = vld [vmem:[%s5679_s0 + $0x488] sm:$0xff]  ;;  %v35_v36 = vld [vmem:[%s5679_s0 + $0x10] sm:$0xff]  ;;  %v177_v38 = vld [vmem:[%s5679_s0 + $0x480] sm:$0xff]  ;;  %s3381_s28 = sshll.u32 %s4122_s27, 4  ;;  %vm3373_vm4 = vcmask 74752   ;;  %s3382_s28 = int_to_ptr.vmem [resolvable:$true] %s3381_s28 }
  0x25   :  { %593 = vmatprep.subr.mxu0 %v5691_v30  ;;  %4080 = vmatprep.subr.mxu1 %v5691_v30  ;;  %v38_v37 = vld [vmem:[%s5679_s0 + $0x28] sm:$0xff]  ;;  %v180_v39 = vld [vmem:[%s5679_s0 + $0x498] sm:$0xff]  ;;  %v37_v40 = vld [vmem:[%s5679_s0 + $0x20] sm:$0xff]  ;;  %p4100_p1 = scmp.lt.s32.totalorder %s3382_s28, %s3382_s28 }
  0x26   :  { %v40_v41 = vld [vmem:[%s5679_s0 + $0x38] sm:$0xff]  ;;  %v179_v42 = vld [vmem:[%s5679_s0 + $0x490] sm:$0xff]  ;;  %v182_v43 = vld [vmem:[%s5679_s0 + $0x4a8] sm:$0xff] }
  0x27   :  { %v39_v44 = vld [vmem:[%s5679_s0 + $0x30] sm:$0xff]  ;;  %v42_v45 = vld [vmem:[%s5679_s0 + $0x48] sm:$0xff]  ;;  %v181_v46 = vld [vmem:[%s5679_s0 + $0x4a0] sm:$0xff] }
  0x28   :  { %3389 = vmatpush1.msk.msra.mxu0 %vm553_vm1, %v251_v31  ;;  %4090 = vmatpush1.msk.msra.mxu1 %vm553_vm1, %v251_v31  ;;  %v184_v47 = vld [vmem:[%s5679_s0 + $0x4b8] sm:$0xff]  ;;  %v41_v48 = vld [vmem:[%s5679_s0 + $0x40] sm:$0xff]  ;;  %v183_v50 = vld [vmem:[%s5679_s0 + $0x4b0] sm:$0xff] }
  0x29   :  { %622 = vmatmul.mubr.f32.vlgmr.msra.gmra.mrb[0].mxu0 %v33_v32  ;;  %977 = vmatmul.mubr.f32.vlgmr.msra.gmra.mrb[0].mxu1 %v175_v34  ;;  %v44_v49 = vld [vmem:[%s5679_s0 + $0x58] sm:$0xff]  ;;  %v186_v51 = vld [vmem:[%s5679_s0 + $0x4c8] sm:$0xff]  ;;  %v43_v52 = vld [vmem:[%s5679_s0 + $0x50] sm:$0xff] }
  0x2a   :  { %3391 = vmatprep.mubr.msk.f32.mxu0 %vm252_vm0, %v36_v33  ;;  %3462 = vmatprep.mubr.msk.f32.mxu1 %vm252_vm0, %v178_v35  ;;  %v46_v53 = vld [vmem:[%s5679_s0 + $0x68] sm:$0xff]  ;;  %v185_v54 = vld [vmem:[%s5679_s0 + $0x4c0] sm:$0xff]  ;;  %v188_v55 = vld [vmem:[%s5679_s0 + $0x4d8] sm:$0xff] }
  0x2b   :  { %3948 = vmatprep.subr.bf16.mxu1 %v5689_v3  ;;  %v45_v56 = vld [vmem:[%s5679_s0 + $0x60] sm:$0xff]  ;;  %v48_v57 = vld [vmem:[%s5679_s0 + $0x78] sm:$0xff]  ;;  %v187_v58 = vld [vmem:[%s5679_s0 + $0x4d0] sm:$0xff] }
  0x2c   :  { %v190_v59 = vld [vmem:[%s5679_s0 + $0x4e8] sm:$0xff]  ;;  %v47_v60 = vld [vmem:[%s5679_s0 + $0x70] sm:$0xff]  ;;  %v189_v62 = vld [vmem:[%s5679_s0 + $0x4e0] sm:$0xff] }
  0x2d   :  { %627 = vmatmul.mubr.f32.gmra.mrb[2].mxu0 %v35_v36  ;;  %982 = vmatmul.mubr.f32.gmra.mrb[2].mxu1 %v177_v38  ;;  %v50_v61 = vld [vmem:[%s5679_s0 + $0x88] sm:$0xff]  ;;  %v192_v63 = vld [vmem:[%s5679_s0 + $0x4f8] sm:$0xff]  ;;  %v49_v0 = vld [vmem:[%s5679_s0 + $0x80] sm:$0xff] }
  0x2e   :  { %3392 = vmatprep.mubr.msk.f32.mxu0 %vm252_vm0, %v38_v37  ;;  %3463 = vmatprep.mubr.msk.f32.mxu1 %vm252_vm0, %v180_v39  ;;  %v52_v1 = vld [vmem:[%s5679_s0 + $0x98] sm:$0xff]  ;;  %v191_v2 = vld [vmem:[%s5679_s0 + $0x4f0] sm:$0xff]  ;;  %v194_v4 = vld [vmem:[%s5679_s0 + $0x508] sm:$0xff] }
  0x2f   :  { %v51_v5 = vld [vmem:[%s5679_s0 + $0x90] sm:$0xff]  ;;  %v54_v6 = vld [vmem:[%s5679_s0 + $0xa8] sm:$0xff]  ;;  %v193_v7 = vld [vmem:[%s5679_s0 + $0x500] sm:$0xff] }
  0x30   :  { %v196_v8 = vld [vmem:[%s5679_s0 + $0x518] sm:$0xff]  ;;  %v53_v9 = vld [vmem:[%s5679_s0 + $0xa0] sm:$0xff]  ;;  %v195_v11 = vld [vmem:[%s5679_s0 + $0x510] sm:$0xff] }
  0x31   :  { %632 = vmatmul.mubr.f32.gmra.mrb[4].mxu0 %v37_v40  ;;  %987 = vmatmul.mubr.f32.gmra.mrb[4].mxu1 %v179_v42  ;;  %v56_v10 = vld [vmem:[%s5679_s0 + $0xb8] sm:$0xff]  ;;  %v198_v12 = vld [vmem:[%s5679_s0 + $0x528] sm:$0xff]  ;;  %v55_v13 = vld [vmem:[%s5679_s0 + $0xb0] sm:$0xff] }
  0x32   :  { %3393 = vmatprep.mubr.msk.f32.mxu0 %vm252_vm0, %v40_v41  ;;  %3464 = vmatprep.mubr.msk.f32.mxu1 %vm252_vm0, %v182_v43  ;;  %v58_v14 = vld [vmem:[%s5679_s0 + $0xc8] sm:$0xff]  ;;  %v197_v15 = vld [vmem:[%s5679_s0 + $0x520] sm:$0xff]  ;;  %v200_v16 = vld [vmem:[%s5679_s0 + $0x538] sm:$0xff] }
  0x33   :  { %v57_v17 = vld [vmem:[%s5679_s0 + $0xc0] sm:$0xff]  ;;  %v60_v18 = vld [vmem:[%s5679_s0 + $0xd8] sm:$0xff]  ;;  %v199_v19 = vld [vmem:[%s5679_s0 + $0x530] sm:$0xff] }
  0x34   :  { %v202_v20 = vld [vmem:[%s5679_s0 + $0x548] sm:$0xff]  ;;  %v59_v21 = vld [vmem:[%s5679_s0 + $0xd0] sm:$0xff]  ;;  %v201_v23 = vld [vmem:[%s5679_s0 + $0x540] sm:$0xff] }
  0x35   :  { %637 = vmatmul.mubr.f32.gmra.mrb[6].mxu0 %v39_v44  ;;  %992 = vmatmul.mubr.f32.gmra.mrb[6].mxu1 %v181_v46  ;;  %v62_v22 = vld [vmem:[%s5679_s0 + $0xe8] sm:$0xff]  ;;  %v204_v24 = vld [vmem:[%s5679_s0 + $0x558] sm:$0xff]  ;;  %v61_v25 = vld [vmem:[%s5679_s0 + $0xe0] sm:$0xff] }
  0x36   :  { %3394 = vmatprep.mubr.msk.f32.mxu0 %vm252_vm0, %v42_v45  ;;  %3465 = vmatprep.mubr.msk.f32.mxu1 %vm252_vm0, %v184_v47  ;;  %v64_v26 = vld [vmem:[%s5679_s0 + $0xf8] sm:$0xff]  ;;  %v203_v27 = vld [vmem:[%s5679_s0 + $0x550] sm:$0xff]  ;;  %v206_v28 = vld [vmem:[%s5679_s0 + $0x568] sm:$0xff] }
  0x37   :  { %v63_v29 = vld [vmem:[%s5679_s0 + $0xf0] sm:$0xff]  ;;  %v66_v31 = vld [vmem:[%s5679_s0 + $0x108] sm:$0xff]  ;;  %v205_v32 = vld [vmem:[%s5679_s0 + $0x560] sm:$0xff] }
  0x38   :  { %v208_v33 = vld [vmem:[%s5679_s0 + $0x578] sm:$0xff]  ;;  %v65_v34 = vld [vmem:[%s5679_s0 + $0x100] sm:$0xff]  ;;  %v207_v36 = vld [vmem:[%s5679_s0 + $0x570] sm:$0xff] }
  0x39   :  { %642 = vmatmul.mubr.f32.gmra.mrb[8].mxu0 %v41_v48  ;;  %997 = vmatmul.mubr.f32.gmra.mrb[8].mxu1 %v183_v50  ;;  %v68_v35 = vld [vmem:[%s5679_s0 + $0x118] sm:$0xff]  ;;  %v210_v37 = vld [vmem:[%s5679_s0 + $0x588] sm:$0xff]  ;;  %v67_v38 = vld [vmem:[%s5679_s0 + $0x110] sm:$0xff] }
  0x3a   :  { %3395 = vmatprep.mubr.msk.f32.mxu0 %vm252_vm0, %v44_v49  ;;  %3466 = vmatprep.mubr.msk.f32.mxu1 %vm252_vm0, %v186_v51  ;;  %v70_v39 = vld [vmem:[%s5679_s0 + $0x128] sm:$0xff]  ;;  %v209_v40 = vld [vmem:[%s5679_s0 + $0x580] sm:$0xff]  ;;  %v212_v41 = vld [vmem:[%s5679_s0 + $0x598] sm:$0xff] }
  0x3b   :  { %v69_v42 = vld [vmem:[%s5679_s0 + $0x120] sm:$0xff]  ;;  %v72_v43 = vld [vmem:[%s5679_s0 + $0x138] sm:$0xff]  ;;  %v211_v44 = vld [vmem:[%s5679_s0 + $0x590] sm:$0xff] }
  0x3c   :  { %v214_v45 = vld [vmem:[%s5679_s0 + $0x5a8] sm:$0xff]  ;;  %v71_v46 = vld [vmem:[%s5679_s0 + $0x130] sm:$0xff]  ;;  %v213_v48 = vld [vmem:[%s5679_s0 + $0x5a0] sm:$0xff] }
  0x3d   :  { %647 = vmatmul.mubr.f32.gmra.mrb[10].mxu0 %v43_v52  ;;  %1002 = vmatmul.mubr.f32.gmra.mrb[10].mxu1 %v185_v54  ;;  %v74_v47 = vld [vmem:[%s5679_s0 + $0x148] sm:$0xff]  ;;  %v216_v49 = vld [vmem:[%s5679_s0 + $0x5b8] sm:$0xff]  ;;  %v73_v50 = vld [vmem:[%s5679_s0 + $0x140] sm:$0xff] }
  0x3e   :  { %3396 = vmatprep.mubr.msk.f32.mxu0 %vm252_vm0, %v46_v53  ;;  %3467 = vmatprep.mubr.msk.f32.mxu1 %vm252_vm0, %v188_v55  ;;  %v76_v51 = vld [vmem:[%s5679_s0 + $0x158] sm:$0xff]  ;;  %v215_v52 = vld [vmem:[%s5679_s0 + $0x5b0] sm:$0xff]  ;;  %v218_v53 = vld [vmem:[%s5679_s0 + $0x5c8] sm:$0xff] }
  0x3f   :  { %v75_v54 = vld [vmem:[%s5679_s0 + $0x150] sm:$0xff]  ;;  %v78_v55 = vld [vmem:[%s5679_s0 + $0x168] sm:$0xff] }
  0x41   :  { %652 = vmatmul.mubr.f32.gmra.mrb[12].mxu0 %v45_v56  ;;  %1007 = vmatmul.mubr.f32.gmra.mrb[12].mxu1 %v187_v58  ;;  %v217_v56 = vld [vmem:[%s5679_s0 + $0x5c0] sm:$0xff] }
  0x42   :  { %3397 = vmatprep.mubr.msk.f32.mxu0 %vm252_vm0, %v48_v57  ;;  %3468 = vmatprep.mubr.msk.f32.mxu1 %vm252_vm0, %v190_v59  ;;  %v220_v57 = vld [vmem:[%s5679_s0 + $0x5d8] sm:$0xff]  ;;  %v77_v58 = vld [vmem:[%s5679_s0 + $0x160] sm:$0xff] }
  0x43   :  { %v80_v59 = vld [vmem:[%s5679_s0 + $0x178] sm:$0xff] }
  0x45   :  { %657 = vmatmul.mubr.f32.gmra.mrb[14].mxu0 %v47_v60  ;;  %1012 = vmatmul.mubr.f32.gmra.mrb[14].mxu1 %v189_v62  ;;  %v219_v60 = vld [vmem:[%s5679_s0 + $0x5d0] sm:$0xff] }
  0x46   :  { %3398 = vmatprep.mubr.msk.f32.mxu0 %vm252_vm0, %v50_v61  ;;  %3469 = vmatprep.mubr.msk.f32.mxu1 %vm252_vm0, %v192_v63  ;;  %v222_v61 = vld [vmem:[%s5679_s0 + $0x5e8] sm:$0xff]  ;;  %v79_v62 = vld [vmem:[%s5679_s0 + $0x170] sm:$0xff] }
  0x47   :  { %v82_v63 = vld [vmem:[%s5679_s0 + $0x188] sm:$0xff] }
  0x49   :  { %662 = vmatmul.mubr.f32.gmra.mrb[16].mxu0 %v49_v0  ;;  %1017 = vmatmul.mubr.f32.gmra.mrb[16].mxu1 %v191_v2  ;;  %v221_v0 = vld [vmem:[%s5679_s0 + $0x5e0] sm:$0xff] }
  0x4a   :  { %3399 = vmatprep.mubr.msk.f32.mxu0 %vm252_vm0, %v52_v1  ;;  %3470 = vmatprep.mubr.msk.f32.mxu1 %vm252_vm0, %v194_v4  ;;  %v224_v1 = vld [vmem:[%s5679_s0 + $0x5f8] sm:$0xff]  ;;  %v81_v2 = vld [vmem:[%s5679_s0 + $0x180] sm:$0xff] }
  0x4b   :  { %v84_v4 = vld [vmem:[%s5679_s0 + $0x198] sm:$0xff] }
  0x4d   :  { %667 = vmatmul.mubr.f32.gmra.mrb[18].mxu0 %v51_v5  ;;  %1022 = vmatmul.mubr.f32.gmra.mrb[18].mxu1 %v193_v7  ;;  %v223_v5 = vld [vmem:[%s5679_s0 + $0x5f0] sm:$0xff] }
  0x4e   :  { %3400 = vmatprep.mubr.msk.f32.mxu0 %vm252_vm0, %v54_v6  ;;  %3471 = vmatprep.mubr.msk.f32.mxu1 %vm252_vm0, %v196_v8  ;;  %v226_v6 = vld [vmem:[%s5679_s0 + $0x608] sm:$0xff]  ;;  %v83_v7 = vld [vmem:[%s5679_s0 + $0x190] sm:$0xff] }
  0x4f   :  { %v86_v8 = vld [vmem:[%s5679_s0 + $0x1a8] sm:$0xff] }
  0x51   :  { %672 = vmatmul.mubr.f32.gmra.mrb[20].mxu0 %v53_v9  ;;  %1027 = vmatmul.mubr.f32.gmra.mrb[20].mxu1 %v195_v11  ;;  %v225_v9 = vld [vmem:[%s5679_s0 + $0x600] sm:$0xff] }
  0x52   :  { %3401 = vmatprep.mubr.msk.f32.mxu0 %vm252_vm0, %v56_v10  ;;  %3472 = vmatprep.mubr.msk.f32.mxu1 %vm252_vm0, %v198_v12  ;;  %v228_v10 = vld [vmem:[%s5679_s0 + $0x618] sm:$0xff]  ;;  %v85_v11 = vld [vmem:[%s5679_s0 + $0x1a0] sm:$0xff] }
  0x53   :  { %v88_v12 = vld [vmem:[%s5679_s0 + $0x1b8] sm:$0xff] }
  0x55   :  { %677 = vmatmul.mubr.f32.gmra.mrb[22].mxu0 %v55_v13  ;;  %1032 = vmatmul.mubr.f32.gmra.mrb[22].mxu1 %v197_v15  ;;  %v227_v13 = vld [vmem:[%s5679_s0 + $0x610] sm:$0xff] }
  0x56   :  { %3402 = vmatprep.mubr.msk.f32.mxu0 %vm252_vm0, %v58_v14  ;;  %3473 = vmatprep.mubr.msk.f32.mxu1 %vm252_vm0, %v200_v16  ;;  %v230_v14 = vld [vmem:[%s5679_s0 + $0x628] sm:$0xff]  ;;  %v87_v15 = vld [vmem:[%s5679_s0 + $0x1b0] sm:$0xff] }
  0x57   :  { %v90_v16 = vld [vmem:[%s5679_s0 + $0x1c8] sm:$0xff] }
  0x59   :  { %682 = vmatmul.mubr.f32.gmra.mrb[24].mxu0 %v57_v17  ;;  %1037 = vmatmul.mubr.f32.gmra.mrb[24].mxu1 %v199_v19  ;;  %v229_v17 = vld [vmem:[%s5679_s0 + $0x620] sm:$0xff] }
  0x5a   :  { %3403 = vmatprep.mubr.msk.f32.mxu0 %vm252_vm0, %v60_v18  ;;  %3474 = vmatprep.mubr.msk.f32.mxu1 %vm252_vm0, %v202_v20  ;;  %v232_v18 = vld [vmem:[%s5679_s0 + $0x638] sm:$0xff]  ;;  %v89_v19 = vld [vmem:[%s5679_s0 + $0x1c0] sm:$0xff] }
  0x5b   :  { %v92_v20 = vld [vmem:[%s5679_s0 + $0x1d8] sm:$0xff] }
  0x5d   :  { %687 = vmatmul.mubr.f32.gmra.mrb[26].mxu0 %v59_v21  ;;  %1042 = vmatmul.mubr.f32.gmra.mrb[26].mxu1 %v201_v23  ;;  %v231_v21 = vld [vmem:[%s5679_s0 + $0x630] sm:$0xff]  ;;  %v94_v23 = vld [vmem:[%s5679_s0 + $0x1e8] sm:$0xff] }
  0x5e   :  { %3404 = vmatprep.mubr.msk.f32.mxu0 %vm252_vm0, %v62_v22  ;;  %3475 = vmatprep.mubr.msk.f32.mxu1 %vm252_vm0, %v204_v24  ;;  %v91_v22 = vld [vmem:[%s5679_s0 + $0x1d0] sm:$0xff]  ;;  %v93_v24 = vld [vmem:[%s5679_s0 + $0x1e0] sm:$0xff] }
  0x61   :  { %692 = vmatmul.mubr.f32.gmra.mrb[28].mxu0 %v61_v25  ;;  %1047 = vmatmul.mubr.f32.gmra.mrb[28].mxu1 %v203_v27  ;;  %v96_v25 = vld [vmem:[%s5679_s0 + $0x1f8] sm:$0xff]  ;;  %v98_v27 = vld [vmem:[%s5679_s0 + $0x208] sm:$0xff] }
  0x62   :  { %3405 = vmatprep.mubr.msk.f32.mxu0 %vm252_vm0, %v64_v26  ;;  %3476 = vmatprep.mubr.msk.f32.mxu1 %vm252_vm0, %v206_v28  ;;  %v95_v26 = vld [vmem:[%s5679_s0 + $0x1f0] sm:$0xff]  ;;  %v97_v28 = vld [vmem:[%s5679_s0 + $0x200] sm:$0xff] }
  0x65   :  { %697 = vmatmul.mubr.f32.gmra.mrb[30].mxu0 %v63_v29  ;;  %1052 = vmatmul.mubr.f32.gmra.mrb[30].mxu1 %v205_v32  ;;  %v100_v29 = vld [vmem:[%s5679_s0 + $0x218] sm:$0xff]  ;;  %v102_v32 = vld [vmem:[%s5679_s0 + $0x228] sm:$0xff] }
  0x66   :  { %3406 = vmatprep.mubr.msk.f32.mxu0 %vm252_vm0, %v66_v31  ;;  %3477 = vmatprep.mubr.msk.f32.mxu1 %vm252_vm0, %v208_v33  ;;  %v99_v31 = vld [vmem:[%s5679_s0 + $0x210] sm:$0xff]  ;;  %v101_v33 = vld [vmem:[%s5679_s0 + $0x220] sm:$0xff] }
  0x69   :  { %702 = vmatmul.mubr.f32.gmra.mrb[32].mxu0 %v65_v34  ;;  %1057 = vmatmul.mubr.f32.gmra.mrb[32].mxu1 %v207_v36  ;;  %v104_v34 = vld [vmem:[%s5679_s0 + $0x238] sm:$0xff]  ;;  %v106_v36 = vld [vmem:[%s5679_s0 + $0x248] sm:$0xff] }
  0x6a   :  { %3407 = vmatprep.mubr.msk.f32.mxu0 %vm252_vm0, %v68_v35  ;;  %3478 = vmatprep.mubr.msk.f32.mxu1 %vm252_vm0, %v210_v37  ;;  %v103_v35 = vld [vmem:[%s5679_s0 + $0x230] sm:$0xff]  ;;  %v105_v37 = vld [vmem:[%s5679_s0 + $0x240] sm:$0xff] }
  0x6d   :  { %707 = vmatmul.mubr.f32.gmra.mrb[34].mxu0 %v67_v38  ;;  %1062 = vmatmul.mubr.f32.gmra.mrb[34].mxu1 %v209_v40  ;;  %v108_v38 = vld [vmem:[%s5679_s0 + $0x258] sm:$0xff]  ;;  %v110_v40 = vld [vmem:[%s5679_s0 + $0x268] sm:$0xff] }
  0x6e   :  { %3408 = vmatprep.mubr.msk.f32.mxu0 %vm252_vm0, %v70_v39  ;;  %3479 = vmatprep.mubr.msk.f32.mxu1 %vm252_vm0, %v212_v41  ;;  %v107_v39 = vld [vmem:[%s5679_s0 + $0x250] sm:$0xff]  ;;  %v109_v41 = vld [vmem:[%s5679_s0 + $0x260] sm:$0xff] }
  0x71   :  { %712 = vmatmul.mubr.f32.gmra.mrb[36].mxu0 %v69_v42  ;;  %1067 = vmatmul.mubr.f32.gmra.mrb[36].mxu1 %v211_v44  ;;  %v112_v42 = vld [vmem:[%s5679_s0 + $0x278] sm:$0xff]  ;;  %v114_v44 = vld [vmem:[%s5679_s0 + $0x288] sm:$0xff] }
  0x72   :  { %3409 = vmatprep.mubr.msk.f32.mxu0 %vm252_vm0, %v72_v43  ;;  %3480 = vmatprep.mubr.msk.f32.mxu1 %vm252_vm0, %v214_v45  ;;  %v111_v43 = vld [vmem:[%s5679_s0 + $0x270] sm:$0xff]  ;;  %v113_v45 = vld [vmem:[%s5679_s0 + $0x280] sm:$0xff] }
  0x75   :  { %717 = vmatmul.mubr.f32.gmra.mrb[38].mxu0 %v71_v46  ;;  %1072 = vmatmul.mubr.f32.gmra.mrb[38].mxu1 %v213_v48  ;;  %v116_v46 = vld [vmem:[%s5679_s0 + $0x298] sm:$0xff]  ;;  %v118_v48 = vld [vmem:[%s5679_s0 + $0x2a8] sm:$0xff] }
  0x76   :  { %3410 = vmatprep.mubr.msk.f32.mxu0 %vm252_vm0, %v74_v47  ;;  %3481 = vmatprep.mubr.msk.f32.mxu1 %vm252_vm0, %v216_v49  ;;  %v115_v47 = vld [vmem:[%s5679_s0 + $0x290] sm:$0xff]  ;;  %v117_v49 = vld [vmem:[%s5679_s0 + $0x2a0] sm:$0xff] }
  0x79   :  { %722 = vmatmul.mubr.f32.gmra.mrb[40].mxu0 %v73_v50  ;;  %1077 = vmatmul.mubr.f32.gmra.mrb[40].mxu1 %v215_v52  ;;  %v120_v50 = vld [vmem:[%s5679_s0 + $0x2b8] sm:$0xff]  ;;  %v122_v52 = vld [vmem:[%s5679_s0 + $0x2c8] sm:$0xff] }
  0x7a   :  { %3411 = vmatprep.mubr.msk.f32.mxu0 %vm252_vm0, %v76_v51  ;;  %3482 = vmatprep.mubr.msk.f32.mxu1 %vm252_vm0, %v218_v53  ;;  %v119_v51 = vld [vmem:[%s5679_s0 + $0x2b0] sm:$0xff]  ;;  %v121_v53 = vld [vmem:[%s5679_s0 + $0x2c0] sm:$0xff] }
  0x7d   :  { %727 = vmatmul.mubr.f32.gmra.mrb[42].mxu0 %v75_v54  ;;  %1082 = vmatmul.mubr.f32.gmra.mrb[42].mxu1 %v217_v56  ;;  %v124_v54 = vld [vmem:[%s5679_s0 + $0x2d8] sm:$0xff]  ;;  %v126_v56 = vld [vmem:[%s5679_s0 + $0x2e8] sm:$0xff] }
  0x7e   :  { %3412 = vmatprep.mubr.msk.f32.mxu0 %vm252_vm0, %v78_v55  ;;  %3483 = vmatprep.mubr.msk.f32.mxu1 %vm252_vm0, %v220_v57  ;;  %v123_v55 = vld [vmem:[%s5679_s0 + $0x2d0] sm:$0xff] }
  0x7f   :  { %v3491_v57 = vld [vmem:[%s5682_s3 + $0x10] sm:$0xff] }
  0x81   :  { %732 = vmatmul.mubr.f32.gmra.mrb[44].mxu0 %v77_v58  ;;  %1087 = vmatmul.mubr.f32.gmra.mrb[44].mxu1 %v219_v60  ;;  %v3492_v58 = vld [vmem:[%s5682_s3 + $0x18] sm:$0xff] }
  0x82   :  { %3413 = vmatprep.mubr.msk.f32.mxu0 %vm252_vm0, %v80_v59  ;;  %3484 = vmatprep.mubr.msk.f32.mxu1 %vm252_vm0, %v222_v61  ;;  %v125_v59 = vld [vmem:[%s5679_s0 + $0x2e0] sm:$0xff]  ;;  %v3949_v60 = vpack.c.bf16 %v3492_v58, %v3491_v57  ;;  %v128_v61 = vld [vmem:[%s5679_s0 + $0x2f8] sm:$0xff] }
  0x84   :  { %3950 = vmatpush3.bf16.msra.mxu1 %v3949_v60 }
  0x85   :  { %737 = vmatmul.mubr.f32.gmra.mrb[46].mxu0 %v79_v62  ;;  %1092 = vmatmul.mubr.f32.gmra.mrb[46].mxu1 %v221_v0  ;;  %v127_v62 = vld [vmem:[%s5679_s0 + $0x2f0] sm:$0xff]  ;;  %v129_v0 = vld [vmem:[%s5679_s0 + $0x300] sm:$0xff] }
  0x86   :  { %3414 = vmatprep.mubr.msk.f32.mxu0 %vm252_vm0, %v82_v63  ;;  %3485 = vmatprep.mubr.msk.f32.mxu1 %vm252_vm0, %v224_v1  ;;  %v130_v63 = vld [vmem:[%s5679_s0 + $0x308] sm:$0xff]  ;;  %v132_v1 = vld [vmem:[%s5679_s0 + $0x318] sm:$0xff] }
  0x87   :  { %3951 = vmatprep.subr.bf16.mxu1 %v5689_v3 }
  0x89   :  { %742 = vmatmul.mubr.f32.gmra.mrb[48].mxu0 %v81_v2  ;;  %1097 = vmatmul.mubr.f32.gmra.mrb[48].mxu1 %v223_v5  ;;  %v131_v2 = vld [vmem:[%s5679_s0 + $0x310] sm:$0xff]  ;;  %v133_v5 = vld [vmem:[%s5679_s0 + $0x320] sm:$0xff] }
  0x8a   :  { %3415 = vmatprep.mubr.msk.f32.mxu0 %vm252_vm0, %v84_v4  ;;  %3486 = vmatprep.mubr.msk.f32.mxu1 %vm252_vm0, %v226_v6  ;;  %v134_v4 = vld [vmem:[%s5679_s0 + $0x328] sm:$0xff]  ;;  %v136_v6 = vld [vmem:[%s5679_s0 + $0x338] sm:$0xff] }
  0x8d   :  { %747 = vmatmul.mubr.f32.gmra.mrb[50].mxu0 %v83_v7  ;;  %1102 = vmatmul.mubr.f32.gmra.mrb[50].mxu1 %v225_v9  ;;  %v135_v7 = vld [vmem:[%s5679_s0 + $0x330] sm:$0xff]  ;;  %v137_v9 = vld [vmem:[%s5679_s0 + $0x340] sm:$0xff] }
  0x8e   :  { %3416 = vmatprep.mubr.msk.f32.mxu0 %vm252_vm0, %v86_v8  ;;  %3487 = vmatprep.mubr.msk.f32.mxu1 %vm252_vm0, %v228_v10  ;;  %v138_v8 = vld [vmem:[%s5679_s0 + $0x348] sm:$0xff]  ;;  %v140_v10 = vld [vmem:[%s5679_s0 + $0x358] sm:$0xff] }
  0x91   :  { %752 = vmatmul.mubr.f32.gmra.mrb[52].mxu0 %v85_v11  ;;  %1107 = vmatmul.mubr.f32.gmra.mrb[52].mxu1 %v227_v13  ;;  %v139_v11 = vld [vmem:[%s5679_s0 + $0x350] sm:$0xff] }
  0x92   :  { %3417 = vmatprep.mubr.msk.f32.mxu0 %vm252_vm0, %v88_v12  ;;  %3488 = vmatprep.mubr.msk.f32.mxu1 %vm252_vm0, %v230_v14  ;;  %v142_v12 = vld [vmem:[%s5679_s0 + $0x368] sm:$0xff] }
  0x95   :  { %757 = vmatmul.mubr.f32.gmra.mrb[54].mxu0 %v87_v15  ;;  %1112 = vmatmul.mubr.f32.gmra.mrb[54].mxu1 %v229_v17  ;;  %v141_v15 = vld [vmem:[%s5679_s0 + $0x360] sm:$0xff] }
  0x96   :  { %3418 = vmatprep.mubr.msk.f32.mxu0 %vm252_vm0, %v90_v16  ;;  %3489 = vmatprep.mubr.msk.f32.mxu1 %vm252_vm0, %v232_v18  ;;  %v144_v16 = vld [vmem:[%s5679_s0 + $0x378] sm:$0xff] }
  0x99   :  { %762 = vmatmul.mubr.f32.gmra.mrb[56].mxu0 %v89_v19  ;;  %1117 = vmatmul.mubr.f32.gmra.mrb[56].mxu1 %v231_v21 }
  0x9a   :  { %3419 = vmatprep.mubr.msk.f32.mxu0 %vm252_vm0, %v92_v20  ;;  %v143_v20 = vld [vmem:[%s5679_s0 + $0x370] sm:$0xff]  ;;  %3680 = vmatprep.mubr.msk.f32.mxu1 %vm4121_vm2, %v5691_v30 }
  0x9d   :  { %767 = vmatmul.mubr.f32.gmra.mrb[58].mxu0 %v91_v22  ;;  %v146_v22 = vld [vmem:[%s5679_s0 + $0x388] sm:$0xff] }
  0x9e   :  { %3420 = vmatprep.mubr.msk.f32.mxu0 %vm252_vm0, %v94_v23 }
  0xa1   :  { %772 = vmatmul.mubr.f32.gmra.mrb[60].mxu0 %v93_v24 }
  0xa2   :  { %3421 = vmatprep.mubr.msk.f32.mxu0 %vm252_vm0, %v96_v25 }
  0xa5   :  { %777 = vmatmul.mubr.f32.gmra.mrb[62].mxu0 %v95_v26 }
  0xa6   :  { %3422 = vmatprep.mubr.msk.f32.mxu0 %vm252_vm0, %v98_v27  ;;  %v145_v27 = vld [vmem:[%s5679_s0 + $0x380] sm:$0xff] }
  0xa9   :  { %782 = vmatmul.mubr.f32.gmra.mrb[64].mxu0 %v97_v28 }
  0xaa   :  { %3423 = vmatprep.mubr.msk.f32.mxu0 %vm252_vm0, %v100_v29  ;;  %v148_v29 = vld [vmem:[%s5679_s0 + $0x398] sm:$0xff] }
  0xad   :  { %787 = vmatmul.mubr.f32.gmra.mrb[66].mxu0 %v99_v31 }
  0xae   :  { %3424 = vmatprep.mubr.msk.f32.mxu0 %vm252_vm0, %v102_v32 }
  0xb1   :  { %792 = vmatmul.mubr.f32.gmra.mrb[68].mxu0 %v101_v33 }
  0xb2   :  { %3425 = vmatprep.mubr.msk.f32.mxu0 %vm252_vm0, %v104_v34 }
  0xb5   :  { %797 = vmatmul.mubr.f32.gmra.mrb[70].mxu0 %v103_v35  ;;  %v147_v35 = vld [vmem:[%s5679_s0 + $0x390] sm:$0xff] }
  0xb6   :  { %3426 = vmatprep.mubr.msk.f32.mxu0 %vm252_vm0, %v106_v36 }
  0xb9   :  { %802 = vmatmul.mubr.f32.gmra.mrb[72].mxu0 %v105_v37  ;;  %v150_v37 = vld [vmem:[%s5679_s0 + $0x3a8] sm:$0xff] }
  0xba   :  { %3427 = vmatprep.mubr.msk.f32.mxu0 %vm252_vm0, %v108_v38 }
  0xbd   :  { %807 = vmatmul.mubr.f32.gmra.mrb[74].mxu0 %v107_v39 }
  0xbe   :  { %3428 = vmatprep.mubr.msk.f32.mxu0 %vm252_vm0, %v110_v40 }
  0xc1   :  { %812 = vmatmul.mubr.f32.gmra.mrb[76].mxu0 %v109_v41  ;;  %v149_v41 = vld [vmem:[%s5679_s0 + $0x3a0] sm:$0xff] }
  0xc2   :  { %3429 = vmatprep.mubr.msk.f32.mxu0 %vm252_vm0, %v112_v42 }
  0xc5   :  { %817 = vmatmul.mubr.f32.gmra.mrb[78].mxu0 %v111_v43  ;;  %v152_v43 = vld [vmem:[%s5679_s0 + $0x3b8] sm:$0xff] }
  0xc6   :  { %3430 = vmatprep.mubr.msk.f32.mxu0 %vm252_vm0, %v114_v44 }
  0xc9   :  { %822 = vmatmul.mubr.f32.gmra.mrb[80].mxu0 %v113_v45 }
  0xca   :  { %3431 = vmatprep.mubr.msk.f32.mxu0 %vm252_vm0, %v116_v46 }
  0xcd   :  { %827 = vmatmul.mubr.f32.gmra.mrb[82].mxu0 %v115_v47  ;;  %v151_v47 = vld [vmem:[%s5679_s0 + $0x3b0] sm:$0xff] }
  0xce   :  { %3432 = vmatprep.mubr.msk.f32.mxu0 %vm252_vm0, %v118_v48 }
  0xd1   :  { %832 = vmatmul.mubr.f32.gmra.mrb[84].mxu0 %v117_v49  ;;  %v154_v49 = vld [vmem:[%s5679_s0 + $0x3c8] sm:$0xff] }
  0xd2   :  { %3433 = vmatprep.mubr.msk.f32.mxu0 %vm252_vm0, %v120_v50 }
  0xd5   :  { %837 = vmatmul.mubr.f32.gmra.mrb[86].mxu0 %v119_v51 }
  0xd6   :  { %3434 = vmatprep.mubr.msk.f32.mxu0 %vm252_vm0, %v122_v52 }
  0xd9   :  { %842 = vmatmul.mubr.f32.gmra.mrb[88].mxu0 %v121_v53  ;;  %v153_v53 = vld [vmem:[%s5679_s0 + $0x3c0] sm:$0xff] }
  0xda   :  { %3435 = vmatprep.mubr.msk.f32.mxu0 %vm252_vm0, %v124_v54 }
  0xdd   :  { %847 = vmatmul.mubr.f32.gmra.mrb[90].mxu0 %v123_v55  ;;  %v156_v55 = vld [vmem:[%s5679_s0 + $0x3d8] sm:$0xff] }
  0xde   :  { %3436 = vmatprep.mubr.msk.f32.mxu0 %vm252_vm0, %v126_v56 }
  0xe1   :  { %852 = vmatmul.mubr.f32.gmra.mrb[92].mxu0 %v125_v59  ;;  %v155_v59 = vld [vmem:[%s5679_s0 + $0x3d0] sm:$0xff] }
  0xe2   :  { %3437 = vmatprep.mubr.msk.f32.mxu0 %vm252_vm0, %v128_v61  ;;  %v158_v61 = vld [vmem:[%s5679_s0 + $0x3e8] sm:$0xff] }
  0xe5   :  { %857 = vmatmul.mubr.f32.gmra.mrb[94].mxu0 %v127_v62 }
  0xe6   :  { %3438 = vmatprep.mubr.msk.f32.mxu0 %vm252_vm0, %v130_v63 }
  0xe9   :  { %862 = vmatmul.mubr.f32.gmra.mrb[96].mxu0 %v129_v0 }
  0xea   :  { %3439 = vmatprep.mubr.msk.f32.mxu0 %vm252_vm0, %v132_v1  ;;  %v157_v1 = vld [vmem:[%s5679_s0 + $0x3e0] sm:$0xff] }
  0xed   :  { %867 = vmatmul.mubr.f32.gmra.mrb[98].mxu0 %v131_v2 }
  0xee   :  { %3440 = vmatprep.mubr.msk.f32.mxu0 %vm252_vm0, %v134_v4  ;;  %v160_v4 = vld [vmem:[%s5679_s0 + $0x3f8] sm:$0xff] }
  0xf1   :  { %872 = vmatmul.mubr.f32.gmra.mrb[100].mxu0 %v133_v5 }
  0xf2   :  { %3441 = vmatprep.mubr.msk.f32.mxu0 %vm252_vm0, %v136_v6 }
  0xf5   :  { %877 = vmatmul.mubr.f32.gmra.mrb[102].mxu0 %v135_v7 }
  0xf6   :  { %3442 = vmatprep.mubr.msk.f32.mxu0 %vm252_vm0, %v138_v8  ;;  %v159_v8 = vld [vmem:[%s5679_s0 + $0x3f0] sm:$0xff] }
  0xf9   :  { %882 = vmatmul.mubr.f32.gmra.mrb[104].mxu0 %v137_v9 }
  0xfa   :  { %3443 = vmatprep.mubr.msk.f32.mxu0 %vm252_vm0, %v140_v10  ;;  %v162_v10 = vld [vmem:[%s5679_s0 + $0x408] sm:$0xff] }
  0xfc   :  { %v4842_v13 = vpop.f32.mrb[0].mxu0  ;;  %v4853_v19 = vpop.f32.mrb[0].mxu1 }
  0xfd   :  { %v625_v14 = vpop.f32.mrb[1].mxu0  ;;  %887 = vmatmul.mubr.f32.gmra.mrb[106].mxu0 %v139_v11  ;;  %v980_v21 = vpop.f32.mrb[1].mxu1 }
  0xfe   :  { %3444 = vmatprep.mubr.msk.f32.mxu0 %vm252_vm0, %v142_v12 }
 0x100   :  { %v4851_v17 = vpop.f32.mrb[2].mxu0  ;;  %v4864_v24 = vpop.f32.mrb[2].mxu1 }
 0x101   :  { %v630_v18 = vpop.f32.mrb[3].mxu0  ;;  %892 = vmatmul.mubr.f32.gmra.mrb[108].mxu0 %v141_v15  ;;  %v985_v26 = vpop.f32.mrb[3].mxu1  ;;  %v161_v15 = vld [vmem:[%s5679_s0 + $0x400] sm:$0xff] }
 0x102   :  { %3445 = vmatprep.mubr.msk.f32.mxu0 %vm252_vm0, %v144_v16  ;;  %v164_v18 = vld [vmem:[%s5679_s0 + $0x418] sm:$0xff] }
 0x104   :  { %v4862_v23 = vpop.f32.mrb[4].mxu0  ;;  %v4870_v28 = vpop.f32.mrb[4].mxu1 }
 0x105   :  { %v635_v25 = vpop.f32.mrb[5].mxu0  ;;  %897 = vmatmul.mubr.f32.gmra.mrb[110].mxu0 %v143_v20  ;;  %v990_v31 = vpop.f32.mrb[5].mxu1 }
 0x106   :  { %3446 = vmatprep.mubr.msk.f32.mxu0 %vm252_vm0, %v146_v22  ;;  %v163_v25 = vld [vmem:[%s5679_s0 + $0x410] sm:$0xff] }
 0x108   :  { %v4875_v32 = vpop.f32.mrb[6].mxu0  ;;  %v4877_v34 = vpop.f32.mrb[6].mxu1 }
 0x109   :  { %v640_v33 = vpop.f32.mrb[7].mxu0  ;;  %902 = vmatmul.mubr.f32.gmra.mrb[112].mxu0 %v145_v27  ;;  %v995_v36 = vpop.f32.mrb[7].mxu1  ;;  %v166_v27 = vld [vmem:[%s5679_s0 + $0x428] sm:$0xff] }
 0x10a   :  { %3447 = vmatprep.mubr.msk.f32.mxu0 %vm252_vm0, %v148_v29 }
 0x10c   :  { %v4886_v38 = vpop.f32.mrb[8].mxu0  ;;  %v4888_v40 = vpop.f32.mrb[8].mxu1 }
 0x10d   :  { %v645_v39 = vpop.f32.mrb[9].mxu0  ;;  %907 = vmatmul.mubr.f32.gmra.mrb[114].mxu0 %v147_v35  ;;  %v1000_v42 = vpop.f32.mrb[9].mxu1  ;;  %v165_v35 = vld [vmem:[%s5679_s0 + $0x420] sm:$0xff] }
 0x10e   :  { %3448 = vmatprep.mubr.msk.f32.mxu0 %vm252_vm0, %v150_v37  ;;  %v168_v37 = vld [vmem:[%s5679_s0 + $0x438] sm:$0xff] }
 0x110   :  { %v4897_v44 = vpop.f32.mrb[10].mxu0  ;;  %v4899_v46 = vpop.f32.mrb[10].mxu1 }
 0x111   :  { %v650_v45 = vpop.f32.mrb[11].mxu0  ;;  %912 = vmatmul.mubr.f32.gmra.mrb[116].mxu0 %v149_v41  ;;  %v1005_v48 = vpop.f32.mrb[11].mxu1 }
 0x112   :  { %3449 = vmatprep.mubr.msk.f32.mxu0 %vm252_vm0, %v152_v43  ;;  %v167_v43 = vld [vmem:[%s5679_s0 + $0x430] sm:$0xff] }
 0x114   :  { %v4908_v50 = vpop.f32.mrb[12].mxu0  ;;  %v4910_v52 = vpop.f32.mrb[12].mxu1 }
 0x115   :  { %v655_v51 = vpop.f32.mrb[13].mxu0  ;;  %917 = vmatmul.mubr.f32.gmra.mrb[118].mxu0 %v151_v47  ;;  %v1010_v54 = vpop.f32.mrb[13].mxu1  ;;  %v170_v47 = vld [vmem:[%s5679_s0 + $0x448] sm:$0xff] }
 0x116   :  { %3450 = vmatprep.mubr.msk.f32.mxu0 %vm252_vm0, %v154_v49 }
 0x118   :  { %v4919_v56 = vpop.f32.mrb[14].mxu0  ;;  %v4921_v58 = vpop.f32.mrb[14].mxu1 }
 0x119   :  { %v660_v57 = vpop.f32.mrb[15].mxu0  ;;  %922 = vmatmul.mubr.f32.gmra.mrb[120].mxu0 %v153_v53  ;;  %v1015_v60 = vpop.f32.mrb[15].mxu1  ;;  %v169_v53 = vld [vmem:[%s5679_s0 + $0x440] sm:$0xff] }
 0x11a   :  { %3451 = vmatprep.mubr.msk.f32.mxu0 %vm252_vm0, %v156_v55  ;;  %v172_v55 = vld [vmem:[%s5679_s0 + $0x458] sm:$0xff] }
 0x11c   :  { %v4930_v62 = vpop.f32.mrb[16].mxu0  ;;  %v4932_v0 = vpop.f32.mrb[16].mxu1 }
 0x11d   :  { %v665_v63 = vpop.f32.mrb[17].mxu0  ;;  %927 = vmatmul.mubr.f32.gmra.mrb[122].mxu0 %v155_v59  ;;  %v1020_v2 = vpop.f32.mrb[17].mxu1 }
 0x11e   :  { %3452 = vmatprep.mubr.msk.f32.mxu0 %vm252_vm0, %v158_v61  ;;  %v171_v61 = vld [vmem:[%s5679_s0 + $0x450] sm:$0xff] }
 0x120   :  { %v4941_v5 = vpop.f32.mrb[18].mxu0  ;;  %v4943_v7 = vpop.f32.mrb[18].mxu1 }
 0x121   :  { %v670_v6 = vpop.f32.mrb[19].mxu0  ;;  %932 = vmatmul.mubr.f32.gmra.mrb[124].mxu0 %v157_v1  ;;  %v1025_v9 = vpop.f32.mrb[19].mxu1  ;;  %v174_v1 = vld [vmem:[%s5679_s0 + $0x468] sm:$0xff] }
 0x122   :  { %3453 = vmatprep.mubr.msk.f32.mxu0 %vm252_vm0, %v160_v4 }
 0x124   :  { %v4952_v11 = vpop.f32.mrb[20].mxu0  ;;  %v4954_v14 = vpop.f32.mrb[20].mxu1 }
 0x125   :  { %v675_v12 = vpop.f32.mrb[21].mxu0  ;;  %937 = vmatmul.mubr.f32.gmra.mrb[126].mxu0 %v159_v8  ;;  %v1030_v16 = vpop.f32.mrb[21].mxu1  ;;  %v173_v8 = vld [vmem:[%s5679_s0 + $0x460] sm:$0xff] }
 0x126   :  { %3454 = vmatprep.mubr.msk.f32.mxu0 %vm252_vm0, %v162_v10 }
 0x128   :  { %v4963_v20 = vpop.f32.mrb[22].mxu0  ;;  %v4965_v22 = vpop.f32.mrb[22].mxu1 }
 0x129   :  { %v680_v21 = vpop.f32.mrb[23].mxu0  ;;  %942 = vmatmul.mubr.f32.gmra.mrb[128].mxu0 %v161_v15  ;;  %v1035_v26 = vpop.f32.mrb[23].mxu1 }
 0x12a   :  { %3455 = vmatprep.mubr.msk.f32.mxu0 %vm252_vm0, %v164_v18 }
 0x12c   :  { %v4974_v29 = vpop.f32.mrb[24].mxu0  ;;  %v4976_v33 = vpop.f32.mrb[24].mxu1 }
 0x12d   :  { %v685_v31 = vpop.f32.mrb[25].mxu0  ;;  %947 = vmatmul.mubr.f32.gmra.mrb[130].mxu0 %v163_v25  ;;  %v1040_v36 = vpop.f32.mrb[25].mxu1 }
 0x12e   :  { %3456 = vmatprep.mubr.msk.f32.mxu0 %vm252_vm0, %v166_v27 }
 0x130   :  { %v4985_v39 = vpop.f32.mrb[26].mxu0  ;;  %v4987_v42 = vpop.f32.mrb[26].mxu1 }
 0x131   :  { %v690_v41 = vpop.f32.mrb[27].mxu0  ;;  %952 = vmatmul.mubr.f32.gmra.mrb[132].mxu0 %v165_v35  ;;  %v1045_v45 = vpop.f32.mrb[27].mxu1 }
 0x132   :  { %3457 = vmatprep.mubr.msk.f32.mxu0 %vm252_vm0, %v168_v37 }
 0x134   :  { %v4996_v48 = vpop.f32.mrb[28].mxu0  ;;  %v4998_v51 = vpop.f32.mrb[28].mxu1 }
 0x135   :  { %v695_v49 = vpop.f32.mrb[29].mxu0  ;;  %957 = vmatmul.mubr.f32.gmra.mrb[134].mxu0 %v167_v43  ;;  %5706 = vst [vmem:[#allocation5_spill] sm:$0xff] %v4998_v51  ;;  %v1050_v54 = vpop.f32.mrb[29].mxu1 }
 0x136   :  { %3458 = vmatprep.mubr.msk.f32.mxu0 %vm252_vm0, %v170_v47 }
 0x138   :  { %v5007_v57 = vpop.f32.mrb[30].mxu0  ;;  %v5009_v60 = vpop.f32.mrb[30].mxu1 }
 0x139   :  { %v700_v59 = vpop.f32.mrb[31].mxu0  ;;  %962 = vmatmul.mubr.f32.gmra.mrb[136].mxu0 %v169_v53  ;;  %5707 = vst [vmem:[#allocation6_spill] sm:$0xff] %v5009_v60  ;;  %v1055_v63 = vpop.f32.mrb[31].mxu1 }
 0x13a   :  { %3459 = vmatprep.mubr.msk.f32.mxu0 %vm252_vm0, %v172_v55 }
 0x13c   :  { %v5018_v2 = vpop.f32.mrb[32].mxu0  ;;  %v5020_v6 = vpop.f32.mrb[32].mxu1 }
 0x13d   :  { %v705_v4 = vpop.f32.mrb[33].mxu0  ;;  %967 = vmatmul.mubr.f32.gmra.mrb[138].mxu0 %v171_v61  ;;  %5708 = vst [vmem:[#allocation7_spill] sm:$0xff] %v5020_v6  ;;  %v1060_v9 = vpop.f32.mrb[33].mxu1 }
 0x13e   :  { %3460 = vmatprep.mubr.msk.f32.mxu0 %vm252_vm0, %v174_v1 }
 0x140   :  { %v5026_v10 = vpop.f32.mrb[34].mxu0  ;;  %v5028_v15 = vpop.f32.mrb[34].mxu1 }
 0x141   :  { %v710_v12 = vpop.f32.mrb[35].mxu0  ;;  %972 = vmatmul.mubr.f32.gmra.mrb[140].mxu0 %v173_v8  ;;  %5709 = vst [vmem:[#allocation8_spill] sm:$0xff] %v5028_v15  ;;  %v1065_v16 = vpop.f32.mrb[35].mxu1 }
 0x144   :  { %v5030_v18 = vpop.f32.mrb[36].mxu0  ;;  %v5032_v25 = vpop.f32.mrb[36].mxu1 }
 0x145   :  { %5710 = vst [vmem:[#allocation9_spill] sm:$0xff] %v5030_v18  ;;  %v715_v21 = vpop.f32.mrb[37].mxu0  ;;  %5711 = vst [vmem:[#allocation10_spill] sm:$0xff] %v5032_v25  ;;  %v1070_v26 = vpop.f32.mrb[37].mxu1 }
 0x148   :  { %v5034_v27 = vpop.f32.mrb[38].mxu0  ;;  %v5036_v35 = vpop.f32.mrb[38].mxu1 }
 0x149   :  { %v720_v31 = vpop.f32.mrb[39].mxu0  ;;  %5712 = vst [vmem:[#allocation11_spill] sm:$0xff] %v5036_v35  ;;  %v1075_v36 = vpop.f32.mrb[39].mxu1 }
 0x14c   :  { %v5038_v37 = vpop.f32.mrb[40].mxu0  ;;  %v5040_v43 = vpop.f32.mrb[40].mxu1 }
 0x14d   :  { %v725_v41 = vpop.f32.mrb[41].mxu0  ;;  %5713 = vst [vmem:[#allocation12_spill] sm:$0xff] %v5040_v43  ;;  %v1080_v45 = vpop.f32.mrb[41].mxu1 }
 0x150   :  { %v5042_v47 = vpop.f32.mrb[42].mxu0  ;;  %v5046_v53 = vpop.f32.mrb[42].mxu1 }
 0x151   :  { %v730_v49 = vpop.f32.mrb[43].mxu0  ;;  %5714 = vst [vmem:[#allocation13_spill] sm:$0xff] %v5046_v53  ;;  %v1085_v54 = vpop.f32.mrb[43].mxu1 }
 0x154   :  { %v5048_v55 = vpop.f32.mrb[44].mxu0  ;;  %v5050_v61 = vpop.f32.mrb[44].mxu1 }
 0x155   :  { %v735_v59 = vpop.f32.mrb[45].mxu0  ;;  %5715 = vst [vmem:[#allocation14_spill] sm:$0xff] %v5050_v61  ;;  %v1090_v63 = vpop.f32.mrb[45].mxu1 }
 0x158   :  { %v5052_v1 = vpop.f32.mrb[46].mxu0  ;;  %v5054_v8 = vpop.f32.mrb[46].mxu1 }
 0x159   :  { %v740_v4 = vpop.f32.mrb[47].mxu0  ;;  %5716 = vst [vmem:[#allocation15_spill] sm:$0xff] %v5054_v8  ;;  %v1095_v9 = vpop.f32.mrb[47].mxu1 }
 0x15c   :  { %v5056_v12 = vpop.f32.mrb[48].mxu0  ;;  %v5058_v21 = vpop.f32.mrb[48].mxu1 }
 0x15d   :  { %v745_v16 = vpop.f32.mrb[49].mxu0  ;;  %5717 = vst [vmem:[#allocation16_spill] sm:$0xff] %v5058_v21  ;;  %v1100_v26 = vpop.f32.mrb[49].mxu1 }
 0x160   :  { %v5060_v31 = vpop.f32.mrb[50].mxu0  ;;  %v5064_v45 = vpop.f32.mrb[50].mxu1 }
 0x161   :  { %v750_v41 = vpop.f32.mrb[51].mxu0  ;;  %v1105_v54 = vpop.f32.mrb[51].mxu1 }
 0x164   :  { %v5068_v59 = vpop.f32.mrb[52].mxu0  ;;  %v5072_v9 = vpop.f32.mrb[52].mxu1 }
 0x165   :  { %v755_v4 = vpop.f32.mrb[53].mxu0  ;;  %v1110_v26 = vpop.f32.mrb[53].mxu1 }
 0x168   :  { %v5076_v3 = vpop.f32.mrb[54].mxu0  ;;  %v5080_v36 = vpop.f32.mrb[54].mxu1 }
 0x169   :  { %v760_v30 = vpop.f32.mrb[55].mxu0  ;;  %v1115_v49 = vpop.f32.mrb[55].mxu1 }
 0x16c   :  { %v5084_v63 = vpop.f32.mrb[56].mxu0  ;;  %v5088_v16 = vpop.f32.mrb[56].mxu1 }
 0x16d   :  { %v765_v21 = vpop.f32.mrb[57].mxu0  ;;  %v1120_v8 = vpop.f32.mrb[57].mxu1 }
 0x170   :  { %v5092_v41 = vpop.f32.mrb[58].mxu0 }
 0x171   :  { %v770_v61 = vpop.f32.mrb[59].mxu0 }
 0x174   :  { %v5096_v54 = vpop.f32.mrb[60].mxu0 }
 0x175   :  { %v775_v53 = vpop.f32.mrb[61].mxu0 }
 0x178   :  { %v5100_v4 = vpop.f32.mrb[62].mxu0 }
 0x179   :  { %v780_v43 = vpop.f32.mrb[63].mxu0 }
 0x17c   :  { %v5104_v26 = vpop.f32.mrb[64].mxu0 }
 0x17d   :  { %v785_v35 = vpop.f32.mrb[65].mxu0 }
 0x180   :  { %v5108_v30 = vpop.f32.mrb[66].mxu0 }
 0x181   :  { %v790_v25 = vpop.f32.mrb[67].mxu0 }
 0x184   :  { %v5112_v49 = vpop.f32.mrb[68].mxu0 }
 0x185   :  { %5718 = vst [vmem:[#allocation17_spill] sm:$0xff] %v5112_v49  ;;  %v795_v15 = vpop.f32.mrb[69].mxu0 }
 0x188   :  { %v5116_v21 = vpop.f32.mrb[70].mxu0 }
 0x189   :  { %5719 = vst [vmem:[#allocation18_spill] sm:$0xff] %v5116_v21  ;;  %v800_v6 = vpop.f32.mrb[71].mxu0 }
 0x18c   :  { %v5120_v8 = vpop.f32.mrb[72].mxu0 }
 0x18d   :  { %5720 = vst [vmem:[#allocation19_spill] sm:$0xff] %v5120_v8  ;;  %v805_v60 = vpop.f32.mrb[73].mxu0 }
 0x190   :  { %v5124_v61 = vpop.f32.mrb[74].mxu0 }
 0x191   :  { %5721 = vst [vmem:[#allocation20_spill] sm:$0xff] %v5124_v61  ;;  %v810_v51 = vpop.f32.mrb[75].mxu0 }
 0x194   :  { %v5128_v53 = vpop.f32.mrb[76].mxu0 }
 0x195   :  { %5722 = vst [vmem:[#allocation21_spill] sm:$0xff] %v5128_v53  ;;  %v815_v49 = vpop.f32.mrb[77].mxu0 }
 0x198   :  { %v5132_v43 = vpop.f32.mrb[78].mxu0 }
 0x199   :  { %5723 = vst [vmem:[#allocation22_spill] sm:$0xff] %v5132_v43  ;;  %v820_v21 = vpop.f32.mrb[79].mxu0 }
 0x19a   :  { %v5730_v21 = vmax.f32 %v4853_v19, %v5064_v45 }
 0x19c   :  { %v5136_v35 = vpop.f32.mrb[80].mxu0 }
 0x19d   :  { %5724 = vst [vmem:[#allocation23_spill] sm:$0xff] %v5136_v35  ;;  %v825_v8 = vpop.f32.mrb[81].mxu0 }
 0x1a0   :  { %v5140_v25 = vpop.f32.mrb[82].mxu0 }
 0x1a1   :  { %5725 = vst [vmem:[#allocation24_spill] sm:$0xff] %v5140_v25  ;;  %v830_v61 = vpop.f32.mrb[83].mxu0 }
 0x1a4   :  { %v5144_v15 = vpop.f32.mrb[84].mxu0 }
 0x1a5   :  { %5726 = vst [vmem:[#allocation25_spill] sm:$0xff] %v5144_v15  ;;  %v835_v53 = vpop.f32.mrb[85].mxu0 }
 0x1a8   :  { %v5148_v6 = vpop.f32.mrb[86].mxu0 }
 0x1a9   :  { %5727 = vst [vmem:[#allocation26_spill] sm:$0xff] %v5148_v6  ;;  %v840_v43 = vpop.f32.mrb[87].mxu0 }
 0x1ac   :  { %v5152_v60 = vpop.f32.mrb[88].mxu0 }
 0x1ad   :  { %5728 = vst [vmem:[#allocation27_spill] sm:$0xff] %v5152_v60  ;;  %v845_v35 = vpop.f32.mrb[89].mxu0 }
 0x1ae   :  { %v5731_v35 = vmax.f32 %v4864_v24, %v5072_v9 }
 0x1b0   :  { %v5156_v51 = vpop.f32.mrb[90].mxu0 }
 0x1b1   :  { %5729 = vst [vmem:[#allocation28_spill] sm:$0xff] %v5156_v51  ;;  %v850_v25 = vpop.f32.mrb[91].mxu0 }
 0x1b4   :  { %v853_v49 = vpop.f32.mrb[92].mxu0 }
 0x1b5   :  { %v1143_v53 = vmax.f32 %v5042_v47, %v853_v49  ;;  %v855_v15 = vpop.f32.mrb[93].mxu0  ;;  %v5732_v47 = vmax.f32 %v4870_v28, %v5080_v36 }
 0x1b7   :  { %v5164_v43 = vmax.f32 %v1143_v53, %v5730_v21 }
 0x1b8   :  { %v858_v6 = vpop.f32.mrb[94].mxu0 }
 0x1b9   :  { %v1144_v18 = vmax.f32 %v5048_v55, %v858_v6  ;;  %v860_v8 = vpop.f32.mrb[95].mxu0  ;;  %v5733_v55 = vmax.f32 %v4877_v34, %v5088_v16  ;;  %v1254_v34 = vld [vmem:[%s5682_s3] sm:$0xff] }
 0x1bb   :  { %v5170_v60 = vmax.f32 %v1144_v18, %v5731_v35  ;;  %v5736_v35 = vmax.f32 %v4862_v23, %v5076_v3 }
 0x1bc   :  { %v863_v61 = vpop.f32.mrb[96].mxu0 }
 0x1bd   :  { %v1145_v25 = vmax.f32 %v5052_v1, %v863_v61  ;;  %v865_v51 = vpop.f32.mrb[97].mxu0  ;;  %v5734_v1 = vmax.f32 %v4842_v13, %v5060_v31  ;;  %v5201_v13 = vld [vmem:[%s5681_s2] ss:$0 sm:$0xff] }
 0x1bf   :  { %v5176_v15 = vmax.f32 %v1145_v25, %v5732_v47  ;;  %v3495_v47 = vld [vmem:[%s5682_s3 + $0x20] sm:$0xff] }
 0x1c0   :  { %v868_v19 = vpop.f32.mrb[98].mxu0 }
 0x1c1   :  { %v1146_v45 = vmax.f32 %v5056_v12, %v868_v19  ;;  %v870_v49 = vpop.f32.mrb[99].mxu0  ;;  %v5735_v12 = vmax.f32 %v4851_v17, %v5068_v59  ;;  %v3496_v19 = vld [vmem:[%s5682_s3 + $0x28] sm:$0xff] }
 0x1c2   :  { %v3955_v3 = vpack.c.bf16 %v3496_v19, %v3495_v47 }
 0x1c3   :  { %v5182_v6 = vmax.f32 %v1146_v45, %v5733_v55  ;;  %v5737_v55 = vmov 0.0  }
 0x1c4   :  { %v873_v24 = vpop.f32.mrb[100].mxu0 }
 0x1c5   :  { %v1147_v18 = vmax.f32 %v873_v24, %v4888_v40  ;;  %v875_v9 = vpop.f32.mrb[101].mxu0  ;;  %v1255_v40 = vld [vmem:[%s5682_s3 + $0x8] sm:$0xff] }
 0x1c6   :  { %v3952_v59 = vpack.c.bf16 %v1255_v40, %v1254_v34  ;;  %v3502_v40 = vld [vmem:[%s5682_s3 + $0x48] sm:$0xff] }
 0x1c7   :  { %v1172_v51 = vmax.f32 %v5734_v1, %v1147_v18  ;;  %v5738_v18 = vmax.f32 %v4875_v32, %v5084_v63  ;;  %v5739_v1 = vmov 0.0|0.0  }
 0x1c8   :  { %v878_v28 = vpop.f32.mrb[102].mxu0 }
 0x1c9   :  { %v1148_v36 = vmax.f32 %v878_v28, %v4899_v46  ;;  %v880_v21 = vpop.f32.mrb[103].mxu0  ;;  %v1204_v61 = vadd.f32 %v5201_v13, %v1172_v51  ;;  %v3499_v51 = vld [vmem:[%s5682_s3 + $0x38] sm:$0xff] }
 0x1cb   :  { %v1173_v8 = vmax.f32 %v5735_v12, %v1148_v36  ;;  %v1229_v23 = vmax.f32 %v1204_v61, 0.0 }
 0x1cc   :  { %v883_v31 = vpop.f32.mrb[104].mxu0 }
 0x1cd   :  { %v1205_v46 = vadd.f32 %v5201_v13, %v1173_v8  ;;  %v1149_v16 = vmax.f32 %v883_v31, %v4910_v52  ;;  %v885_v17 = vpop.f32.mrb[105].mxu0  ;;  %v5740_v8 = vmax.f32 %v4886_v38, %v5092_v41 }
 0x1cf   :  { %v1230_v53 = vmax.f32 %v1205_v46, 0.0  ;;  %v1174_v25 = vmax.f32 %v5736_v35, %v1149_v16 }
 0x1d0   :  { %v888_v45 = vpop.f32.mrb[106].mxu0 }
 0x1d1   :  { %v1150_v52 = vmax.f32 %v888_v45, %v4921_v58  ;;  %3681 = vmatmul.mubr.msk.f32.vlgmr.msra.gmra.mrb[58].mxu1 %vm1259_vm3, %v1230_v53  ;;  %v890_v49 = vpop.f32.mrb[107].mxu0  ;;  %v1206_v24 = vadd.f32 %v5201_v13, %v1174_v25  ;;  %v3498_v58 = vld [vmem:[%s5682_s3 + $0x30] sm:$0xff]  ;;  %v3505_v53 = vld [vmem:[%s5682_s3 + $0x58] sm:$0xff]  ;;  %v5742_v45 = vmax.f32 %v4908_v50, %v5100_v4 }
 0x1d2   :  { %3953 = vmatpush3.bf16.msra.mxu1 %v3952_v59  ;;  %3687 = vmatprep.mubr.msk.f32.mxu1 %vm4121_vm2, %v5737_v55  ;;  %v3958_v32 = vpack.c.bf16 %v3499_v51, %v3498_v58  ;;  %v5741_v59 = vmax.f32 %v4897_v44, %v5096_v54  ;;  %v3508_v49 = vld [vmem:[%s5682_s3 + $0x68] sm:$0xff]  ;;  %v3511_v51 = vld [vmem:[%s5682_s3 + $0x78] sm:$0xff] }
 0x1d3   :  { %v1175_v9 = vmax.f32 %v5738_v18, %v1150_v52  ;;  %3954 = vmatprep.subr.bf16.mxu1 %v5739_v1  ;;  %v1231_v63 = vmax.f32 %v1206_v24, 0.0 }
 0x1d4   :  { %v893_v28 = vpop.f32.mrb[108].mxu0 }
 0x1d5   :  { %v1151_v36 = vmax.f32 %v893_v28, %v4932_v0  ;;  %3688 = vmatmul.mubr.msk.f32.vlgmr.msra.gmra.mrb[60].mxu1 %vm1259_vm3, %v1229_v23  ;;  %v895_v21 = vpop.f32.mrb[109].mxu0  ;;  %v1207_v12 = vadd.f32 %v5201_v13, %v1175_v9  ;;  %v3501_v0 = vld [vmem:[%s5682_s3 + $0x40] sm:$0xff]  ;;  %v5743_v9 = vmax.f32 %v4919_v56, %v5104_v26 }
 0x1d6   :  { %3956 = vmatpush3.bf16.msra.mxu1 %v3955_v3  ;;  %3694 = vmatprep.mubr.msk.f32.mxu1 %vm4121_vm2, %v5737_v55  ;;  %v3961_v38 = vpack.c.bf16 %v3502_v40, %v3501_v0 }
 0x1d7   :  { %v1176_v34 = vmax.f32 %v5740_v8, %v1151_v36  ;;  %3957 = vmatprep.subr.bf16.mxu1 %v5739_v1  ;;  %v1232_v41 = vmax.f32 %v1207_v12, 0.0  ;;  %v3514_v8 = vld [vmem:[%s5682_s3 + $0x88] sm:$0xff] }
 0x1d8   :  { %v898_v31 = vpop.f32.mrb[110].mxu0 }
 0x1d9   :  { %v1152_v46 = vmax.f32 %v898_v31, %v4943_v7  ;;  %3695 = vmatmul.mubr.msk.f32.vlgmr.msra.gmra.mrb[62].mxu1 %vm1259_vm3, %v1231_v63  ;;  %v900_v16 = vpop.f32.mrb[111].mxu0  ;;  %v1208_v17 = vadd.f32 %v5201_v13, %v1176_v34  ;;  %v3504_v7 = vld [vmem:[%s5682_s3 + $0x50] sm:$0xff]  ;;  %v5744_v63 = vmax.f32 %v4930_v62, %v5108_v30 }
 0x1da   :  { %3959 = vmatpush3.bf16.msra.mxu1 %v3958_v32  ;;  %3701 = vmatprep.mubr.msk.f32.mxu1 %vm4121_vm2, %v5737_v55  ;;  %v3964_v44 = vpack.c.bf16 %v3505_v53, %v3504_v7 }
 0x1db   :  { %v1177_v61 = vmax.f32 %v5741_v59, %v1152_v46  ;;  %3960 = vmatprep.subr.bf16.mxu1 %v5739_v1  ;;  %v1233_v54 = vmax.f32 %v1208_v17, 0.0  ;;  %v5745_v46 = vld [vmem:[#allocation17_spill] sm:$0xff] }
 0x1dc   :  { %v903_v35 = vpop.f32.mrb[112].mxu0  ;;  %v5746_v16 = vmax.f32 %v4941_v5, %v5745_v46  ;;  %v5747_v59 = vld [vmem:[#allocation5_spill] sm:$0xff] }
 0x1dd   :  { %v1153_v25 = vmax.f32 %v903_v35, %v4954_v14  ;;  %3702 = vmatmul.mubr.msk.f32.vlgmr.msra.gmra.mrb[64].mxu1 %vm1259_vm3, %v1232_v41  ;;  %v905_v47 = vpop.f32.mrb[113].mxu0  ;;  %v1209_v19 = vadd.f32 %v5201_v13, %v1177_v61  ;;  %v3507_v14 = vld [vmem:[%s5682_s3 + $0x60] sm:$0xff]  ;;  %v3517_v41 = vld [vmem:[%s5682_s3 + $0x98] sm:$0xff] }
 0x1de   :  { %3962 = vmatpush3.bf16.msra.mxu1 %v3961_v38  ;;  %3708 = vmatprep.mubr.msk.f32.mxu1 %vm4121_vm2, %v5737_v55  ;;  %v3967_v50 = vpack.c.bf16 %v3508_v49, %v3507_v14 }
 0x1df   :  { %v1178_v52 = vmax.f32 %v5742_v45, %v1153_v25  ;;  %3963 = vmatprep.subr.bf16.mxu1 %v5739_v1  ;;  %v1234_v4 = vmax.f32 %v1209_v19, 0.0  ;;  %v5748_v25 = vld [vmem:[#allocation18_spill] sm:$0xff] }
 0x1e0   :  { %v908_v3 = vpop.f32.mrb[114].mxu0  ;;  %v5749_v47 = vmax.f32 %v4952_v11, %v5748_v25  ;;  %v3520_v19 = vld [vmem:[%s5682_s3 + $0xa8] sm:$0xff]  ;;  %v3531_v25 = vld [vmem:[%s5682_s3 + $0xe0] sm:$0xff] }
 0x1e1   :  { %v1154_v23 = vmax.f32 %v908_v3, %v4965_v22  ;;  %3709 = vmatmul.mubr.msk.f32.vlgmr.msra.gmra.mrb[66].mxu1 %vm1259_vm3, %v1233_v54  ;;  %v910_v24 = vpop.f32.mrb[115].mxu0  ;;  %v1210_v18 = vadd.f32 %v5201_v13, %v1178_v52  ;;  %v3510_v22 = vld [vmem:[%s5682_s3 + $0x70] sm:$0xff]  ;;  %v3519_v54 = vld [vmem:[%s5682_s3 + $0xa0] sm:$0xff] }
 0x1e2   :  { %3965 = vmatpush3.bf16.msra.mxu1 %v3964_v44  ;;  %3715 = vmatprep.mubr.msk.f32.mxu1 %vm4121_vm2, %v5737_v55  ;;  %v3970_v56 = vpack.c.bf16 %v3511_v51, %v3510_v22  ;;  %v5750_v52 = vld [vmem:[#allocation6_spill] sm:$0xff]  ;;  %v3979_v11 = vpack.c.bf16 %v3520_v19, %v3519_v54  ;;  %v5751_v24 = vld [vmem:[#allocation19_spill] sm:$0xff] }
 0x1e3   :  { %v1179_v58 = vmax.f32 %v5743_v9, %v1154_v23  ;;  %3966 = vmatprep.subr.bf16.mxu1 %v5739_v1  ;;  %v1235_v26 = vmax.f32 %v1210_v18, 0.0  ;;  %v3522_v18 = vld [vmem:[%s5682_s3 + $0xb0] sm:$0xff]  ;;  %v3523_v9 = vld [vmem:[%s5682_s3 + $0xb8] sm:$0xff] }
 0x1e4   :  { %v913_v28 = vpop.f32.mrb[116].mxu0  ;;  %v5753_v22 = vld [vmem:[#allocation7_spill] sm:$0xff] }
 0x1e5   :  { %v1155_v36 = vmax.f32 %v913_v28, %v4976_v33  ;;  %3716 = vmatmul.mubr.msk.f32.vlgmr.msra.gmra.mrb[68].mxu1 %vm1259_vm3, %v1234_v4  ;;  %v915_v21 = vpop.f32.mrb[117].mxu0  ;;  %v1211_v32 = vadd.f32 %v5201_v13, %v1179_v58  ;;  %v3513_v33 = vld [vmem:[%s5682_s3 + $0x80] sm:$0xff]  ;;  %v5762_v54 = vld [vmem:[#allocation11_spill] sm:$0xff] }
 0x1e6   :  { %3968 = vmatpush3.bf16.msra.mxu1 %v3967_v50  ;;  %3722 = vmatprep.mubr.msk.f32.mxu1 %vm4121_vm2, %v5737_v55  ;;  %v3973_v62 = vpack.c.bf16 %v3514_v8, %v3513_v33  ;;  %v5752_v50 = vmax.f32 %v4963_v20, %v5751_v24  ;;  %v3982_v20 = vpack.c.bf16 %v3523_v9, %v3522_v18  ;;  %v5756_v8 = vld [vmem:[#allocation8_spill] sm:$0xff] }
 0x1e7   :  { %v1180_v12 = vmax.f32 %v5744_v63, %v1155_v36  ;;  %3969 = vmatprep.subr.bf16.mxu1 %v5739_v1  ;;  %v1236_v30 = vmax.f32 %v1211_v32, 0.0  ;;  %v3525_v63 = vld [vmem:[%s5682_s3 + $0xc0] sm:$0xff]  ;;  %v3535_v24 = vld [vmem:[%s5682_s3 + $0xf8] sm:$0xff] }
 0x1e8   :  { %v918_v34 = vpop.f32.mrb[118].mxu0 }
 0x1e9   :  { %v1156_v0 = vmax.f32 %v918_v34, %v4987_v42  ;;  %3723 = vmatmul.mubr.msk.f32.vlgmr.msra.gmra.mrb[70].mxu1 %vm1259_vm3, %v1235_v26  ;;  %v920_v40 = vpop.f32.mrb[119].mxu0  ;;  %v1212_v31 = vadd.f32 %v5201_v13, %v1180_v12  ;;  %v3516_v42 = vld [vmem:[%s5682_s3 + $0x90] sm:$0xff]  ;;  %v3526_v12 = vld [vmem:[%s5682_s3 + $0xc8] sm:$0xff] }
 0x1ea   :  { %3971 = vmatpush3.bf16.msra.mxu1 %v3970_v56  ;;  %3729 = vmatprep.mubr.msk.f32.mxu1 %vm4121_vm2, %v5737_v55  ;;  %v3976_v5 = vpack.c.bf16 %v3517_v41, %v3516_v42  ;;  %v5754_v56 = vld [vmem:[#allocation20_spill] sm:$0xff]  ;;  %v5759_v41 = vld [vmem:[#allocation10_spill] sm:$0xff] }
 0x1eb   :  { %v1181_v38 = vmax.f32 %v5746_v16, %v1156_v0  ;;  %3972 = vmatprep.subr.bf16.mxu1 %v5739_v1  ;;  %v1237_v53 = vmax.f32 %v1212_v31, 0.0  ;;  %v5755_v26 = vmax.f32 %v4974_v29, %v5754_v56  ;;  %v3985_v29 = vpack.c.bf16 %v3526_v12, %v3525_v63  ;;  %v3528_v16 = vld [vmem:[%s5682_s3 + $0xd0] sm:$0xff] }
 0x1ec   :  { %v923_v17 = vpop.f32.mrb[120].mxu0 }
 0x1ed   :  { %v1157_v61 = vmax.f32 %v923_v17, %v5747_v59  ;;  %3730 = vmatmul.mubr.msk.f32.vlgmr.msra.gmra.mrb[72].mxu1 %vm1259_vm3, %v1236_v30  ;;  %v925_v7 = vpop.f32.mrb[121].mxu0  ;;  %v1213_v35 = vadd.f32 %v5201_v13, %v1181_v38  ;;  %v5757_v30 = vld [vmem:[#allocation21_spill] sm:$0xff]  ;;  %v3529_v38 = vld [vmem:[%s5682_s3 + $0xd8] sm:$0xff] }
 0x1ee   :  { %3974 = vmatpush3.bf16.msra.mxu1 %v3973_v62  ;;  %3736 = vmatprep.mubr.msk.f32.mxu1 %vm4121_vm2, %v5737_v55  ;;  %v5758_v31 = vmax.f32 %v4985_v39, %v5757_v30  ;;  %v3988_v39 = vpack.c.bf16 %v3529_v38, %v3528_v16  ;;  %v5771_v30 = vld [vmem:[#allocation14_spill] sm:$0xff] }
 0x1ef   :  { %v1182_v44 = vmax.f32 %v5749_v47, %v1157_v61  ;;  %3975 = vmatprep.subr.bf16.mxu1 %v5739_v1  ;;  %v1238_v3 = vmax.f32 %v1213_v35, 0.0  ;;  %v3532_v47 = vld [vmem:[%s5682_s3 + $0xe8] sm:$0xff] }
 0x1f0   :  { %v928_v45 = vpop.f32.mrb[122].mxu0 }
 0x1f1   :  { %v1158_v14 = vmax.f32 %v928_v45, %v5750_v52  ;;  %3737 = vmatmul.mubr.msk.f32.vlgmr.msra.gmra.mrb[74].mxu1 %vm1259_vm3, %v1237_v53  ;;  %v930_v49 = vpop.f32.mrb[123].mxu0  ;;  %v1214_v23 = vadd.f32 %v5201_v13, %v1182_v44 }
 0x1f2   :  { %3977 = vmatpush3.bf16.msra.mxu1 %v3976_v5  ;;  %3743 = vmatprep.mubr.msk.f32.mxu1 %vm4121_vm2, %v5737_v55  ;;  %v5760_v5 = vld [vmem:[#allocation22_spill] sm:$0xff]  ;;  %v5763_v49 = vld [vmem:[#allocation23_spill] sm:$0xff] }
 0x1f3   :  { %v1183_v4 = vmax.f32 %v5752_v50, %v1158_v14  ;;  %3978 = vmatprep.subr.bf16.mxu1 %v5739_v1  ;;  %v1239_v36 = vmax.f32 %v1214_v23, 0.0  ;;  %v5761_v53 = vmax.f32 %v4996_v48, %v5760_v5  ;;  %v3991_v48 = vpack.c.bf16 %v3532_v47, %v3531_v25  ;;  %v3534_v23 = vld [vmem:[%s5682_s3 + $0xf0] sm:$0xff] }
 0x1f4   :  { %v933_v58 = vpop.f32.mrb[124].mxu0  ;;  %v5775_v5 = vld [vmem:[#allocation15_spill] sm:$0xff] }
 0x1f5   :  { %v1159_v51 = vmax.f32 %v933_v58, %v5753_v22  ;;  %3744 = vmatmul.mubr.msk.f32.vlgmr.msra.gmra.mrb[76].mxu1 %vm1259_vm3, %v1238_v3  ;;  %v935_v28 = vpop.f32.mrb[125].mxu0  ;;  %v1215_v21 = vadd.f32 %v5201_v13, %v1183_v4  ;;  %v5765_v4 = vld [vmem:[#allocation12_spill] sm:$0xff] }
 0x1f6   :  { %3980 = vmatpush3.bf16.msra.mxu1 %v3979_v11  ;;  %3750 = vmatprep.mubr.msk.f32.mxu1 %vm4121_vm2, %v5737_v55  ;;  %v5764_v11 = vmax.f32 %v5007_v57, %v5763_v49  ;;  %v3994_v57 = vpack.c.bf16 %v3535_v24, %v3534_v23  ;;  %v5778_v49 = vld [vmem:[#allocation16_spill] sm:$0xff] }
 0x1f7   :  { %v1184_v32 = vmax.f32 %v5755_v26, %v1159_v51  ;;  %3981 = vmatprep.subr.bf16.mxu1 %v5739_v1  ;;  %v1240_v40 = vmax.f32 %v1215_v21, 0.0  ;;  %v5766_v51 = vld [vmem:[#allocation24_spill] sm:$0xff]  ;;  %v3538_v21 = vld [vmem:[%s5682_s3 + $0x108] sm:$0xff] }
 0x1f8   :  { %v938_v33 = vpop.f32.mrb[126].mxu0  ;;  %v5767_v28 = vmax.f32 %v5018_v2, %v5766_v51  ;;  %v5768_v26 = vld [vmem:[#allocation13_spill] sm:$0xff]  ;;  %v3552_v51 = vld [vmem:[%s5682_s3 + $0x150] sm:$0xff] }
 0x1f9   :  { %v1160_v34 = vmax.f32 %v938_v33, %v5756_v8  ;;  %3751 = vmatmul.mubr.msk.f32.vlgmr.msra.gmra.mrb[78].mxu1 %vm1259_vm3, %v1239_v36  ;;  %v940_v0 = vpop.f32.mrb[127].mxu0  ;;  %v1216_v62 = vadd.f32 %v5201_v13, %v1184_v32  ;;  %v3537_v36 = vld [vmem:[%s5682_s3 + $0x100] sm:$0xff] }
 0x1fa   :  { %3983 = vmatpush3.bf16.msra.mxu1 %v3982_v20  ;;  %3757 = vmatprep.mubr.msk.f32.mxu1 %vm4121_vm2, %v5737_v55  ;;  %v3997_v2 = vpack.c.bf16 %v3538_v21, %v3537_v36  ;;  %v5769_v8 = vld [vmem:[#allocation25_spill] sm:$0xff]  ;;  %v1225_v36 = vadd.f32 %v5201_v13, %v5164_v43  ;;  %v1226_v43 = vadd.f32 %v5201_v13, %v5170_v60 }
 0x1fb   :  { %v1185_v46 = vmax.f32 %v5758_v31, %v1160_v34  ;;  %3984 = vmatprep.subr.bf16.mxu1 %v5739_v1  ;;  %v1241_v61 = vmax.f32 %v1216_v62, 0.0  ;;  %v5770_v34 = vmax.f32 %v5026_v10, %v5769_v8  ;;  %v1227_v60 = vadd.f32 %v5201_v13, %v5176_v15 }
 0x1fc   :  { %v943_v42 = vpop.f32.mrb[128].mxu0  ;;  %v1251_v8 = vmax.f32 %v1226_v43, 0.0  ;;  %v1228_v15 = vadd.f32 %v5201_v13, %v5182_v6  ;;  %v3186_v6 = vld [vmem:[%s5684_s5] sm:$0xff] }
 0x1fd   :  { %v1161_v17 = vmax.f32 %v943_v42, %v5759_v41  ;;  %3758 = vmatmul.mubr.msk.f32.vlgmr.msra.gmra.mrb[80].mxu1 %vm1259_vm3, %v1240_v40  ;;  %v945_v59 = vpop.f32.mrb[129].mxu0  ;;  %v1217_v7 = vadd.f32 %v5201_v13, %v1185_v46  ;;  %v3541_v40 = vld [vmem:[%s5682_s3 + $0x118] sm:$0xff]  ;;  %v5772_v42 = vld [vmem:[#allocation9_spill] sm:$0xff]  ;;  %v5773_v41 = vld [vmem:[#allocation26_spill] sm:$0xff] }
 0x1fe   :  { %3986 = vmatpush3.bf16.msra.mxu1 %v3985_v29  ;;  %3764 = vmatprep.mubr.msk.f32.mxu1 %vm4121_vm2, %v5737_v55  ;;  %v3540_v29 = vld [vmem:[%s5682_s3 + $0x110] sm:$0xff] }
 0x1ff   :  { %v1186_v35 = vmax.f32 %v5761_v53, %v1161_v17  ;;  %3987 = vmatprep.subr.bf16.mxu1 %v5739_v1  ;;  %v1242_v52 = vmax.f32 %v1217_v7, 0.0  ;;  %v4000_v10 = vpack.c.bf16 %v3541_v40, %v3540_v29  ;;  %v5774_v17 = vmax.f32 %v5772_v42, %v5773_v41  ;;  %v3192_v41 = vld [vmem:[%s5684_s5 + $0x30] sm:$0xff] }
 0x200   :  { %v948_v44 = vpop.f32.mrb[130].mxu0  ;;  %v1252_v40 = vmax.f32 %v1227_v60, 0.0 }
 0x201   :  { %v1162_v19 = vmax.f32 %v948_v44, %v5762_v54  ;;  %3765 = vmatmul.mubr.msk.f32.vlgmr.msra.gmra.mrb[82].mxu1 %vm1259_vm3, %v1241_v61  ;;  %v950_v45 = vpop.f32.mrb[131].mxu0  ;;  %v1218_v14 = vadd.f32 %v5201_v13, %v1186_v35  ;;  %v3544_v61 = vld [vmem:[%s5682_s3 + $0x128] sm:$0xff]  ;;  %v5776_v54 = vld [vmem:[#allocation27_spill] sm:$0xff] }
 0x202   :  { %3989 = vmatpush3.bf16.msra.mxu1 %v3988_v39  ;;  %3771 = vmatprep.mubr.msk.f32.mxu1 %vm4121_vm2, %v5737_v55  ;;  %v3543_v39 = vld [vmem:[%s5682_s3 + $0x120] sm:$0xff] }
 0x203   :  { %v1187_v3 = vmax.f32 %v5764_v11, %v1162_v19  ;;  %3990 = vmatprep.subr.bf16.mxu1 %v5739_v1  ;;  %v1243_v58 = vmax.f32 %v1218_v14, 0.0  ;;  %v4003_v25 = vpack.c.bf16 %v3544_v61, %v3543_v39  ;;  %v5777_v19 = vmax.f32 %v5034_v27, %v5776_v54  ;;  %v3194_v39 = vld [vmem:[%s5684_s5 + $0x40] sm:$0xff]  ;;  %v3195_v61 = vld [vmem:[%s5684_s5 + $0x48] sm:$0xff]  ;;  %v3200_v54 = vld [vmem:[%s5684_s5 + $0x70] sm:$0xff] }
 0x204   :  { %v953_v50 = vpop.f32.mrb[132].mxu0 }
 0x205   :  { %v1163_v18 = vmax.f32 %v953_v50, %v5765_v4  ;;  %3772 = vmatmul.mubr.msk.f32.vlgmr.msra.gmra.mrb[84].mxu1 %vm1259_vm3, %v1242_v52  ;;  %v955_v9 = vpop.f32.mrb[133].mxu0  ;;  %v1219_v22 = vadd.f32 %v5201_v13, %v1187_v3  ;;  %v3547_v52 = vld [vmem:[%s5682_s3 + $0x138] sm:$0xff] }
 0x206   :  { %3992 = vmatpush3.bf16.msra.mxu1 %v3991_v48  ;;  %3778 = vmatprep.mubr.msk.f32.mxu1 %vm4121_vm2, %v5737_v55  ;;  %v3546_v48 = vld [vmem:[%s5682_s3 + $0x130] sm:$0xff]  ;;  %v5779_v50 = vld [vmem:[#allocation28_spill] sm:$0xff] }
 0x207   :  { %v1188_v20 = vmax.f32 %v5767_v28, %v1163_v18  ;;  %3993 = vmatprep.subr.bf16.mxu1 %v5739_v1  ;;  %v1244_v12 = vmax.f32 %v1219_v22, 0.0  ;;  %v4006_v27 = vpack.c.bf16 %v3547_v52, %v3546_v48  ;;  %v5780_v4 = vmax.f32 %v5038_v37, %v5779_v50  ;;  %v3549_v9 = vld [vmem:[%s5682_s3 + $0x140] sm:$0xff]  ;;  %v3553_v28 = vld [vmem:[%s5682_s3 + $0x158] sm:$0xff] }
 0x208   :  { %v958_v56 = vpop.f32.mrb[134].mxu0 }
 0x209   :  { %v1164_v32 = vmax.f32 %v958_v56, %v5768_v26  ;;  %3779 = vmatmul.mubr.msk.f32.vlgmr.msra.gmra.mrb[86].mxu1 %vm1259_vm3, %v1243_v58  ;;  %v960_v63 = vpop.f32.mrb[135].mxu0  ;;  %v1220_v33 = vadd.f32 %v5201_v13, %v1188_v20  ;;  %v4012_v20 = vpack.c.bf16 %v3553_v28, %v3552_v51  ;;  %v3555_v56 = vld [vmem:[%s5682_s3 + $0x160] sm:$0xff]  ;;  %v3556_v26 = vld [vmem:[%s5682_s3 + $0x168] sm:$0xff] }
 0x20a   :  { %3995 = vmatpush3.bf16.msra.mxu1 %v3994_v57  ;;  %3785 = vmatprep.mubr.msk.f32.mxu1 %vm4121_vm2, %v5737_v55  ;;  %v3550_v57 = vld [vmem:[%s5682_s3 + $0x148] sm:$0xff]  ;;  %v1250_v63 = vmax.f32 %v1225_v36, 0.0 }
 0x20b   :  { %v1189_v0 = vmax.f32 %v5770_v34, %v1164_v32  ;;  %3996 = vmatprep.subr.bf16.mxu1 %v5739_v1  ;;  %v1245_v16 = vmax.f32 %v1220_v33, 0.0  ;;  %v4009_v58 = vpack.c.bf16 %v3550_v57, %v3549_v9  ;;  %v4015_v32 = vpack.c.bf16 %v3556_v26, %v3555_v56  ;;  %v3561_v34 = vld [vmem:[%s5682_s3 + $0x180] sm:$0xff] }
 0x20c   :  { %v963_v62 = vpop.f32.mrb[136].mxu0 }
 0x20d   :  { %v1165_v31 = vmax.f32 %v963_v62, %v5771_v30  ;;  %3786 = vmatmul.mubr.msk.f32.vlgmr.msra.gmra.mrb[88].mxu1 %vm1259_vm3, %v1244_v12  ;;  %v965_v46 = vpop.f32.mrb[137].mxu0  ;;  %v1221_v38 = vadd.f32 %v5201_v13, %v1189_v0  ;;  %v3559_v12 = vld [vmem:[%s5682_s3 + $0x178] sm:$0xff]  ;;  %v3562_v0 = vld [vmem:[%s5682_s3 + $0x188] sm:$0xff]  ;;  %v1253_v62 = vmax.f32 %v1228_v15, 0.0 }
 0x20e   :  { %3998 = vmatpush3.bf16.msra.mxu1 %v3997_v2  ;;  %3792 = vmatprep.mubr.msk.f32.mxu1 %vm4121_vm2, %v5737_v55  ;;  %v3558_v2 = vld [vmem:[%s5682_s3 + $0x170] sm:$0xff]  ;;  %v4021_v29 = vpack.c.bf16 %v3562_v0, %v3561_v34  ;;  %v3189_v46 = vld [vmem:[%s5684_s5 + $0x18] sm:$0xff] }
 0x20f   :  { %v1190_v59 = vmax.f32 %v5774_v17, %v1165_v31  ;;  %3999 = vmatprep.subr.bf16.mxu1 %v5739_v1  ;;  %v1246_v47 = vmax.f32 %v1221_v38, 0.0  ;;  %v4018_v33 = vpack.c.bf16 %v3559_v12, %v3558_v2  ;;  %v3188_v31 = vld [vmem:[%s5684_s5 + $0x10] sm:$0xff]  ;;  %v3191_v38 = vld [vmem:[%s5684_s5 + $0x28] sm:$0xff]  ;;  %v3193_v17 = vld [vmem:[%s5684_s5 + $0x38] sm:$0xff] }
 0x210   :  { %v968_v7 = vpop.f32.mrb[138].mxu0 }
 0x211   :  { %v1166_v53 = vmax.f32 %v968_v7, %v5775_v5  ;;  %3793 = vmatmul.mubr.msk.f32.vlgmr.msra.gmra.mrb[90].mxu1 %vm1259_vm3, %v1245_v16  ;;  %v970_v35 = vpop.f32.mrb[139].mxu0  ;;  %v1222_v44 = vadd.f32 %v5201_v13, %v1190_v59  ;;  %v3190_v16 = vld [vmem:[%s5684_s5 + $0x20] sm:$0xff]  ;;  %v4033_v59 = vpack.c.bf16 %v3193_v17, %v3192_v41  ;;  %v4036_v7 = vpack.c.bf16 %v3195_v61, %v3194_v39  ;;  %v3196_v5 = vld [vmem:[%s5684_s5 + $0x50] sm:$0xff] }
 0x212   :  { %4001 = vmatpush3.bf16.msra.mxu1 %v4000_v10  ;;  %3799 = vmatprep.mubr.msk.f32.mxu1 %vm4121_vm2, %v5737_v55  ;;  %v4027_v10 = vpack.c.bf16 %v3189_v46, %v3188_v31  ;;  %v4030_v42 = vpack.c.bf16 %v3191_v38, %v3190_v16 }
 0x213   :  { %v1191_v45 = vmax.f32 %v5777_v19, %v1166_v53  ;;  %4002 = vmatprep.subr.bf16.mxu1 %v5739_v1  ;;  %v1247_v23 = vmax.f32 %v1222_v44, 0.0  ;;  %v3197_v53 = vld [vmem:[%s5684_s5 + $0x58] sm:$0xff] }
 0x214   :  { %v973_v14 = vpop.f32.mrb[140].mxu0  ;;  %v4039_v35 = vpack.c.bf16 %v3197_v53, %v3196_v5  ;;  %v3201_v19 = vld [vmem:[%s5684_s5 + $0x78] sm:$0xff] }
 0x215   :  { %v1167_v11 = vmax.f32 %v973_v14, %v5778_v49  ;;  %3800 = vmatmul.mubr.msk.f32.vlgmr.msra.gmra.mrb[92].mxu1 %vm1259_vm3, %v1246_v47  ;;  %v975_v3 = vpop.f32.mrb[141].mxu0  ;;  %v1223_v24 = vadd.f32 %v5201_v13, %v1191_v45  ;;  %v3199_v47 = vld [vmem:[%s5684_s5 + $0x68] sm:$0xff]  ;;  %v4045_v45 = vpack.c.bf16 %v3201_v19, %v3200_v54 }
 0x216   :  { %4004 = vmatpush3.bf16.msra.mxu1 %v4003_v25  ;;  %3806 = vmatprep.mubr.msk.f32.mxu1 %vm4121_vm2, %v5737_v55  ;;  %v3198_v25 = vld [vmem:[%s5684_s5 + $0x60] sm:$0xff] }
 0x217   :  { %v1192_v18 = vmax.f32 %v5780_v4, %v1167_v11  ;;  %4005 = vmatprep.subr.bf16.mxu1 %v5739_v1  ;;  %v1248_v22 = vmax.f32 %v1223_v24, 0.0  ;;  %v4042_v44 = vpack.c.bf16 %v3199_v47, %v3198_v25 }
 0x219   :  { %3807 = vmatmul.mubr.msk.f32.vlgmr.msra.gmra.mrb[94].mxu1 %vm1259_vm3, %v1247_v23  ;;  %v1224_v37 = vadd.f32 %v5201_v13, %v1192_v18  ;;  %v3187_v13 = vld [vmem:[%s5684_s5 + $0x8] sm:$0xff] }
 0x21a   :  { %4007 = vmatpush3.bf16.msra.mxu1 %v4006_v27  ;;  %3813 = vmatprep.mubr.msk.f32.mxu1 %vm4121_vm2, %v5737_v55  ;;  %v4024_v30 = vpack.c.bf16 %v3187_v13, %v3186_v6 }
 0x21b   :  { %4008 = vmatprep.subr.bf16.mxu1 %v5739_v1  ;;  %v1249_v21 = vmax.f32 %v1224_v37, 0.0 }
 0x21d   :  { %3814 = vmatmul.mubr.msk.f32.vlgmr.msra.gmra.mrb[96].mxu1 %vm1259_vm3, %v1248_v22 }
 0x21e   :  { %4010 = vmatpush3.bf16.msra.mxu1 %v4009_v58  ;;  %3820 = vmatprep.mubr.msk.f32.mxu1 %vm4121_vm2, %v5737_v55 }
 0x21f   :  { %4011 = vmatprep.subr.bf16.mxu1 %v5739_v1 }
 0x221   :  { %3821 = vmatmul.mubr.msk.f32.vlgmr.msra.gmra.mrb[98].mxu1 %vm1259_vm3, %v1249_v21 }
 0x222   :  { %4013 = vmatpush3.bf16.msra.mxu1 %v4012_v20  ;;  %3827 = vmatprep.mubr.msk.f32.mxu1 %vm4121_vm2, %v5737_v55 }
 0x223   :  { %4014 = vmatprep.subr.bf16.mxu1 %v5739_v1 }
 0x225   :  { %3828 = vmatmul.mubr.msk.f32.vlgmr.msra.gmra.mrb[100].mxu1 %vm1259_vm3, %v1250_v63 }
 0x226   :  { %4016 = vmatpush3.bf16.msra.mxu1 %v4015_v32  ;;  %3834 = vmatprep.mubr.msk.f32.mxu1 %vm4121_vm2, %v5737_v55 }
 0x227   :  { %4017 = vmatprep.subr.bf16.mxu1 %v5739_v1 }
 0x229   :  { %3835 = vmatmul.mubr.msk.f32.vlgmr.msra.gmra.mrb[102].mxu1 %vm1259_vm3, %v1251_v8 }
 0x22a   :  { %4019 = vmatpush3.bf16.msra.mxu1 %v4018_v33  ;;  %3841 = vmatprep.mubr.msk.f32.mxu1 %vm4121_vm2, %v5737_v55 }
 0x22b   :  { %4020 = vmatprep.subr.bf16.mxu1 %v5739_v1 }
 0x22d   :  { %3842 = vmatmul.mubr.msk.f32.vlgmr.msra.gmra.mrb[104].mxu1 %vm1259_vm3, %v1252_v40 }
 0x22e   :  { %4022 = vmatpush3.bf16.msra.mxu1 %v4021_v29  ;;  %3848 = vmatprep.mubr.msk.f32.mxu1 %vm4121_vm2, %v5737_v55 }
 0x22f   :  { %4023 = vmatprep.subr.bf16.mxu1 %v5739_v1 }
 0x231   :  { %3849 = vmatmul.mubr.msk.f32.vlgmr.msra.gmra.mrb[106].mxu1 %vm1259_vm3, %v1253_v62 }
 0x232   :  { %3883 = vmatprep.mubr.msk.f32.mxu1 %vm4121_vm2, %v5737_v55  ;;  %4025 = vmatpush3.bf16.msra.mxu1 %v4024_v30 }
 0x233   :  { %4026 = vmatprep.subr.bf16.mxu1 %v5739_v1 }
 0x236   :  { %4028 = vmatpush3.bf16.msra.mxu1 %v4027_v10 }
 0x237   :  { %4029 = vmatprep.subr.bf16.mxu1 %v5739_v1 }
 0x23a   :  { %4031 = vmatpush3.bf16.msra.mxu1 %v4030_v42 }
 0x23b   :  { %4032 = vmatprep.subr.bf16.mxu1 %v5739_v1 }
 0x23e   :  { %4034 = vmatpush3.bf16.msra.mxu1 %v4033_v59 }
 0x23f   :  { %4035 = vmatprep.subr.bf16.mxu1 %v5739_v1 }
 0x242   :  { %4037 = vmatpush3.bf16.msra.mxu1 %v4036_v7 }
 0x243   :  { %4038 = vmatprep.subr.bf16.mxu1 %v5739_v1 }
 0x246   :  { %4040 = vmatpush3.bf16.msra.mxu1 %v4039_v35 }
 0x247   :  { %4041 = vmatprep.subr.bf16.mxu1 %v5739_v1 }
 0x24a   :  { %4043 = vmatpush3.bf16.msra.mxu1 %v4042_v44 }
 0x24b   :  { %4044 = vmatprep.subr.bf16.mxu1 %v5739_v1 }
 0x24e   :  { %4046 = vmatpush3.bf16.msra.mxu1 %v4045_v45 }
 0x24f   :  { %4047 = vmatprep.subr.bf16.mxu1 %v5739_v1 }
 0x2a4   :  { %v1329_v48 = vpop.f32.mrb[58].mxu1 }
 0x2a5   :  { %v3682_v52 = vpop.f32.mrb[59].mxu1 }
 0x2a8   :  { %v1402_v14 = vpop.f32.mrb[60].mxu1 }
 0x2a9   :  { %v1403_v49 = vadd.f32 %v1402_v14, %v1329_v48  ;;  %v3689_v11 = vpop.f32.mrb[61].mxu1 }
 0x2ac   :  { %v1478_v3 = vpop.f32.mrb[62].mxu1 }
 0x2ad   :  { %v1482_v27 = vadd.f32 %v1478_v3, %v1403_v49  ;;  %v3696_v23 = vpop.f32.mrb[63].mxu1 }
 0x2b0   :  { %v1555_v24 = vpop.f32.mrb[64].mxu1 }
 0x2b1   :  { %v1559_v50 = vadd.f32 %v1555_v24, %v1482_v27  ;;  %v3703_v4 = vpop.f32.mrb[65].mxu1 }
 0x2b2   :  { %v3564_v4 = vld [vmem:[%s5683_s4] ss:$0 sm:$0xff] }
 0x2b4   :  { %v1632_v18 = vpop.f32.mrb[66].mxu1 }
 0x2b5   :  { %v1636_v9 = vadd.f32 %v1632_v18, %v1559_v50  ;;  %v3710_v57 = vpop.f32.mrb[67].mxu1 }
 0x2b6   :  { %v3280_v57 = vld [vmem:[%s5686_s7] sm:$0xff] }
 0x2b8   :  { %v1709_v58 = vpop.f32.mrb[68].mxu1 }
 0x2b9   :  { %v1713_v22 = vadd.f32 %v1709_v58, %v1636_v9  ;;  %v3717_v37 = vpop.f32.mrb[69].mxu1  ;;  %v3281_v58 = vld [vmem:[%s5686_s7 + $0x8] sm:$0xff] }
 0x2ba   :  { %v4048_v37 = vpack.c.bf16 %v3281_v58, %v3280_v57 }
 0x2bc   :  { %v1786_v51 = vpop.f32.mrb[70].mxu1 }
 0x2bd   :  { %v1790_v28 = vadd.f32 %v1786_v51, %v1713_v22  ;;  %v3724_v20 = vpop.f32.mrb[71].mxu1 }
 0x2be   :  { %v3283_v20 = vld [vmem:[%s5686_s7 + $0x18] sm:$0xff] }
 0x2c0   :  { %v1863_v36 = vpop.f32.mrb[72].mxu1 }
 0x2c1   :  { %v1867_v21 = vadd.f32 %v1863_v36, %v1790_v28  ;;  %v3731_v56 = vpop.f32.mrb[73].mxu1  ;;  %v3282_v28 = vld [vmem:[%s5686_s7 + $0x10] sm:$0xff] }
 0x2c2   :  { %v4051_v36 = vpack.c.bf16 %v3283_v20, %v3282_v28  ;;  %v3285_v56 = vld [vmem:[%s5686_s7 + $0x28] sm:$0xff] }
 0x2c4   :  { %v1940_v26 = vpop.f32.mrb[74].mxu1 }
 0x2c5   :  { %v1944_v32 = vadd.f32 %v1940_v26, %v1867_v21  ;;  %v3738_v63 = vpop.f32.mrb[75].mxu1  ;;  %v3284_v21 = vld [vmem:[%s5686_s7 + $0x20] sm:$0xff] }
 0x2c6   :  { %v4054_v26 = vpack.c.bf16 %v3285_v56, %v3284_v21 }
 0x2c8   :  { %v2017_v43 = vpop.f32.mrb[76].mxu1 }
 0x2c9   :  { %v2021_v2 = vadd.f32 %v2017_v43, %v1944_v32  ;;  %v3745_v12 = vpop.f32.mrb[77].mxu1  ;;  %v3286_v32 = vld [vmem:[%s5686_s7 + $0x30] sm:$0xff]  ;;  %v3288_v43 = vld [vmem:[%s5686_s7 + $0x40] sm:$0xff] }
 0x2cc   :  { %v2094_v33 = vpop.f32.mrb[78].mxu1 }
 0x2cd   :  { %v2098_v8 = vadd.f32 %v2094_v33, %v2021_v2  ;;  %v3752_v60 = vpop.f32.mrb[79].mxu1  ;;  %v3289_v2 = vld [vmem:[%s5686_s7 + $0x48] sm:$0xff]  ;;  %v3290_v33 = vld [vmem:[%s5686_s7 + $0x50] sm:$0xff] }
 0x2ce   :  { %v4060_v12 = vpack.c.bf16 %v3289_v2, %v3288_v43 }
 0x2d0   :  { %v2171_v34 = vpop.f32.mrb[80].mxu1 }
 0x2d1   :  { %v2175_v0 = vadd.f32 %v2171_v34, %v2098_v8  ;;  %v3759_v29 = vpop.f32.mrb[81].mxu1  ;;  %v3291_v8 = vld [vmem:[%s5686_s7 + $0x58] sm:$0xff]  ;;  %v3292_v34 = vld [vmem:[%s5686_s7 + $0x60] sm:$0xff] }
 0x2d2   :  { %v4063_v60 = vpack.c.bf16 %v3291_v8, %v3290_v33 }
 0x2d4   :  { %v2248_v40 = vpop.f32.mrb[82].mxu1 }
 0x2d5   :  { %v2252_v15 = vadd.f32 %v2248_v40, %v2175_v0  ;;  %v3766_v62 = vpop.f32.mrb[83].mxu1  ;;  %v3293_v0 = vld [vmem:[%s5686_s7 + $0x68] sm:$0xff]  ;;  %v3294_v40 = vld [vmem:[%s5686_s7 + $0x70] sm:$0xff] }
 0x2d6   :  { %v4066_v29 = vpack.c.bf16 %v3293_v0, %v3292_v34 }
 0x2d8   :  { %v2325_v6 = vpop.f32.mrb[84].mxu1 }
 0x2d9   :  { %v2329_v13 = vadd.f32 %v2325_v6, %v2252_v15  ;;  %v3773_v30 = vpop.f32.mrb[85].mxu1  ;;  %v3295_v15 = vld [vmem:[%s5686_s7 + $0x78] sm:$0xff]  ;;  %v3565_v6 = vld [vmem:[%s5685_s6] ss:$0 sm:$0xff] }
 0x2da   :  { %v4069_v62 = vpack.c.bf16 %v3295_v15, %v3294_v40 }
 0x2dc   :  { %v2402_v31 = vpop.f32.mrb[86].mxu1 }
 0x2dd   :  { %v2406_v46 = vadd.f32 %v2402_v31, %v2329_v13  ;;  %v3780_v10 = vpop.f32.mrb[87].mxu1 }
 0x2e0   :  { %v2479_v16 = vpop.f32.mrb[88].mxu1 }
 0x2e1   :  { %v2483_v38 = vadd.f32 %v2479_v16, %v2406_v46  ;;  %v3787_v42 = vpop.f32.mrb[89].mxu1 }
 0x2e4   :  { %v2556_v41 = vpop.f32.mrb[90].mxu1 }
 0x2e5   :  { %v2560_v17 = vadd.f32 %v2556_v41, %v2483_v38  ;;  %v3794_v59 = vpop.f32.mrb[91].mxu1 }
 0x2e8   :  { %v2633_v39 = vpop.f32.mrb[92].mxu1 }
 0x2e9   :  { %v2637_v61 = vadd.f32 %v2633_v39, %v2560_v17  ;;  %v3801_v7 = vpop.f32.mrb[93].mxu1 }
 0x2ec   :  { %v2710_v5 = vpop.f32.mrb[94].mxu1 }
 0x2ed   :  { %v2714_v53 = vadd.f32 %v2710_v5, %v2637_v61  ;;  %v3808_v35 = vpop.f32.mrb[95].mxu1 }
 0x2f0   :  { %v2787_v25 = vpop.f32.mrb[96].mxu1 }
 0x2f1   :  { %v2791_v47 = vadd.f32 %v2787_v25, %v2714_v53  ;;  %v3815_v44 = vpop.f32.mrb[97].mxu1 }
 0x2f4   :  { %v2864_v54 = vpop.f32.mrb[98].mxu1 }
 0x2f5   :  { %v2868_v19 = vadd.f32 %v2864_v54, %v2791_v47  ;;  %v3822_v45 = vpop.f32.mrb[99].mxu1 }
 0x2f8   :  { %v2941_v48 = vpop.f32.mrb[100].mxu1 }
 0x2f9   :  { %v2945_v52 = vadd.f32 %v2941_v48, %v2868_v19  ;;  %v3829_v14 = vpop.f32.mrb[101].mxu1 }
 0x2fc   :  { %v3018_v49 = vpop.f32.mrb[102].mxu1 }
 0x2fd   :  { %v3022_v11 = vadd.f32 %v3018_v49, %v2945_v52  ;;  %v3836_v3 = vpop.f32.mrb[103].mxu1 }
 0x300   :  { %v3095_v27 = vpop.f32.mrb[104].mxu1 }
 0x301   :  { %v3099_v23 = vadd.f32 %v3095_v27, %v3022_v11  ;;  %v3843_v24 = vpop.f32.mrb[105].mxu1 }
 0x304   :  { %v3172_v50 = vpop.f32.mrb[106].mxu1 }
 0x305   :  { %v3176_v18 = vadd.f32 %v3172_v50, %v3099_v23  ;;  %v3850_v9 = vpop.f32.mrb[107].mxu1 }
 0x307   :  { %v3184_v22 = vadd.f32 %v3564_v4, %v3176_v18 }
 0x309   :  { %v3185_v51 = vmax.f32 %v3184_v22, 0.0 }
 0x30b   :  { %3884 = vmatmul.mubr.f32.vlgmr.msra.gmra.mrb[108].mxu1 %v3185_v51 }
 0x30c   :  { %4049 = vmatpush3.bf16.msra.mxu1 %v4048_v37  ;;  %3918 = vmatprep.mubr.msk.f32.mxu1 %vm4121_vm2, %v5737_v55  ;;  %v3287_v55 = vld [vmem:[%s5686_s7 + $0x38] sm:$0xff]  ;;  %s4095_s7 = scalar_lea.vmem %s3382_s28, 32 }
 0x30d   :  { %4050 = vmatprep.subr.bf16.mxu1 %v5739_v1  ;;  %v4057_v63 = vpack.c.bf16 %v3287_v55, %v3286_v32  ;;  %p4096_p0 = scmp.ne.s32.totalorder %s3382_s28, %s4095_s7  ;;  %p4101_p2 = scmp.lt.s32.totalorder %s4095_s7, %s4095_s7 }
 0x30f   :  { %p4102_p3 = por %p4101_p2, %p4100_p1 }
 0x310   :  { %4052 = vmatpush3.bf16.msra.mxu1 %v4051_v36 }
 0x311   :  { %4053 = vmatprep.subr.bf16.mxu1 %v5739_v1  ;;  %p4103_p4 = pnand %p4102_p3, %p4096_p0 }
 0x314   :  { %4055 = vmatpush3.bf16.msra.mxu1 %v4054_v26 }
 0x315   :  { %4056 = vmatprep.subr.bf16.mxu1 %v5739_v1 }
 0x318   :  { %4058 = vmatpush3.bf16.msra.mxu1 %v4057_v63 }
 0x319   :  { %4059 = vmatprep.subr.bf16.mxu1 %v5739_v1 }
 0x31c   :  { %4061 = vmatpush3.bf16.msra.mxu1 %v4060_v12 }
 0x31d   :  { %4062 = vmatprep.subr.bf16.mxu1 %v5739_v1 }
 0x320   :  { %4064 = vmatpush3.bf16.msra.mxu1 %v4063_v60 }
 0x321   :  { %4065 = vmatprep.subr.bf16.mxu1 %v5739_v1 }
 0x324   :  { %4067 = vmatpush3.bf16.msra.mxu1 %v4066_v29 }
 0x325   :  { %4068 = vmatprep.subr.bf16.mxu1 %v5739_v1  ;;  %v3566_v1 = vld [vmem:[%s5687_s8] ss:$0 sm:$0xff] }
 0x328   :  { %4070 = vmatpush3.bf16.msra.mxu1 %v4069_v62 }
 0x3de   :  { %v3275_v13 = vpop.f32.mrb[108].mxu1 }
 0x3df   :  { %v3276_v30 = vadd.f32 %v3565_v6, %v3275_v13  ;;  %v3885_v31 = vpop.f32.mrb[109].mxu1 }
 0x3e1   :  { %v3279_v46 = vmax.f32 %v3276_v30, 0.0 }
 0x3e3   :  { %3919 = vmatmul.mubr.f32.vlgmr.msra.gmra.mrb[110].mxu1 %v3279_v46 }
 0x4b6   :  { %v3369_v10 = vpop.f32.mrb[110].mxu1 }
 0x4b7   :  { %v3370_v16 = vadd.f32 %v3566_v1, %v3369_v10  ;;  %v3920_v38 = vpop.f32.mrb[111].mxu1 }
 0x4b9   :  { %3374 = vst.msk [vmem:[#allocation2] sm:$0x3] %vm3373_vm4, %v3370_v16 }
 0x4ba   :  { %4106 = shalt.err (!%p4103_p4)
}
 0x4bb   :  { %s4107_s30 = scalar_lea.hbm %s5688_s9, 32 }
 0x4bc   :  { %p4108_p5 = scmp.ne.s32.totalorder %s5688_s9, %s4107_s30  ;;  %p4111_p6 = scmp.lt.u32.totalorder %s4107_s30, %s5688_s9 }
 0x4be   :  { %p4113_p7 = pnand %p4111_p6, %p4108_p5 }
 0x4c0   :  { %4116 = shalt.err (!%p4113_p7)
}
 0x4c1   :  { %3384 = dma.vmem_to_hbm [thread:$0]  %s3382_s28, 32, %s5688_s9, [#allocation3]  }
 0x4c2   :  { %4117 = dma.done.wait [#allocation3], 32  }
 0x4c3   :  { %4118 = vsyncadd [#allocation3], 4294967264 }
 0x4c4   :  { %3388 = vsyncpa [#allocation3], 1 }

</bundles_post_ra>
